<compile_context>
chip_gen: v6e
topology: v6e:2x2x1
jax: 0.10.0
libtpu: 0.0.40
codegen_flags: <defaults>
</compile_context>

<pallas_src>
import jax
import jax.numpy as jnp
from jax import lax
from jax.experimental import pallas as pl
from jax.experimental.pallas import tpu as pltpu

INPUT = 28   # fixed by the module (LSTM input_size=28)
H = 128      # hidden_size=128


# ----------------------------- Pallas kernel ------------------------------ #
def bayesian_rnn_kernel(x_ref, wih1_ref, b1_ref, whh1_ref, w2_ref, b2_ref,
                        wlin_ref, blin_ref, out_ref, pre1_ref):
    """Single-program kernel.

    x_ref   : (T*B, 28) f32   time-major rows (row index = t*B + b)
    wih1_ref: (28, 4H)  bf16  lstm1 W_ih^T
    b1_ref  : (1, 4H)   f32   lstm1 bias_ih + bias_hh
    whh1_ref: (H, 4H)   bf16  lstm1 W_hh^T
    w2_ref  : (2H, 4H)  bf16  [lstm2 W_ih^T ; lstm2 W_hh^T] stacked on K
    b2_ref  : (1, 4H)   f32   lstm2 bias_ih + bias_hh
    wlin_ref: (1, H)    f32   linear weight row
    blin_ref: (1, 1)    f32   linear bias
    out_ref : (B, 1)    f32
    pre1_ref: (T*B, 4H) f32   VMEM scratch: hoisted layer-1 input projection
    """
    B = out_ref.shape[0]
    T = x_ref.shape[0] // B
    bf16 = jnp.bfloat16
    f32 = jnp.float32

    # ---- Hoisted layer-1 input projection + bias: one matmul for all timesteps ----
    pre1_ref[...] = (
        jnp.dot(x_ref[...].astype(bf16), wih1_ref[...],
                preferred_element_type=f32)
        + b1_ref[...])

    # ---- Hoist layer-2 bias broadcast out of the loop (computed once) ----
    b2_full = jnp.broadcast_to(b2_ref[...], (B, 4 * H))

    def gates_to_hc(gates, c_prev):
        # PyTorch gate order: i, f, g, o. Elementwise math stays f32.
        i_g = jax.nn.sigmoid(gates[:, 0 * H:1 * H])
        g_g = jnp.tanh(gates[:, 2 * H:3 * H])
        o_g = jax.nn.sigmoid(gates[:, 3 * H:4 * H])
        if c_prev is None:
            # First step: c_prev == 0 exactly, so f_g * c_prev vanishes.
            c_new = i_g * g_g
        else:
            f_g = jax.nn.sigmoid(gates[:, 1 * H:2 * H])
            c_new = f_g * c_prev + i_g * g_g
        h_new = o_g * jnp.tanh(c_new)
        return h_new, c_new

    h1_b = None  # bf16 layer-1 hidden (reused by layer-2 and next-step recurrence)
    h2_b = None  # bf16 layer-2 hidden (reused by next-step layer-2 matmul)
    h2 = None    # f32 layer-2 hidden (needed for the final Linear)
    c1 = None
    c2 = None

    # Fully unrolled time loop: states stay in vregs; the scheduler overlaps the MXU /
    # EUP / VPU work of adjacent timesteps across the straight-line code.
    for t in range(T):
        pre_t = pre1_ref[t * B:(t + 1) * B, :]

        # ---- Layer 1 ----
        if t == 0:
            # h1_prev == 0: recurrent matmul is exactly zero, skip it.
            g1 = pre_t
        else:
            g1 = pre_t + jnp.dot(h1_b, whh1_ref[...], preferred_element_type=f32)
        h1, c1 = gates_to_hc(g1, c1)
        h1_b = h1.astype(bf16)

        # dropout(p=0.2) between the LSTMs: identity in eval mode.

        # ---- Layer 2: fused [h1_t, h2_{t-1}] @ [W_ih2 ; W_hh2] (K = 256) ----
        if t == 0:
            # h2_prev == 0: only the W_ih2 half contributes (K = 128, no concat).
            g2 = (jnp.dot(h1_b, w2_ref[0:H, :], preferred_element_type=f32)
                  + b2_full)
        else:
            xh = jnp.concatenate([h1_b, h2_b], axis=-1)
            g2 = jnp.dot(xh, w2_ref[...], preferred_element_type=f32) + b2_full
        h2, c2 = gates_to_hc(g2, c2)
        h2_b = h2.astype(bf16)

    # Final dropout (identity) + Linear(128 -> 1) via VPU multiply + lane reduction
    # (avoids a degenerate N=1 MXU matmul).
    out_ref[...] = (jnp.sum(h2 * wlin_ref[...], axis=-1, keepdims=True)
                    + blin_ref[...])


# ------------------------------- Wrapper ----------------------------------- #
def prepare_kernel_params(params):
    """Fuse / transpose / cast the transposed-PyTorch-layout params for the kernel."""
    wih1, whh1, b1, wih2, whh2, b2, wlin, blin = params
    return (
        wih1.astype(jnp.bfloat16),                                    # (28, 4H)
        b1,                                                           # (1, 4H)
        whh1.astype(jnp.bfloat16),                                    # (H, 4H)
        jnp.concatenate([wih2, whh2], axis=0).astype(jnp.bfloat16),   # (2H, 4H)
        b2,                                                           # (1, 4H)
        wlin.T,                                                       # (1, H)
        blin,                                                         # (1, 1)
    )


def bayesian_rnn_forward(x, params):
    """x: (B, T, INPUT) float32, batch-first (PyTorch convention)."""
    B, T, _ = x.shape
    kp = prepare_kernel_params(params)
    # Time-major rows so each timestep's pre-gates are a contiguous sublane-aligned slab.
    x2d = jnp.transpose(x, (1, 0, 2)).reshape(T * B, INPUT)

    vmem = pl.BlockSpec(memory_space=pltpu.MemorySpace.VMEM)
    out = pl.pallas_call(
        bayesian_rnn_kernel,
        out_shape=jax.ShapeDtypeStruct((B, 1), jnp.float32),
        in_specs=[vmem] * 8,
        out_specs=vmem,
        scratch_shapes=[pltpu.VMEM((T * B, 4 * H), jnp.float32)],  # hoisted pre-gates
    )(x2d, *kp)
    return out


# ---------------------- Deterministic parameter init ----------------------- #
def init_params(key):
    """PyTorch-style uniform(-1/sqrt(H), 1/sqrt(H)); weights stored transposed, f32."""
    k = 1.0 / jnp.sqrt(jnp.float32(H))
    keys = jax.random.split(key, 10)

    def u(kk, shape):
        return jax.random.uniform(kk, shape, jnp.float32, minval=-k, maxval=k)

    wih1 = u(keys[0], (INPUT, 4 * H))       # lstm1 weight_ih^T
    whh1 = u(keys[1], (H, 4 * H))           # lstm1 weight_hh^T
    b1 = u(keys[2], (1, 4 * H)) + u(keys[3], (1, 4 * H))   # bias_ih + bias_hh

    wih2 = u(keys[4], (H, 4 * H))           # lstm2 weight_ih^T
    whh2 = u(keys[5], (H, 4 * H))           # lstm2 weight_hh^T
    b2 = u(keys[6], (1, 4 * H)) + u(keys[7], (1, 4 * H))

    wlin = u(keys[8], (H, 1))               # linear weight^T
    blin = u(keys[9], (1, 1))               # linear bias
    return (wih1, whh1, b1, wih2, whh2, b2, wlin, blin)


# --------------------------- Pure-JAX reference ----------------------------- #
def reference_forward(x, params):
    """Reference mirroring the kernel numerics: bf16 matmul operands, f32 accumulate,
    f32 elementwise (bf16 operand rounding deviates from a pure-f32 PyTorch forward by
    ~1e-3 at these weight scales)."""
    wih1, whh1, b1, wih2, whh2, b2, wlin, blin = params
    B, T, _ = x.shape
    bf = jnp.bfloat16

    def lstm(xs_btk, wih, whh, b):
        wih_b, whh_b = wih.astype(bf), whh.astype(bf)

        def cell(carry, x_t):
            h, c = carry
            gates = (jnp.dot(x_t.astype(bf), wih_b, preferred_element_type=jnp.float32)
                     + jnp.dot(h.astype(bf), whh_b, preferred_element_type=jnp.float32)
                     + b)
            i_g = jax.nn.sigmoid(gates[:, 0 * H:1 * H])
            f_g = jax.nn.sigmoid(gates[:, 1 * H:2 * H])
            g_g = jnp.tanh(gates[:, 2 * H:3 * H])
            o_g = jax.nn.sigmoid(gates[:, 3 * H:4 * H])
            c = f_g * c + i_g * g_g
            h = o_g * jnp.tanh(c)
            return (h, c), h

        init = (jnp.zeros((B, H), jnp.float32), jnp.zeros((B, H), jnp.float32))
        _, hs = lax.scan(cell, init, jnp.transpose(xs_btk, (1, 0, 2)))
        return jnp.transpose(hs, (1, 0, 2))

    h1s = lstm(x, wih1, whh1, b1)
    h2s = lstm(h1s, wih2, whh2, b2)
    last = h2s[:, -1, :]
    return last @ wlin + blin


# ---------------------------------- Main ------------------------------------ #
if __name__ == "__main__":
    key = jax.random.PRNGKey(0)
    k_x, k_p = jax.random.split(key)

    B, T = 8, 8
    x = jax.random.normal(k_x, (B, T, INPUT), dtype=jnp.float32)
    params = init_params(k_p)

    out = bayesian_rnn_forward(x, params)
    out = jax.block_until_ready(out)

    ref = reference_forward(x, params)
    assert out.shape == (B, 1), out.shape
    max_err = jnp.max(jnp.abs(out - ref))
    assert jnp.allclose(out, ref, atol=1e-3, rtol=1e-3), f"max abs err {max_err}"

    print("KERNEL_OK")
</pallas_src>

<mosaic_0001>
module attributes {stable_mosaic.version = 11 : i64} {
  func.func @bayesian_rnn_kernel(%arg0: memref<64x28xf32, #tpu.memory_space<vmem>>, %arg1: memref<28x512xbf16, #tpu.memory_space<vmem>>, %arg2: memref<1x512xf32, #tpu.memory_space<vmem>>, %arg3: memref<128x512xbf16, #tpu.memory_space<vmem>>, %arg4: memref<256x512xbf16, #tpu.memory_space<vmem>>, %arg5: memref<1x512xf32, #tpu.memory_space<vmem>>, %arg6: memref<1x128xf32, #tpu.memory_space<vmem>>, %arg7: memref<1x1xf32, #tpu.memory_space<vmem>>, %arg8: memref<8x1xf32, #tpu.memory_space<vmem>>, %arg9: memref<64x512xf32, #tpu.memory_space<vmem>>) attributes {dimension_semantics = [], scalar_prefetch = 0 : i64, scratch_operands = 1 : i64, tpu.core_type = #tpu.core_type<tc>} {
    %c0 = arith.constant 0 : index
    %c0_0 = arith.constant 0 : index
    %0 = vector.load %arg0[%c0, %c0_0] : memref<64x28xf32, #tpu.memory_space<vmem>>, vector<64x28xf32>
    %1 = arith.truncf %0 : vector<64x28xf32> to vector<64x28xbf16>
    %c0_1 = arith.constant 0 : index
    %c0_2 = arith.constant 0 : index
    %2 = vector.load %arg1[%c0_1, %c0_2] : memref<28x512xbf16, #tpu.memory_space<vmem>>, vector<28x512xbf16>
    %cst = arith.constant dense<0.000000e+00> : vector<64x512xf32>
    %3 = tpu.matmul %1, %2, %cst {dimension_numbers = #tpu.dot_dimension_numbers<[1], [0], [0], [1], [0, 0, 1, 1], [], []>} : vector<64x28xbf16>, vector<28x512xbf16>, vector<64x512xf32> -> vector<64x512xf32>
    %c0_3 = arith.constant 0 : index
    %c0_4 = arith.constant 0 : index
    %4 = vector.load %arg2[%c0_3, %c0_4] : memref<1x512xf32, #tpu.memory_space<vmem>>, vector<1x512xf32>
    %5 = vector.broadcast %4 : vector<1x512xf32> to vector<64x512xf32>
    %6 = arith.addf %3, %5 : vector<64x512xf32>
    %c0_5 = arith.constant 0 : index
    %c0_6 = arith.constant 0 : index
    %7 = vector.load %arg9[%c0_5, %c0_6] : memref<64x512xf32, #tpu.memory_space<vmem>>, vector<64x512xf32>
    tpu.vector_store %arg9[%c0_5, %c0_6], %6 {strides = array<i32>} : memref<64x512xf32, #tpu.memory_space<vmem>>, vector<64x512xf32>,
    %c0_7 = arith.constant 0 : index
    %c0_8 = arith.constant 0 : index
    %8 = vector.load %arg5[%c0_7, %c0_8] : memref<1x512xf32, #tpu.memory_space<vmem>>, vector<1x512xf32>
    %9 = vector.shape_cast %8 : vector<1x512xf32> to vector<1x512xf32>
    %10 = vector.broadcast %9 : vector<1x512xf32> to vector<8x512xf32>
    %c0_9 = arith.constant 0 : index
    %c0_10 = arith.constant 0 : index
    %11 = vector.load %arg9[%c0_9, %c0_10] : memref<64x512xf32, #tpu.memory_space<vmem>>, vector<8x512xf32>
    %12 = vector.extract_strided_slice %11 {offsets = [0, 0], sizes = [8, 128], strides = [1, 1]} : vector<8x512xf32> to vector<8x128xf32>
    %13 = arith.negf %12 : vector<8x128xf32>
    %14 = math.exp %13 : vector<8x128xf32>
    %cst_11 = arith.constant 1.000000e+00 : f32
    %15 = vector.broadcast %cst_11 : f32 to vector<8x128xf32>
    %16 = arith.addf %15, %14 : vector<8x128xf32>
    %17 = arith.divf %15, %16 : vector<8x128xf32>
    %18 = vector.extract_strided_slice %11 {offsets = [0, 256], sizes = [8, 128], strides = [1, 1]} : vector<8x512xf32> to vector<8x128xf32>
    %19 = math.tanh %18 : vector<8x128xf32>
    %20 = vector.extract_strided_slice %11 {offsets = [0, 384], sizes = [8, 128], strides = [1, 1]} : vector<8x512xf32> to vector<8x128xf32>
    %21 = arith.negf %20 : vector<8x128xf32>
    %22 = math.exp %21 : vector<8x128xf32>
    %cst_12 = arith.constant 1.000000e+00 : f32
    %23 = vector.broadcast %cst_12 : f32 to vector<8x128xf32>
    %24 = arith.addf %23, %22 : vector<8x128xf32>
    %25 = arith.divf %23, %24 : vector<8x128xf32>
    %26 = arith.mulf %17, %19 : vector<8x128xf32>
    %27 = math.tanh %26 : vector<8x128xf32>
    %28 = arith.mulf %25, %27 : vector<8x128xf32>
    %29 = arith.truncf %28 : vector<8x128xf32> to vector<8x128xbf16>
    %c0_13 = arith.constant 0 : index
    %c0_14 = arith.constant 0 : index
    %30 = vector.load %arg4[%c0_13, %c0_14] : memref<256x512xbf16, #tpu.memory_space<vmem>>, vector<128x512xbf16>
    %cst_15 = arith.constant dense<0.000000e+00> : vector<8x512xf32>
    %31 = tpu.matmul %29, %30, %cst_15 {dimension_numbers = #tpu.dot_dimension_numbers<[1], [0], [0], [1], [0, 0, 1, 1], [], []>} : vector<8x128xbf16>, vector<128x512xbf16>, vector<8x512xf32> -> vector<8x512xf32>
    %32 = arith.addf %31, %10 : vector<8x512xf32>
    %33 = vector.extract_strided_slice %32 {offsets = [0, 0], sizes = [8, 128], strides = [1, 1]} : vector<8x512xf32> to vector<8x128xf32>
    %34 = arith.negf %33 : vector<8x128xf32>
    %35 = math.exp %34 : vector<8x128xf32>
    %cst_16 = arith.constant 1.000000e+00 : f32
    %36 = vector.broadcast %cst_16 : f32 to vector<8x128xf32>
    %37 = arith.addf %36, %35 : vector<8x128xf32>
    %38 = arith.divf %36, %37 : vector<8x128xf32>
    %39 = vector.extract_strided_slice %32 {offsets = [0, 256], sizes = [8, 128], strides = [1, 1]} : vector<8x512xf32> to vector<8x128xf32>
    %40 = math.tanh %39 : vector<8x128xf32>
    %41 = vector.extract_strided_slice %32 {offsets = [0, 384], sizes = [8, 128], strides = [1, 1]} : vector<8x512xf32> to vector<8x128xf32>
    %42 = arith.negf %41 : vector<8x128xf32>
    %43 = math.exp %42 : vector<8x128xf32>
    %cst_17 = arith.constant 1.000000e+00 : f32
    %44 = vector.broadcast %cst_17 : f32 to vector<8x128xf32>
    %45 = arith.addf %44, %43 : vector<8x128xf32>
    %46 = arith.divf %44, %45 : vector<8x128xf32>
    %47 = arith.mulf %38, %40 : vector<8x128xf32>
    %48 = math.tanh %47 : vector<8x128xf32>
    %49 = arith.mulf %46, %48 : vector<8x128xf32>
    %50 = arith.truncf %49 : vector<8x128xf32> to vector<8x128xbf16>
    %c8 = arith.constant 8 : index
    %c0_18 = arith.constant 0 : index
    %51 = vector.load %arg9[%c8, %c0_18] : memref<64x512xf32, #tpu.memory_space<vmem>>, vector<8x512xf32>
    %c0_19 = arith.constant 0 : index
    %c0_20 = arith.constant 0 : index
    %52 = vector.load %arg3[%c0_19, %c0_20] : memref<128x512xbf16, #tpu.memory_space<vmem>>, vector<128x512xbf16>
    %cst_21 = arith.constant dense<0.000000e+00> : vector<8x512xf32>
    %53 = tpu.matmul %29, %52, %cst_21 {dimension_numbers = #tpu.dot_dimension_numbers<[1], [0], [0], [1], [0, 0, 1, 1], [], []>} : vector<8x128xbf16>, vector<128x512xbf16>, vector<8x512xf32> -> vector<8x512xf32>
    %54 = arith.addf %51, %53 : vector<8x512xf32>
    %55 = vector.extract_strided_slice %54 {offsets = [0, 0], sizes = [8, 128], strides = [1, 1]} : vector<8x512xf32> to vector<8x128xf32>
    %56 = arith.negf %55 : vector<8x128xf32>
    %57 = math.exp %56 : vector<8x128xf32>
    %cst_22 = arith.constant 1.000000e+00 : f32
    %58 = vector.broadcast %cst_22 : f32 to vector<8x128xf32>
    %59 = arith.addf %58, %57 : vector<8x128xf32>
    %60 = arith.divf %58, %59 : vector<8x128xf32>
    %61 = vector.extract_strided_slice %54 {offsets = [0, 256], sizes = [8, 128], strides = [1, 1]} : vector<8x512xf32> to vector<8x128xf32>
    %62 = math.tanh %61 : vector<8x128xf32>
    %63 = vector.extract_strided_slice %54 {offsets = [0, 384], sizes = [8, 128], strides = [1, 1]} : vector<8x512xf32> to vector<8x128xf32>
    %64 = arith.negf %63 : vector<8x128xf32>
    %65 = math.exp %64 : vector<8x128xf32>
    %cst_23 = arith.constant 1.000000e+00 : f32
    %66 = vector.broadcast %cst_23 : f32 to vector<8x128xf32>
    %67 = arith.addf %66, %65 : vector<8x128xf32>
    %68 = arith.divf %66, %67 : vector<8x128xf32>
    %69 = vector.extract_strided_slice %54 {offsets = [0, 128], sizes = [8, 128], strides = [1, 1]} : vector<8x512xf32> to vector<8x128xf32>
    %70 = arith.negf %69 : vector<8x128xf32>
    %71 = math.exp %70 : vector<8x128xf32>
    %cst_24 = arith.constant 1.000000e+00 : f32
    %72 = vector.broadcast %cst_24 : f32 to vector<8x128xf32>
    %73 = arith.addf %72, %71 : vector<8x128xf32>
    %74 = arith.divf %72, %73 : vector<8x128xf32>
    %75 = arith.mulf %74, %26 : vector<8x128xf32>
    %76 = arith.mulf %60, %62 : vector<8x128xf32>
    %77 = arith.addf %75, %76 : vector<8x128xf32>
    %78 = math.tanh %77 : vector<8x128xf32>
    %79 = arith.mulf %68, %78 : vector<8x128xf32>
    %80 = arith.truncf %79 : vector<8x128xf32> to vector<8x128xbf16>
    %81 = tpu.concatenate %80, %50 in 1 : vector<8x128xbf16>, vector<8x128xbf16> -> vector<8x256xbf16>
    %c0_25 = arith.constant 0 : index
    %c0_26 = arith.constant 0 : index
    %82 = vector.load %arg4[%c0_25, %c0_26] : memref<256x512xbf16, #tpu.memory_space<vmem>>, vector<256x512xbf16>
    %cst_27 = arith.constant dense<0.000000e+00> : vector<8x512xf32>
    %83 = tpu.matmul %81, %82, %cst_27 {dimension_numbers = #tpu.dot_dimension_numbers<[1], [0], [0], [1], [0, 0, 1, 1], [], []>} : vector<8x256xbf16>, vector<256x512xbf16>, vector<8x512xf32> -> vector<8x512xf32>
    %84 = arith.addf %83, %10 : vector<8x512xf32>
    %85 = vector.extract_strided_slice %84 {offsets = [0, 0], sizes = [8, 128], strides = [1, 1]} : vector<8x512xf32> to vector<8x128xf32>
    %86 = arith.negf %85 : vector<8x128xf32>
    %87 = math.exp %86 : vector<8x128xf32>
    %cst_28 = arith.constant 1.000000e+00 : f32
    %88 = vector.broadcast %cst_28 : f32 to vector<8x128xf32>
    %89 = arith.addf %88, %87 : vector<8x128xf32>
    %90 = arith.divf %88, %89 : vector<8x128xf32>
    %91 = vector.extract_strided_slice %84 {offsets = [0, 256], sizes = [8, 128], strides = [1, 1]} : vector<8x512xf32> to vector<8x128xf32>
    %92 = math.tanh %91 : vector<8x128xf32>
    %93 = vector.extract_strided_slice %84 {offsets = [0, 384], sizes = [8, 128], strides = [1, 1]} : vector<8x512xf32> to vector<8x128xf32>
    %94 = arith.negf %93 : vector<8x128xf32>
    %95 = math.exp %94 : vector<8x128xf32>
    %cst_29 = arith.constant 1.000000e+00 : f32
    %96 = vector.broadcast %cst_29 : f32 to vector<8x128xf32>
    %97 = arith.addf %96, %95 : vector<8x128xf32>
    %98 = arith.divf %96, %97 : vector<8x128xf32>
    %99 = vector.extract_strided_slice %84 {offsets = [0, 128], sizes = [8, 128], strides = [1, 1]} : vector<8x512xf32> to vector<8x128xf32>
    %100 = arith.negf %99 : vector<8x128xf32>
    %101 = math.exp %100 : vector<8x128xf32>
    %cst_30 = arith.constant 1.000000e+00 : f32
    %102 = vector.broadcast %cst_30 : f32 to vector<8x128xf32>
    %103 = arith.addf %102, %101 : vector<8x128xf32>
    %104 = arith.divf %102, %103 : vector<8x128xf32>
    %105 = arith.mulf %104, %47 : vector<8x128xf32>
    %106 = arith.mulf %90, %92 : vector<8x128xf32>
    %107 = arith.addf %105, %106 : vector<8x128xf32>
    %108 = math.tanh %107 : vector<8x128xf32>
    %109 = arith.mulf %98, %108 : vector<8x128xf32>
    %110 = arith.truncf %109 : vector<8x128xf32> to vector<8x128xbf16>
    %c16 = arith.constant 16 : index
    %c0_31 = arith.constant 0 : index
    %111 = vector.load %arg9[%c16, %c0_31] : memref<64x512xf32, #tpu.memory_space<vmem>>, vector<8x512xf32>
    %c0_32 = arith.constant 0 : index
    %c0_33 = arith.constant 0 : index
    %112 = vector.load %arg3[%c0_32, %c0_33] : memref<128x512xbf16, #tpu.memory_space<vmem>>, vector<128x512xbf16>
    %cst_34 = arith.constant dense<0.000000e+00> : vector<8x512xf32>
    %113 = tpu.matmul %80, %112, %cst_34 {dimension_numbers = #tpu.dot_dimension_numbers<[1], [0], [0], [1], [0, 0, 1, 1], [], []>} : vector<8x128xbf16>, vector<128x512xbf16>, vector<8x512xf32> -> vector<8x512xf32>
    %114 = arith.addf %111, %113 : vector<8x512xf32>
    %115 = vector.extract_strided_slice %114 {offsets = [0, 0], sizes = [8, 128], strides = [1, 1]} : vector<8x512xf32> to vector<8x128xf32>
    %116 = arith.negf %115 : vector<8x128xf32>
    %117 = math.exp %116 : vector<8x128xf32>
    %cst_35 = arith.constant 1.000000e+00 : f32
    %118 = vector.broadcast %cst_35 : f32 to vector<8x128xf32>
    %119 = arith.addf %118, %117 : vector<8x128xf32>
    %120 = arith.divf %118, %119 : vector<8x128xf32>
    %121 = vector.extract_strided_slice %114 {offsets = [0, 256], sizes = [8, 128], strides = [1, 1]} : vector<8x512xf32> to vector<8x128xf32>
    %122 = math.tanh %121 : vector<8x128xf32>
    %123 = vector.extract_strided_slice %114 {offsets = [0, 384], sizes = [8, 128], strides = [1, 1]} : vector<8x512xf32> to vector<8x128xf32>
    %124 = arith.negf %123 : vector<8x128xf32>
    %125 = math.exp %124 : vector<8x128xf32>
    %cst_36 = arith.constant 1.000000e+00 : f32
    %126 = vector.broadcast %cst_36 : f32 to vector<8x128xf32>
    %127 = arith.addf %126, %125 : vector<8x128xf32>
    %128 = arith.divf %126, %127 : vector<8x128xf32>
    %129 = vector.extract_strided_slice %114 {offsets = [0, 128], sizes = [8, 128], strides = [1, 1]} : vector<8x512xf32> to vector<8x128xf32>
    %130 = arith.negf %129 : vector<8x128xf32>
    %131 = math.exp %130 : vector<8x128xf32>
    %cst_37 = arith.constant 1.000000e+00 : f32
    %132 = vector.broadcast %cst_37 : f32 to vector<8x128xf32>
    %133 = arith.addf %132, %131 : vector<8x128xf32>
    %134 = arith.divf %132, %133 : vector<8x128xf32>
    %135 = arith.mulf %134, %77 : vector<8x128xf32>
    %136 = arith.mulf %120, %122 : vector<8x128xf32>
    %137 = arith.addf %135, %136 : vector<8x128xf32>
    %138 = math.tanh %137 : vector<8x128xf32>
    %139 = arith.mulf %128, %138 : vector<8x128xf32>
    %140 = arith.truncf %139 : vector<8x128xf32> to vector<8x128xbf16>
    %141 = tpu.concatenate %140, %110 in 1 : vector<8x128xbf16>, vector<8x128xbf16> -> vector<8x256xbf16>
    %c0_38 = arith.constant 0 : index
    %c0_39 = arith.constant 0 : index
    %142 = vector.load %arg4[%c0_38, %c0_39] : memref<256x512xbf16, #tpu.memory_space<vmem>>, vector<256x512xbf16>
    %cst_40 = arith.constant dense<0.000000e+00> : vector<8x512xf32>
    %143 = tpu.matmul %141, %142, %cst_40 {dimension_numbers = #tpu.dot_dimension_numbers<[1], [0], [0], [1], [0, 0, 1, 1], [], []>} : vector<8x256xbf16>, vector<256x512xbf16>, vector<8x512xf32> -> vector<8x512xf32>
    %144 = arith.addf %143, %10 : vector<8x512xf32>
    %145 = vector.extract_strided_slice %144 {offsets = [0, 0], sizes = [8, 128], strides = [1, 1]} : vector<8x512xf32> to vector<8x128xf32>
    %146 = arith.negf %145 : vector<8x128xf32>
    %147 = math.exp %146 : vector<8x128xf32>
    %cst_41 = arith.constant 1.000000e+00 : f32
    %148 = vector.broadcast %cst_41 : f32 to vector<8x128xf32>
    %149 = arith.addf %148, %147 : vector<8x128xf32>
    %150 = arith.divf %148, %149 : vector<8x128xf32>
    %151 = vector.extract_strided_slice %144 {offsets = [0, 256], sizes = [8, 128], strides = [1, 1]} : vector<8x512xf32> to vector<8x128xf32>
    %152 = math.tanh %151 : vector<8x128xf32>
    %153 = vector.extract_strided_slice %144 {offsets = [0, 384], sizes = [8, 128], strides = [1, 1]} : vector<8x512xf32> to vector<8x128xf32>
    %154 = arith.negf %153 : vector<8x128xf32>
    %155 = math.exp %154 : vector<8x128xf32>
    %cst_42 = arith.constant 1.000000e+00 : f32
    %156 = vector.broadcast %cst_42 : f32 to vector<8x128xf32>
    %157 = arith.addf %156, %155 : vector<8x128xf32>
    %158 = arith.divf %156, %157 : vector<8x128xf32>
    %159 = vector.extract_strided_slice %144 {offsets = [0, 128], sizes = [8, 128], strides = [1, 1]} : vector<8x512xf32> to vector<8x128xf32>
    %160 = arith.negf %159 : vector<8x128xf32>
    %161 = math.exp %160 : vector<8x128xf32>
    %cst_43 = arith.constant 1.000000e+00 : f32
    %162 = vector.broadcast %cst_43 : f32 to vector<8x128xf32>
    %163 = arith.addf %162, %161 : vector<8x128xf32>
    %164 = arith.divf %162, %163 : vector<8x128xf32>
    %165 = arith.mulf %164, %107 : vector<8x128xf32>
    %166 = arith.mulf %150, %152 : vector<8x128xf32>
    %167 = arith.addf %165, %166 : vector<8x128xf32>
    %168 = math.tanh %167 : vector<8x128xf32>
    %169 = arith.mulf %158, %168 : vector<8x128xf32>
    %170 = arith.truncf %169 : vector<8x128xf32> to vector<8x128xbf16>
    %c24 = arith.constant 24 : index
    %c0_44 = arith.constant 0 : index
    %171 = vector.load %arg9[%c24, %c0_44] : memref<64x512xf32, #tpu.memory_space<vmem>>, vector<8x512xf32>
    %c0_45 = arith.constant 0 : index
    %c0_46 = arith.constant 0 : index
    %172 = vector.load %arg3[%c0_45, %c0_46] : memref<128x512xbf16, #tpu.memory_space<vmem>>, vector<128x512xbf16>
    %cst_47 = arith.constant dense<0.000000e+00> : vector<8x512xf32>
    %173 = tpu.matmul %140, %172, %cst_47 {dimension_numbers = #tpu.dot_dimension_numbers<[1], [0], [0], [1], [0, 0, 1, 1], [], []>} : vector<8x128xbf16>, vector<128x512xbf16>, vector<8x512xf32> -> vector<8x512xf32>
    %174 = arith.addf %171, %173 : vector<8x512xf32>
    %175 = vector.extract_strided_slice %174 {offsets = [0, 0], sizes = [8, 128], strides = [1, 1]} : vector<8x512xf32> to vector<8x128xf32>
    %176 = arith.negf %175 : vector<8x128xf32>
    %177 = math.exp %176 : vector<8x128xf32>
    %cst_48 = arith.constant 1.000000e+00 : f32
    %178 = vector.broadcast %cst_48 : f32 to vector<8x128xf32>
    %179 = arith.addf %178, %177 : vector<8x128xf32>
    %180 = arith.divf %178, %179 : vector<8x128xf32>
    %181 = vector.extract_strided_slice %174 {offsets = [0, 256], sizes = [8, 128], strides = [1, 1]} : vector<8x512xf32> to vector<8x128xf32>
    %182 = math.tanh %181 : vector<8x128xf32>
    %183 = vector.extract_strided_slice %174 {offsets = [0, 384], sizes = [8, 128], strides = [1, 1]} : vector<8x512xf32> to vector<8x128xf32>
    %184 = arith.negf %183 : vector<8x128xf32>
    %185 = math.exp %184 : vector<8x128xf32>
    %cst_49 = arith.constant 1.000000e+00 : f32
    %186 = vector.broadcast %cst_49 : f32 to vector<8x128xf32>
    %187 = arith.addf %186, %185 : vector<8x128xf32>
    %188 = arith.divf %186, %187 : vector<8x128xf32>
    %189 = vector.extract_strided_slice %174 {offsets = [0, 128], sizes = [8, 128], strides = [1, 1]} : vector<8x512xf32> to vector<8x128xf32>
    %190 = arith.negf %189 : vector<8x128xf32>
    %191 = math.exp %190 : vector<8x128xf32>
    %cst_50 = arith.constant 1.000000e+00 : f32
    %192 = vector.broadcast %cst_50 : f32 to vector<8x128xf32>
    %193 = arith.addf %192, %191 : vector<8x128xf32>
    %194 = arith.divf %192, %193 : vector<8x128xf32>
    %195 = arith.mulf %194, %137 : vector<8x128xf32>
    %196 = arith.mulf %180, %182 : vector<8x128xf32>
    %197 = arith.addf %195, %196 : vector<8x128xf32>
    %198 = math.tanh %197 : vector<8x128xf32>
    %199 = arith.mulf %188, %198 : vector<8x128xf32>
    %200 = arith.truncf %199 : vector<8x128xf32> to vector<8x128xbf16>
    %201 = tpu.concatenate %200, %170 in 1 : vector<8x128xbf16>, vector<8x128xbf16> -> vector<8x256xbf16>
    %c0_51 = arith.constant 0 : index
    %c0_52 = arith.constant 0 : index
    %202 = vector.load %arg4[%c0_51, %c0_52] : memref<256x512xbf16, #tpu.memory_space<vmem>>, vector<256x512xbf16>
    %cst_53 = arith.constant dense<0.000000e+00> : vector<8x512xf32>
    %203 = tpu.matmul %201, %202, %cst_53 {dimension_numbers = #tpu.dot_dimension_numbers<[1], [0], [0], [1], [0, 0, 1, 1], [], []>} : vector<8x256xbf16>, vector<256x512xbf16>, vector<8x512xf32> -> vector<8x512xf32>
    %204 = arith.addf %203, %10 : vector<8x512xf32>
    %205 = vector.extract_strided_slice %204 {offsets = [0, 0], sizes = [8, 128], strides = [1, 1]} : vector<8x512xf32> to vector<8x128xf32>
    %206 = arith.negf %205 : vector<8x128xf32>
    %207 = math.exp %206 : vector<8x128xf32>
    %cst_54 = arith.constant 1.000000e+00 : f32
    %208 = vector.broadcast %cst_54 : f32 to vector<8x128xf32>
    %209 = arith.addf %208, %207 : vector<8x128xf32>
    %210 = arith.divf %208, %209 : vector<8x128xf32>
    %211 = vector.extract_strided_slice %204 {offsets = [0, 256], sizes = [8, 128], strides = [1, 1]} : vector<8x512xf32> to vector<8x128xf32>
    %212 = math.tanh %211 : vector<8x128xf32>
    %213 = vector.extract_strided_slice %204 {offsets = [0, 384], sizes = [8, 128], strides = [1, 1]} : vector<8x512xf32> to vector<8x128xf32>
    %214 = arith.negf %213 : vector<8x128xf32>
    %215 = math.exp %214 : vector<8x128xf32>
    %cst_55 = arith.constant 1.000000e+00 : f32
    %216 = vector.broadcast %cst_55 : f32 to vector<8x128xf32>
    %217 = arith.addf %216, %215 : vector<8x128xf32>
    %218 = arith.divf %216, %217 : vector<8x128xf32>
    %219 = vector.extract_strided_slice %204 {offsets = [0, 128], sizes = [8, 128], strides = [1, 1]} : vector<8x512xf32> to vector<8x128xf32>
    %220 = arith.negf %219 : vector<8x128xf32>
    %221 = math.exp %220 : vector<8x128xf32>
    %cst_56 = arith.constant 1.000000e+00 : f32
    %222 = vector.broadcast %cst_56 : f32 to vector<8x128xf32>
    %223 = arith.addf %222, %221 : vector<8x128xf32>
    %224 = arith.divf %222, %223 : vector<8x128xf32>
    %225 = arith.mulf %224, %167 : vector<8x128xf32>
    %226 = arith.mulf %210, %212 : vector<8x128xf32>
    %227 = arith.addf %225, %226 : vector<8x128xf32>
    %228 = math.tanh %227 : vector<8x128xf32>
    %229 = arith.mulf %218, %228 : vector<8x128xf32>
    %230 = arith.truncf %229 : vector<8x128xf32> to vector<8x128xbf16>
    %c32 = arith.constant 32 : index
    %c0_57 = arith.constant 0 : index
    %231 = vector.load %arg9[%c32, %c0_57] : memref<64x512xf32, #tpu.memory_space<vmem>>, vector<8x512xf32>
    %c0_58 = arith.constant 0 : index
    %c0_59 = arith.constant 0 : index
    %232 = vector.load %arg3[%c0_58, %c0_59] : memref<128x512xbf16, #tpu.memory_space<vmem>>, vector<128x512xbf16>
    %cst_60 = arith.constant dense<0.000000e+00> : vector<8x512xf32>
    %233 = tpu.matmul %200, %232, %cst_60 {dimension_numbers = #tpu.dot_dimension_numbers<[1], [0], [0], [1], [0, 0, 1, 1], [], []>} : vector<8x128xbf16>, vector<128x512xbf16>, vector<8x512xf32> -> vector<8x512xf32>
    %234 = arith.addf %231, %233 : vector<8x512xf32>
    %235 = vector.extract_strided_slice %234 {offsets = [0, 0], sizes = [8, 128], strides = [1, 1]} : vector<8x512xf32> to vector<8x128xf32>
    %236 = arith.negf %235 : vector<8x128xf32>
    %237 = math.exp %236 : vector<8x128xf32>
    %cst_61 = arith.constant 1.000000e+00 : f32
    %238 = vector.broadcast %cst_61 : f32 to vector<8x128xf32>
    %239 = arith.addf %238, %237 : vector<8x128xf32>
    %240 = arith.divf %238, %239 : vector<8x128xf32>
    %241 = vector.extract_strided_slice %234 {offsets = [0, 256], sizes = [8, 128], strides = [1, 1]} : vector<8x512xf32> to vector<8x128xf32>
    %242 = math.tanh %241 : vector<8x128xf32>
    %243 = vector.extract_strided_slice %234 {offsets = [0, 384], sizes = [8, 128], strides = [1, 1]} : vector<8x512xf32> to vector<8x128xf32>
    %244 = arith.negf %243 : vector<8x128xf32>
    %245 = math.exp %244 : vector<8x128xf32>
    %cst_62 = arith.constant 1.000000e+00 : f32
    %246 = vector.broadcast %cst_62 : f32 to vector<8x128xf32>
    %247 = arith.addf %246, %245 : vector<8x128xf32>
    %248 = arith.divf %246, %247 : vector<8x128xf32>
    %249 = vector.extract_strided_slice %234 {offsets = [0, 128], sizes = [8, 128], strides = [1, 1]} : vector<8x512xf32> to vector<8x128xf32>
    %250 = arith.negf %249 : vector<8x128xf32>
    %251 = math.exp %250 : vector<8x128xf32>
    %cst_63 = arith.constant 1.000000e+00 : f32
    %252 = vector.broadcast %cst_63 : f32 to vector<8x128xf32>
    %253 = arith.addf %252, %251 : vector<8x128xf32>
    %254 = arith.divf %252, %253 : vector<8x128xf32>
    %255 = arith.mulf %254, %197 : vector<8x128xf32>
    %256 = arith.mulf %240, %242 : vector<8x128xf32>
    %257 = arith.addf %255, %256 : vector<8x128xf32>
    %258 = math.tanh %257 : vector<8x128xf32>
    %259 = arith.mulf %248, %258 : vector<8x128xf32>
    %260 = arith.truncf %259 : vector<8x128xf32> to vector<8x128xbf16>
    %261 = tpu.concatenate %260, %230 in 1 : vector<8x128xbf16>, vector<8x128xbf16> -> vector<8x256xbf16>
    %c0_64 = arith.constant 0 : index
    %c0_65 = arith.constant 0 : index
    %262 = vector.load %arg4[%c0_64, %c0_65] : memref<256x512xbf16, #tpu.memory_space<vmem>>, vector<256x512xbf16>
    %cst_66 = arith.constant dense<0.000000e+00> : vector<8x512xf32>
    %263 = tpu.matmul %261, %262, %cst_66 {dimension_numbers = #tpu.dot_dimension_numbers<[1], [0], [0], [1], [0, 0, 1, 1], [], []>} : vector<8x256xbf16>, vector<256x512xbf16>, vector<8x512xf32> -> vector<8x512xf32>
    %264 = arith.addf %263, %10 : vector<8x512xf32>
    %265 = vector.extract_strided_slice %264 {offsets = [0, 0], sizes = [8, 128], strides = [1, 1]} : vector<8x512xf32> to vector<8x128xf32>
    %266 = arith.negf %265 : vector<8x128xf32>
    %267 = math.exp %266 : vector<8x128xf32>
    %cst_67 = arith.constant 1.000000e+00 : f32
    %268 = vector.broadcast %cst_67 : f32 to vector<8x128xf32>
    %269 = arith.addf %268, %267 : vector<8x128xf32>
    %270 = arith.divf %268, %269 : vector<8x128xf32>
    %271 = vector.extract_strided_slice %264 {offsets = [0, 256], sizes = [8, 128], strides = [1, 1]} : vector<8x512xf32> to vector<8x128xf32>
    %272 = math.tanh %271 : vector<8x128xf32>
    %273 = vector.extract_strided_slice %264 {offsets = [0, 384], sizes = [8, 128], strides = [1, 1]} : vector<8x512xf32> to vector<8x128xf32>
    %274 = arith.negf %273 : vector<8x128xf32>
    %275 = math.exp %274 : vector<8x128xf32>
    %cst_68 = arith.constant 1.000000e+00 : f32
    %276 = vector.broadcast %cst_68 : f32 to vector<8x128xf32>
    %277 = arith.addf %276, %275 : vector<8x128xf32>
    %278 = arith.divf %276, %277 : vector<8x128xf32>
    %279 = vector.extract_strided_slice %264 {offsets = [0, 128], sizes = [8, 128], strides = [1, 1]} : vector<8x512xf32> to vector<8x128xf32>
    %280 = arith.negf %279 : vector<8x128xf32>
    %281 = math.exp %280 : vector<8x128xf32>
    %cst_69 = arith.constant 1.000000e+00 : f32
    %282 = vector.broadcast %cst_69 : f32 to vector<8x128xf32>
    %283 = arith.addf %282, %281 : vector<8x128xf32>
    %284 = arith.divf %282, %283 : vector<8x128xf32>
    %285 = arith.mulf %284, %227 : vector<8x128xf32>
    %286 = arith.mulf %270, %272 : vector<8x128xf32>
    %287 = arith.addf %285, %286 : vector<8x128xf32>
    %288 = math.tanh %287 : vector<8x128xf32>
    %289 = arith.mulf %278, %288 : vector<8x128xf32>
    %290 = arith.truncf %289 : vector<8x128xf32> to vector<8x128xbf16>
    %c40 = arith.constant 40 : index
    %c0_70 = arith.constant 0 : index
    %291 = vector.load %arg9[%c40, %c0_70] : memref<64x512xf32, #tpu.memory_space<vmem>>, vector<8x512xf32>
    %c0_71 = arith.constant 0 : index
    %c0_72 = arith.constant 0 : index
    %292 = vector.load %arg3[%c0_71, %c0_72] : memref<128x512xbf16, #tpu.memory_space<vmem>>, vector<128x512xbf16>
    %cst_73 = arith.constant dense<0.000000e+00> : vector<8x512xf32>
    %293 = tpu.matmul %260, %292, %cst_73 {dimension_numbers = #tpu.dot_dimension_numbers<[1], [0], [0], [1], [0, 0, 1, 1], [], []>} : vector<8x128xbf16>, vector<128x512xbf16>, vector<8x512xf32> -> vector<8x512xf32>
    %294 = arith.addf %291, %293 : vector<8x512xf32>
    %295 = vector.extract_strided_slice %294 {offsets = [0, 0], sizes = [8, 128], strides = [1, 1]} : vector<8x512xf32> to vector<8x128xf32>
    %296 = arith.negf %295 : vector<8x128xf32>
    %297 = math.exp %296 : vector<8x128xf32>
    %cst_74 = arith.constant 1.000000e+00 : f32
    %298 = vector.broadcast %cst_74 : f32 to vector<8x128xf32>
    %299 = arith.addf %298, %297 : vector<8x128xf32>
    %300 = arith.divf %298, %299 : vector<8x128xf32>
    %301 = vector.extract_strided_slice %294 {offsets = [0, 256], sizes = [8, 128], strides = [1, 1]} : vector<8x512xf32> to vector<8x128xf32>
    %302 = math.tanh %301 : vector<8x128xf32>
    %303 = vector.extract_strided_slice %294 {offsets = [0, 384], sizes = [8, 128], strides = [1, 1]} : vector<8x512xf32> to vector<8x128xf32>
    %304 = arith.negf %303 : vector<8x128xf32>
    %305 = math.exp %304 : vector<8x128xf32>
    %cst_75 = arith.constant 1.000000e+00 : f32
    %306 = vector.broadcast %cst_75 : f32 to vector<8x128xf32>
    %307 = arith.addf %306, %305 : vector<8x128xf32>
    %308 = arith.divf %306, %307 : vector<8x128xf32>
    %309 = vector.extract_strided_slice %294 {offsets = [0, 128], sizes = [8, 128], strides = [1, 1]} : vector<8x512xf32> to vector<8x128xf32>
    %310 = arith.negf %309 : vector<8x128xf32>
    %311 = math.exp %310 : vector<8x128xf32>
    %cst_76 = arith.constant 1.000000e+00 : f32
    %312 = vector.broadcast %cst_76 : f32 to vector<8x128xf32>
    %313 = arith.addf %312, %311 : vector<8x128xf32>
    %314 = arith.divf %312, %313 : vector<8x128xf32>
    %315 = arith.mulf %314, %257 : vector<8x128xf32>
    %316 = arith.mulf %300, %302 : vector<8x128xf32>
    %317 = arith.addf %315, %316 : vector<8x128xf32>
    %318 = math.tanh %317 : vector<8x128xf32>
    %319 = arith.mulf %308, %318 : vector<8x128xf32>
    %320 = arith.truncf %319 : vector<8x128xf32> to vector<8x128xbf16>
    %321 = tpu.concatenate %320, %290 in 1 : vector<8x128xbf16>, vector<8x128xbf16> -> vector<8x256xbf16>
    %c0_77 = arith.constant 0 : index
    %c0_78 = arith.constant 0 : index
    %322 = vector.load %arg4[%c0_77, %c0_78] : memref<256x512xbf16, #tpu.memory_space<vmem>>, vector<256x512xbf16>
    %cst_79 = arith.constant dense<0.000000e+00> : vector<8x512xf32>
    %323 = tpu.matmul %321, %322, %cst_79 {dimension_numbers = #tpu.dot_dimension_numbers<[1], [0], [0], [1], [0, 0, 1, 1], [], []>} : vector<8x256xbf16>, vector<256x512xbf16>, vector<8x512xf32> -> vector<8x512xf32>
    %324 = arith.addf %323, %10 : vector<8x512xf32>
    %325 = vector.extract_strided_slice %324 {offsets = [0, 0], sizes = [8, 128], strides = [1, 1]} : vector<8x512xf32> to vector<8x128xf32>
    %326 = arith.negf %325 : vector<8x128xf32>
    %327 = math.exp %326 : vector<8x128xf32>
    %cst_80 = arith.constant 1.000000e+00 : f32
    %328 = vector.broadcast %cst_80 : f32 to vector<8x128xf32>
    %329 = arith.addf %328, %327 : vector<8x128xf32>
    %330 = arith.divf %328, %329 : vector<8x128xf32>
    %331 = vector.extract_strided_slice %324 {offsets = [0, 256], sizes = [8, 128], strides = [1, 1]} : vector<8x512xf32> to vector<8x128xf32>
    %332 = math.tanh %331 : vector<8x128xf32>
    %333 = vector.extract_strided_slice %324 {offsets = [0, 384], sizes = [8, 128], strides = [1, 1]} : vector<8x512xf32> to vector<8x128xf32>
    %334 = arith.negf %333 : vector<8x128xf32>
    %335 = math.exp %334 : vector<8x128xf32>
    %cst_81 = arith.constant 1.000000e+00 : f32
    %336 = vector.broadcast %cst_81 : f32 to vector<8x128xf32>
    %337 = arith.addf %336, %335 : vector<8x128xf32>
    %338 = arith.divf %336, %337 : vector<8x128xf32>
    %339 = vector.extract_strided_slice %324 {offsets = [0, 128], sizes = [8, 128], strides = [1, 1]} : vector<8x512xf32> to vector<8x128xf32>
    %340 = arith.negf %339 : vector<8x128xf32>
    %341 = math.exp %340 : vector<8x128xf32>
    %cst_82 = arith.constant 1.000000e+00 : f32
    %342 = vector.broadcast %cst_82 : f32 to vector<8x128xf32>
    %343 = arith.addf %342, %341 : vector<8x128xf32>
    %344 = arith.divf %342, %343 : vector<8x128xf32>
    %345 = arith.mulf %344, %287 : vector<8x128xf32>
    %346 = arith.mulf %330, %332 : vector<8x128xf32>
    %347 = arith.addf %345, %346 : vector<8x128xf32>
    %348 = math.tanh %347 : vector<8x128xf32>
    %349 = arith.mulf %338, %348 : vector<8x128xf32>
    %350 = arith.truncf %349 : vector<8x128xf32> to vector<8x128xbf16>
    %c48 = arith.constant 48 : index
    %c0_83 = arith.constant 0 : index
    %351 = vector.load %arg9[%c48, %c0_83] : memref<64x512xf32, #tpu.memory_space<vmem>>, vector<8x512xf32>
    %c0_84 = arith.constant 0 : index
    %c0_85 = arith.constant 0 : index
    %352 = vector.load %arg3[%c0_84, %c0_85] : memref<128x512xbf16, #tpu.memory_space<vmem>>, vector<128x512xbf16>
    %cst_86 = arith.constant dense<0.000000e+00> : vector<8x512xf32>
    %353 = tpu.matmul %320, %352, %cst_86 {dimension_numbers = #tpu.dot_dimension_numbers<[1], [0], [0], [1], [0, 0, 1, 1], [], []>} : vector<8x128xbf16>, vector<128x512xbf16>, vector<8x512xf32> -> vector<8x512xf32>
    %354 = arith.addf %351, %353 : vector<8x512xf32>
    %355 = vector.extract_strided_slice %354 {offsets = [0, 0], sizes = [8, 128], strides = [1, 1]} : vector<8x512xf32> to vector<8x128xf32>
    %356 = arith.negf %355 : vector<8x128xf32>
    %357 = math.exp %356 : vector<8x128xf32>
    %cst_87 = arith.constant 1.000000e+00 : f32
    %358 = vector.broadcast %cst_87 : f32 to vector<8x128xf32>
    %359 = arith.addf %358, %357 : vector<8x128xf32>
    %360 = arith.divf %358, %359 : vector<8x128xf32>
    %361 = vector.extract_strided_slice %354 {offsets = [0, 256], sizes = [8, 128], strides = [1, 1]} : vector<8x512xf32> to vector<8x128xf32>
    %362 = math.tanh %361 : vector<8x128xf32>
    %363 = vector.extract_strided_slice %354 {offsets = [0, 384], sizes = [8, 128], strides = [1, 1]} : vector<8x512xf32> to vector<8x128xf32>
    %364 = arith.negf %363 : vector<8x128xf32>
    %365 = math.exp %364 : vector<8x128xf32>
    %cst_88 = arith.constant 1.000000e+00 : f32
    %366 = vector.broadcast %cst_88 : f32 to vector<8x128xf32>
    %367 = arith.addf %366, %365 : vector<8x128xf32>
    %368 = arith.divf %366, %367 : vector<8x128xf32>
    %369 = vector.extract_strided_slice %354 {offsets = [0, 128], sizes = [8, 128], strides = [1, 1]} : vector<8x512xf32> to vector<8x128xf32>
    %370 = arith.negf %369 : vector<8x128xf32>
    %371 = math.exp %370 : vector<8x128xf32>
    %cst_89 = arith.constant 1.000000e+00 : f32
    %372 = vector.broadcast %cst_89 : f32 to vector<8x128xf32>
    %373 = arith.addf %372, %371 : vector<8x128xf32>
    %374 = arith.divf %372, %373 : vector<8x128xf32>
    %375 = arith.mulf %374, %317 : vector<8x128xf32>
    %376 = arith.mulf %360, %362 : vector<8x128xf32>
    %377 = arith.addf %375, %376 : vector<8x128xf32>
    %378 = math.tanh %377 : vector<8x128xf32>
    %379 = arith.mulf %368, %378 : vector<8x128xf32>
    %380 = arith.truncf %379 : vector<8x128xf32> to vector<8x128xbf16>
    %381 = tpu.concatenate %380, %350 in 1 : vector<8x128xbf16>, vector<8x128xbf16> -> vector<8x256xbf16>
    %c0_90 = arith.constant 0 : index
    %c0_91 = arith.constant 0 : index
    %382 = vector.load %arg4[%c0_90, %c0_91] : memref<256x512xbf16, #tpu.memory_space<vmem>>, vector<256x512xbf16>
    %cst_92 = arith.constant dense<0.000000e+00> : vector<8x512xf32>
    %383 = tpu.matmul %381, %382, %cst_92 {dimension_numbers = #tpu.dot_dimension_numbers<[1], [0], [0], [1], [0, 0, 1, 1], [], []>} : vector<8x256xbf16>, vector<256x512xbf16>, vector<8x512xf32> -> vector<8x512xf32>
    %384 = arith.addf %383, %10 : vector<8x512xf32>
    %385 = vector.extract_strided_slice %384 {offsets = [0, 0], sizes = [8, 128], strides = [1, 1]} : vector<8x512xf32> to vector<8x128xf32>
    %386 = arith.negf %385 : vector<8x128xf32>
    %387 = math.exp %386 : vector<8x128xf32>
    %cst_93 = arith.constant 1.000000e+00 : f32
    %388 = vector.broadcast %cst_93 : f32 to vector<8x128xf32>
    %389 = arith.addf %388, %387 : vector<8x128xf32>
    %390 = arith.divf %388, %389 : vector<8x128xf32>
    %391 = vector.extract_strided_slice %384 {offsets = [0, 256], sizes = [8, 128], strides = [1, 1]} : vector<8x512xf32> to vector<8x128xf32>
    %392 = math.tanh %391 : vector<8x128xf32>
    %393 = vector.extract_strided_slice %384 {offsets = [0, 384], sizes = [8, 128], strides = [1, 1]} : vector<8x512xf32> to vector<8x128xf32>
    %394 = arith.negf %393 : vector<8x128xf32>
    %395 = math.exp %394 : vector<8x128xf32>
    %cst_94 = arith.constant 1.000000e+00 : f32
    %396 = vector.broadcast %cst_94 : f32 to vector<8x128xf32>
    %397 = arith.addf %396, %395 : vector<8x128xf32>
    %398 = arith.divf %396, %397 : vector<8x128xf32>
    %399 = vector.extract_strided_slice %384 {offsets = [0, 128], sizes = [8, 128], strides = [1, 1]} : vector<8x512xf32> to vector<8x128xf32>
    %400 = arith.negf %399 : vector<8x128xf32>
    %401 = math.exp %400 : vector<8x128xf32>
    %cst_95 = arith.constant 1.000000e+00 : f32
    %402 = vector.broadcast %cst_95 : f32 to vector<8x128xf32>
    %403 = arith.addf %402, %401 : vector<8x128xf32>
    %404 = arith.divf %402, %403 : vector<8x128xf32>
    %405 = arith.mulf %404, %347 : vector<8x128xf32>
    %406 = arith.mulf %390, %392 : vector<8x128xf32>
    %407 = arith.addf %405, %406 : vector<8x128xf32>
    %408 = math.tanh %407 : vector<8x128xf32>
    %409 = arith.mulf %398, %408 : vector<8x128xf32>
    %410 = arith.truncf %409 : vector<8x128xf32> to vector<8x128xbf16>
    %c56 = arith.constant 56 : index
    %c0_96 = arith.constant 0 : index
    %411 = vector.load %arg9[%c56, %c0_96] : memref<64x512xf32, #tpu.memory_space<vmem>>, vector<8x512xf32>
    %c0_97 = arith.constant 0 : index
    %c0_98 = arith.constant 0 : index
    %412 = vector.load %arg3[%c0_97, %c0_98] : memref<128x512xbf16, #tpu.memory_space<vmem>>, vector<128x512xbf16>
    %cst_99 = arith.constant dense<0.000000e+00> : vector<8x512xf32>
    %413 = tpu.matmul %380, %412, %cst_99 {dimension_numbers = #tpu.dot_dimension_numbers<[1], [0], [0], [1], [0, 0, 1, 1], [], []>} : vector<8x128xbf16>, vector<128x512xbf16>, vector<8x512xf32> -> vector<8x512xf32>
    %414 = arith.addf %411, %413 : vector<8x512xf32>
    %415 = vector.extract_strided_slice %414 {offsets = [0, 0], sizes = [8, 128], strides = [1, 1]} : vector<8x512xf32> to vector<8x128xf32>
    %416 = arith.negf %415 : vector<8x128xf32>
    %417 = math.exp %416 : vector<8x128xf32>
    %cst_100 = arith.constant 1.000000e+00 : f32
    %418 = vector.broadcast %cst_100 : f32 to vector<8x128xf32>
    %419 = arith.addf %418, %417 : vector<8x128xf32>
    %420 = arith.divf %418, %419 : vector<8x128xf32>
    %421 = vector.extract_strided_slice %414 {offsets = [0, 256], sizes = [8, 128], strides = [1, 1]} : vector<8x512xf32> to vector<8x128xf32>
    %422 = math.tanh %421 : vector<8x128xf32>
    %423 = vector.extract_strided_slice %414 {offsets = [0, 384], sizes = [8, 128], strides = [1, 1]} : vector<8x512xf32> to vector<8x128xf32>
    %424 = arith.negf %423 : vector<8x128xf32>
    %425 = math.exp %424 : vector<8x128xf32>
    %cst_101 = arith.constant 1.000000e+00 : f32
    %426 = vector.broadcast %cst_101 : f32 to vector<8x128xf32>
    %427 = arith.addf %426, %425 : vector<8x128xf32>
    %428 = arith.divf %426, %427 : vector<8x128xf32>
    %429 = vector.extract_strided_slice %414 {offsets = [0, 128], sizes = [8, 128], strides = [1, 1]} : vector<8x512xf32> to vector<8x128xf32>
    %430 = arith.negf %429 : vector<8x128xf32>
    %431 = math.exp %430 : vector<8x128xf32>
    %cst_102 = arith.constant 1.000000e+00 : f32
    %432 = vector.broadcast %cst_102 : f32 to vector<8x128xf32>
    %433 = arith.addf %432, %431 : vector<8x128xf32>
    %434 = arith.divf %432, %433 : vector<8x128xf32>
    %435 = arith.mulf %434, %377 : vector<8x128xf32>
    %436 = arith.mulf %420, %422 : vector<8x128xf32>
    %437 = arith.addf %435, %436 : vector<8x128xf32>
    %438 = math.tanh %437 : vector<8x128xf32>
    %439 = arith.mulf %428, %438 : vector<8x128xf32>
    %440 = arith.truncf %439 : vector<8x128xf32> to vector<8x128xbf16>
    %441 = tpu.concatenate %440, %410 in 1 : vector<8x128xbf16>, vector<8x128xbf16> -> vector<8x256xbf16>
    %c0_103 = arith.constant 0 : index
    %c0_104 = arith.constant 0 : index
    %442 = vector.load %arg4[%c0_103, %c0_104] : memref<256x512xbf16, #tpu.memory_space<vmem>>, vector<256x512xbf16>
    %cst_105 = arith.constant dense<0.000000e+00> : vector<8x512xf32>
    %443 = tpu.matmul %441, %442, %cst_105 {dimension_numbers = #tpu.dot_dimension_numbers<[1], [0], [0], [1], [0, 0, 1, 1], [], []>} : vector<8x256xbf16>, vector<256x512xbf16>, vector<8x512xf32> -> vector<8x512xf32>
    %444 = arith.addf %443, %10 : vector<8x512xf32>
    %445 = vector.extract_strided_slice %444 {offsets = [0, 0], sizes = [8, 128], strides = [1, 1]} : vector<8x512xf32> to vector<8x128xf32>
    %446 = arith.negf %445 : vector<8x128xf32>
    %447 = math.exp %446 : vector<8x128xf32>
    %cst_106 = arith.constant 1.000000e+00 : f32
    %448 = vector.broadcast %cst_106 : f32 to vector<8x128xf32>
    %449 = arith.addf %448, %447 : vector<8x128xf32>
    %450 = arith.divf %448, %449 : vector<8x128xf32>
    %451 = vector.extract_strided_slice %444 {offsets = [0, 256], sizes = [8, 128], strides = [1, 1]} : vector<8x512xf32> to vector<8x128xf32>
    %452 = math.tanh %451 : vector<8x128xf32>
    %453 = vector.extract_strided_slice %444 {offsets = [0, 384], sizes = [8, 128], strides = [1, 1]} : vector<8x512xf32> to vector<8x128xf32>
    %454 = arith.negf %453 : vector<8x128xf32>
    %455 = math.exp %454 : vector<8x128xf32>
    %cst_107 = arith.constant 1.000000e+00 : f32
    %456 = vector.broadcast %cst_107 : f32 to vector<8x128xf32>
    %457 = arith.addf %456, %455 : vector<8x128xf32>
    %458 = arith.divf %456, %457 : vector<8x128xf32>
    %459 = vector.extract_strided_slice %444 {offsets = [0, 128], sizes = [8, 128], strides = [1, 1]} : vector<8x512xf32> to vector<8x128xf32>
    %460 = arith.negf %459 : vector<8x128xf32>
    %461 = math.exp %460 : vector<8x128xf32>
    %cst_108 = arith.constant 1.000000e+00 : f32
    %462 = vector.broadcast %cst_108 : f32 to vector<8x128xf32>
    %463 = arith.addf %462, %461 : vector<8x128xf32>
    %464 = arith.divf %462, %463 : vector<8x128xf32>
    %465 = arith.mulf %464, %407 : vector<8x128xf32>
    %466 = arith.mulf %450, %452 : vector<8x128xf32>
    %467 = arith.addf %465, %466 : vector<8x128xf32>
    %468 = math.tanh %467 : vector<8x128xf32>
    %469 = arith.mulf %458, %468 : vector<8x128xf32>
    %c0_109 = arith.constant 0 : index
    %c0_110 = arith.constant 0 : index
    %470 = vector.load %arg6[%c0_109, %c0_110] : memref<1x128xf32, #tpu.memory_space<vmem>>, vector<1x128xf32>
    %471 = vector.broadcast %470 : vector<1x128xf32> to vector<8x128xf32>
    %472 = arith.mulf %469, %471 : vector<8x128xf32>
    %cst_111 = arith.constant dense<0.000000e+00> : vector<8xf32>
    %473 = vector.multi_reduction <add>, %472, %cst_111 [1] : vector<8x128xf32> to vector<8xf32>
    %474 = vector.shape_cast %473 : vector<8xf32> to vector<8x1xf32>
    %c0_112 = arith.constant 0 : index
    %c0_113 = arith.constant 0 : index
    %475 = vector.load %arg7[%c0_112, %c0_113] : memref<1x1xf32, #tpu.memory_space<vmem>>, vector<1x1xf32>
    %476 = vector.broadcast %475 : vector<1x1xf32> to vector<8x1xf32>
    %477 = arith.addf %474, %476 : vector<8x1xf32>
    %c0_114 = arith.constant 0 : index
    %c0_115 = arith.constant 0 : index
    %478 = vector.load %arg8[%c0_114, %c0_115] : memref<8x1xf32, #tpu.memory_space<vmem>>, vector<8x1xf32>
    tpu.vector_store %arg8[%c0_114, %c0_115], %477 {strides = array<i32>} : memref<8x1xf32, #tpu.memory_space<vmem>>, vector<8x1xf32>,
    return
  }
}

</mosaic_0001>

<bundles_post_ra>
// kernel: tpu_custom_call.1
= control target key start
LH: loop header
LB: loop body
LE: loop exit
PB: predicated region body
PF: predicated region fallthrough
CT: control target
= control target key end

     0   :  { %s5177_s0 = inlined_call_operand.vmem [shape: f32[64,28], index: 0, kind: input, shape index: {}]   ;;  %s5178_s1 = inlined_call_operand.vmem [shape: bf16[28,512], index: 1, kind: input, shape index: {}]   ;;  %s5179_s2 = inlined_call_operand.vmem [shape: f32[1,512], index: 2, kind: input, shape index: {}]   ;;  %s5180_s3 = inlined_call_operand.hbm [shape: bf16[128,512], index: 3, kind: input, shape index: {}]   ;;  %s5181_s4 = inlined_call_operand.hbm [shape: bf16[256,512], index: 4, kind: input, shape index: {}]   ;;  %s5182_s5 = inlined_call_operand.vmem [shape: f32[1,512], index: 5, kind: input, shape index: {}]   ;;  %s5183_s6 = inlined_call_operand.vmem [shape: f32[1,128], index: 6, kind: input, shape index: {}]   ;;  %s5184_s7 = inlined_call_operand.<no memory space> [shape: f32[1,1], index: 7, kind: input, shape index: {}]   ;;  %s5185_s8 = inlined_call_operand.vmem [shape: f32[8,1], index: 8, kind: output, shape index: {}]  }
   0x1   :  { %v13_v0 = vstv %s5184_s7 }
   0x2   :  { %14 = vst [vmem:[#allocation3] sm:$0x1] %v13_v0 }
   0x3   :  { %15 = vsyncpa [#allocation5], 0 }
   0x4   :  { %16 = vsyncpa [#allocation7], 0  ;;  %s3668_s29 = smov [#allocation4]  }
   0x5   :  { %s28_s30 = sshll.u32 %s3668_s29, 4  ;;  %s29_s30 = int_to_ptr.vmem [resolvable:$true] %s28_s30 }
   0x6   :  { %s3632_s9 = scalar_lea.vmem %s29_s30, 4096  ;;  %p3637_p1 = scmp.lt.s32.totalorder %s29_s30, %s29_s30 }
   0x7   :  { %p3633_p0 = scmp.ne.s32.totalorder %s29_s30, %s3632_s9  ;;  %p3638_p2 = scmp.lt.s32.totalorder %s3632_s9, %s3632_s9 }
   0x9   :  { %p3639_p3 = por %p3638_p2, %p3637_p1 }
   0xb   :  { %p3640_p4 = pnand %p3639_p3, %p3633_p0 }
   0xd   :  { %3643 = shalt.err (!%p3640_p4)
}
   0xe   :  { %s3669_s10 = smov 256   ;;  %s3670_s11 = smov 16  }
   0xf   :  { %34 = dma.hbm_to_vmem [thread:$0]  %s5180_s3, 4096, %s29_s30, [#allocation5], %s3669_s10, %s3669_s10, %s3670_s11  }
  0x10   :  { %s3671_s7 = smov [#allocation6]  }
  0x11   :  { %s40_s14 = sshll.u32 %s3671_s7, 4  ;;  %s41_s14 = int_to_ptr.vmem [resolvable:$true] %s40_s14 }
  0x12   :  { %s3652_s15 = scalar_lea.vmem %s41_s14, 8192  ;;  %p3657_p6 = scmp.lt.s32.totalorder %s41_s14, %s41_s14 }
  0x13   :  { %p3653_p5 = scmp.ne.s32.totalorder %s41_s14, %s3652_s15  ;;  %p3658_p7 = scmp.lt.s32.totalorder %s3652_s15, %s3652_s15 }
  0x15   :  { %p3659_p8 = por %p3658_p7, %p3657_p6 }
  0x17   :  { %p3660_p9 = pnand %p3659_p8, %p3653_p5 }
  0x19   :  { %3663 = shalt.err (!%p3660_p9)
}
  0x1a   :  { %46 = dma.hbm_to_vmem [thread:$0]  %s5181_s4, 8192, %s41_s14, [#allocation7], %s3669_s10, %s3669_s10, %s3670_s11  }
  0x1b   :  { %3664 = dma.done.wait [#allocation5], 4096  }
  0x1c   :  { %3665 = vsyncadd [#allocation5], 4294963200 }
  0x1d   :  { %3666 = dma.done.wait [#allocation7], 8192  }
  0x1e   :  { %3667 = vsyncadd [#allocation7], 4294959104  ;;  %v5186_v1 = vmov 0   ;;  %vm151_vm0 = vcmask 1045504   ;;  %v3031_v4 = vld [vmem:[%s5178_s1 + $0x4] ss:$16 sps:$4 sm:$0xff]   ;;  %v82_v58 = vlaneseq }
  0x1f   :  { %196 = vmatprep.mubr.bf16.mxu0 %v5186_v1  ;;  %269 = vmatprep.mubr.bf16.mxu1 %v5186_v1  ;;  %v3028_v2 = vld [vmem:[%s5178_s1 + $0x24] ss:$16 sps:$4 sm:$0x3f]   ;;  %v3030_v3 = vld [vmem:[%s5178_s1 + $0x20] ss:$16 sps:$4 sm:$0x3f]  }
  0x20   :  { %2837 = vmatprep.subr.msk.bf16.mxu0 %vm151_vm0, %v3028_v2  ;;  %v3033_v5 = vld [vmem:[%s5178_s1] ss:$16 sps:$4 sm:$0xff]   ;;  %v153_v7 = vsel %vm151_vm0, %v3030_v3, 0  ;;  %v61_v8 = vld [vmem:[%s5177_s0 + $0x8] sm:$0xff]  ;;  %vm138_vm1 = vcmask 228352   ;;  %v63_v20 = vld [vmem:[%s5177_s0 + $0x18] sm:$0xff] }
  0x21   :  { %v60_v6 = vld [vmem:[%s5177_s0] sm:$0xff]  ;;  %177 = vmatpush1.bf16.msra.mxu0 %v153_v7  ;;  %v3034_v9 = vld [vmem:[%s5178_s1 + $0x2c] ss:$16 sps:$4 sm:$0x3f]   ;;  %v3039_v13 = vld [vmem:[%s5178_s1 + $0x8] ss:$16 sps:$4 sm:$0xff]  }
  0x22   :  { %v3036_v10 = vld [vmem:[%s5178_s1 + $0x28] ss:$16 sps:$4 sm:$0x3f]   ;;  %178 = vmatprep.subr.bf16.mxu0 %v3031_v4  ;;  %v3037_v11 = vld [vmem:[%s5178_s1 + $0xc] ss:$16 sps:$4 sm:$0xff]   ;;  %2842 = vmatprep.subr.msk.bf16.mxu1 %vm151_vm0, %v3034_v9  ;;  %v68_v14 = vpack.c.bf16 %v61_v8, %v60_v6  ;;  %v62_v19 = vld [vmem:[%s5177_s0 + $0x10] sm:$0xff] }
  0x23   :  { %v159_v12 = vsel %vm151_vm0, %v3036_v10, 0  ;;  %v3763_v15 = vld [vmem:[#allocation6 + $0xe4] ss:$16 sps:$4 sm:$0xff]   ;;  %v3765_v16 = vld [vmem:[#allocation6 + $0xec] ss:$16 sps:$4 sm:$0xff]   ;;  %v69_v21 = vpack.c.bf16 %v63_v20, %v62_v19  ;;  %v3895_v59 = vshrl.u32 %v82_v58, 7 }
  0x24   :  { %250 = vmatpush1.bf16.msra.mxu1 %v159_v12  ;;  %v3767_v17 = vld [vmem:[#allocation6 + $0xe0] ss:$16 sps:$4 sm:$0xff]   ;;  %v3769_v18 = vld [vmem:[#allocation6 + $0xe8] ss:$16 sps:$4 sm:$0xff]   ;;  %v3781_v22 = vld [vmem:[#allocation6 + $0xc4] ss:$16 sps:$4 sm:$0xff]  }
  0x25   :  { %179 = vmatpush1.bf16.msra.mxu0 %v3033_v5  ;;  %251 = vmatprep.subr.bf16.mxu1 %v3037_v11  ;;  %v3783_v23 = vld [vmem:[#allocation6 + $0xcc] ss:$16 sps:$4 sm:$0xff]   ;;  %v3786_v24 = vld [vmem:[#allocation6 + $0xc0] ss:$16 sps:$4 sm:$0xff]   ;;  %v3788_v25 = vld [vmem:[#allocation6 + $0xc8] ss:$16 sps:$4 sm:$0xff]  }
  0x26   :  { %576 = vmatprep.subr.bf16.mxu0 %v3763_v15  ;;  %v3795_v26 = vld [vmem:[#allocation6 + $0xa4] ss:$16 sps:$4 sm:$0xff]   ;;  %v3797_v27 = vld [vmem:[#allocation6 + $0xac] ss:$16 sps:$4 sm:$0xff]   ;;  %v3801_v28 = vld [vmem:[#allocation6 + $0xa0] ss:$16 sps:$4 sm:$0xff]  }
  0x27   :  { %v3803_v29 = vld [vmem:[#allocation6 + $0xa8] ss:$16 sps:$4 sm:$0xff]   ;;  %v64_v30 = vld [vmem:[%s5177_s0 + $0x20] sm:$0xff]  ;;  %v66_v41 = vld [vmem:[%s5177_s0 + $0x30] sm:$0xff]  ;;  %v5190_v60 = vsub.s32 0, %v3895_v59  ;;  %v5189_v0 = vsub.s32 3, %v3895_v59 }
  0x28   :  { %2838 = vmatmul.mubr.msk.bf16.vlgmr.msra.gmra.mxu0 %vm138_vm1, %v68_v14  ;;  %252 = vmatpush1.bf16.msra.mxu1 %v3039_v13  ;;  %v65_v31 = vld [vmem:[%s5177_s0 + $0x28] sm:$0xff]  ;;  %v3820_v35 = vld [vmem:[#allocation6 + $0x80] ss:$16 sps:$4 sm:$0xff]   ;;  %v67_v42 = vld [vmem:[%s5177_s0 + $0x38] sm:$0xff]  ;;  %v5188_v8 = vsub.s32 2, %v3895_v59  ;;  %vm2821_vm2 = vcmask 7168  }
  0x29   :  { %206 = vmatprep.mubr.bf16.mxu0 %v5186_v1  ;;  %616 = vmatprep.subr.bf16.mxu1 %v3765_v16  ;;  %v70_v32 = vpack.c.bf16 %v65_v31, %v64_v30  ;;  %v3815_v33 = vld [vmem:[#allocation6 + $0x84] ss:$16 sps:$4 sm:$0xff]   ;;  %v3817_v34 = vld [vmem:[#allocation6 + $0x8c] ss:$16 sps:$4 sm:$0xff]   ;;  %5403 = vst [vmem:[#allocation10_spill] sm:$0xff] %v3820_v35  ;;  %v71_v44 = vpack.c.bf16 %v67_v42, %v66_v41 }
  0x2a   :  { %577 = vmatpush1.bf16.msra.mxu0 %v3767_v17  ;;  %v3822_v36 = vld [vmem:[#allocation6 + $0x88] ss:$16 sps:$4 sm:$0xff]   ;;  %v3829_v37 = vld [vmem:[#allocation6 + $0x64] ss:$16 sps:$4 sm:$0xff]   ;;  %v3831_v38 = vld [vmem:[#allocation6 + $0x6c] ss:$16 sps:$4 sm:$0xff]  }
  0x2b   :  { %2843 = vmatmul.mubr.msk.bf16.vlgmr.msra.gmra.mxu1 %vm138_vm1, %v68_v14  ;;  %578 = vmatprep.subr.bf16.mxu0 %v3781_v22  ;;  %5404 = vst [vmem:[#allocation11_spill] sm:$0xff] %v3822_v36  ;;  %5405 = vst [vmem:[#allocation12_spill] sm:$0xff] %v3829_v37  ;;  %v3835_v39 = vld [vmem:[#allocation6 + $0x60] ss:$16 sps:$4 sm:$0xff]   ;;  %v3837_v40 = vld [vmem:[#allocation6 + $0x68] ss:$16 sps:$4 sm:$0xff]  }
  0x2c   :  { %279 = vmatprep.mubr.bf16.mxu1 %v5186_v1  ;;  %617 = vmatpush1.bf16.msra.mxu1 %v3769_v18  ;;  %5406 = vst [vmem:[#allocation13_spill] sm:$0xff] %v3831_v38  ;;  %5407 = vst [vmem:[#allocation14_spill] sm:$0xff] %v3835_v39  ;;  %v3847_v43 = vld [vmem:[#allocation6 + $0x44] ss:$16 sps:$4 sm:$0xff]   ;;  %v3851_v45 = vld [vmem:[#allocation6 + $0x40] ss:$16 sps:$4 sm:$0xff]  }
  0x2d   :  { %618 = vmatprep.subr.bf16.mxu1 %v3783_v23  ;;  %5408 = vst [vmem:[#allocation15_spill] sm:$0xff] %v3837_v40  ;;  %5409 = vst [vmem:[#allocation16_spill] sm:$0xff] %v3847_v43  ;;  %v3853_v46 = vld [vmem:[#allocation6 + $0x48] ss:$16 sps:$4 sm:$0xff]   ;;  %v3855_v47 = vld [vmem:[#allocation6 + $0x4c] ss:$16 sps:$4 sm:$0xff]  }
  0x2e   :  { %579 = vmatpush1.bf16.msra.mxu0 %v3786_v24  ;;  %5410 = vst [vmem:[#allocation17_spill] sm:$0xff] %v3851_v45  ;;  %5411 = vst [vmem:[#allocation18_spill] sm:$0xff] %v3853_v46  ;;  %v3858_v48 = vld [vmem:[#allocation6 + $0x24] ss:$16 sps:$4 sm:$0xff]   ;;  %v3860_v49 = vld [vmem:[#allocation6 + $0x2c] ss:$16 sps:$4 sm:$0xff]  }
  0x2f   :  { %580 = vmatprep.subr.bf16.mxu0 %v3795_v26  ;;  %5412 = vst [vmem:[#allocation19_spill] sm:$0xff] %v3855_v47  ;;  %5413 = vst [vmem:[#allocation20_spill] sm:$0xff] %v3858_v48  ;;  %v3868_v50 = vld [vmem:[#allocation6 + $0x20] ss:$16 sps:$4 sm:$0xff]   ;;  %v3870_v51 = vld [vmem:[#allocation6 + $0x28] ss:$16 sps:$4 sm:$0xff]  }
  0x30   :  { %2839 = vmatmul.mubr.msk.bf16.gmra.mxu0 %vm138_vm1, %v69_v21  ;;  %619 = vmatpush1.bf16.msra.mxu1 %v3788_v25  ;;  %5414 = vst [vmem:[#allocation21_spill] sm:$0xff] %v3860_v49  ;;  %5415 = vst [vmem:[#allocation22_spill] sm:$0xff] %v3868_v50  ;;  %v3874_v52 = vld [vmem:[#allocation6 + $0x4] ss:$16 sps:$4 sm:$0xff]   ;;  %v3876_v53 = vld [vmem:[#allocation6 + $0xc] ss:$16 sps:$4 sm:$0xff]  }
  0x31   :  { %216 = vmatprep.mubr.bf16.mxu0 %v5186_v1  ;;  %620 = vmatprep.subr.bf16.mxu1 %v3797_v27  ;;  %5416 = vst [vmem:[#allocation23_spill] sm:$0xff] %v3870_v51  ;;  %5417 = vst [vmem:[#allocation24_spill] sm:$0xff] %v3874_v52  ;;  %v3881_v54 = vld [vmem:[#allocation6] ss:$16 sps:$4 sm:$0xff]   ;;  %v3883_v55 = vld [vmem:[#allocation6 + $0x8] ss:$16 sps:$4 sm:$0xff]  }
  0x32   :  { %581 = vmatpush1.bf16.msra.mxu0 %v3801_v28  ;;  %5418 = vst [vmem:[#allocation25_spill] sm:$0xff] %v3876_v53  ;;  %5419 = vst [vmem:[#allocation26_spill] sm:$0xff] %v3881_v54  ;;  %v3887_v56 = vld [vmem:[#allocation4 + $0xe4] ss:$16 sps:$4 sm:$0xff]   ;;  %v3889_v57 = vld [vmem:[#allocation4 + $0xec] ss:$16 sps:$4 sm:$0xff]  }
  0x33   :  { %2844 = vmatmul.mubr.msk.bf16.gmra.mxu1 %vm138_vm1, %v69_v21  ;;  %582 = vmatprep.subr.bf16.mxu0 %v3815_v33  ;;  %5420 = vst [vmem:[#allocation27_spill] sm:$0xff] %v3883_v55  ;;  %5421 = vst [vmem:[#allocation28_spill] sm:$0xff] %v3887_v56  ;;  %v3901_v61 = vld [vmem:[%s5179_s2] sm:$0xf]  ;;  %v3928_v58 = vld [vmem:[#allocation4 + $0xe8] ss:$16 sps:$4 sm:$0xff]  }
  0x34   :  { %289 = vmatprep.mubr.bf16.mxu1 %v5186_v1  ;;  %621 = vmatpush1.bf16.msra.mxu1 %v3803_v29  ;;  %5422 = vst [vmem:[#allocation29_spill] sm:$0xff] %v3889_v57  ;;  %v3906_v62 = vrot.slane %v3901_v61, %v5190_v60  ;;  %v3913_v6 = vrot.slane %v3901_v61, %v5189_v0  ;;  %v3992_v0 = vld [vmem:[#allocation4 + $0x48] ss:$16 sps:$4 sm:$0xff]   ;;  %v3996_v60 = vld [vmem:[#allocation4 + $0x24] ss:$16 sps:$4 sm:$0xff]  }
  0x35   :  { %622 = vmatprep.subr.bf16.mxu1 %v3817_v34  ;;  %v3920_v10 = vrot.slane %v3901_v61, %v5188_v8  ;;  %v3990_v8 = vld [vmem:[#allocation4 + $0x40] ss:$16 sps:$4 sm:$0xff]  }
  0x36   :  { %583 = vmatpush1.bf16.msra.mxu0 %v3820_v35  ;;  %5423 = vst [vmem:[#allocation30_spill] sm:$0xff] %v3906_v62  ;;  %5430 = vst [vmem:[#allocation37_spill] sm:$0xff] %v3990_v8 }
  0x37   :  { %584 = vmatprep.subr.bf16.mxu0 %v3829_v37 }
  0x38   :  { %2840 = vmatmul.mubr.msk.bf16.gmra.mxu0 %vm138_vm1, %v70_v32  ;;  %623 = vmatpush1.bf16.msra.mxu1 %v3822_v36 }
  0x39   :  { %226 = vmatprep.mubr.bf16.mxu0 %v5186_v1  ;;  %624 = vmatprep.subr.bf16.mxu1 %v3831_v38 }
  0x3a   :  { %585 = vmatpush1.bf16.msra.mxu0 %v3835_v39 }
  0x3b   :  { %2845 = vmatmul.mubr.msk.bf16.gmra.mxu1 %vm138_vm1, %v70_v32  ;;  %586 = vmatprep.subr.bf16.mxu0 %v3847_v43 }
  0x3c   :  { %299 = vmatprep.mubr.bf16.mxu1 %v5186_v1  ;;  %625 = vmatpush1.bf16.msra.mxu1 %v3837_v40 }
  0x3d   :  { %626 = vmatprep.subr.bf16.mxu1 %v3855_v47 }
  0x3e   :  { %587 = vmatpush1.bf16.msra.mxu0 %v3851_v45 }
  0x3f   :  { %588 = vmatprep.subr.bf16.mxu0 %v3858_v48 }
  0x40   :  { %2841 = vmatmul.mubr.msk.bf16.gmra.mxu0 %vm138_vm1, %v71_v44  ;;  %627 = vmatpush1.bf16.msra.mxu1 %v3853_v46 }
  0x41   :  { %608 = vmatprep.mubr.bf16.mxu0 %v5186_v1  ;;  %628 = vmatprep.subr.bf16.mxu1 %v3860_v49 }
  0x42   :  { %589 = vmatpush1.bf16.msra.mxu0 %v3868_v50 }
  0x43   :  { %2846 = vmatmul.mubr.msk.bf16.gmra.mxu1 %vm138_vm1, %v71_v44  ;;  %590 = vmatprep.subr.bf16.mxu0 %v3874_v52  ;;  %v3926_v44 = vld [vmem:[#allocation4 + $0xe0] ss:$16 sps:$4 sm:$0xff]  }
  0x44   :  { %648 = vmatprep.mubr.bf16.mxu1 %v5186_v1  ;;  %629 = vmatpush1.bf16.msra.mxu1 %v3870_v51 }
  0x45   :  { %630 = vmatprep.subr.bf16.mxu1 %v3876_v53 }
  0x46   :  { %591 = vmatpush1.bf16.msra.mxu0 %v3881_v54 }
  0x47   :  { %870 = vmatprep.subr.bf16.mxu0 %v3887_v56 }
  0x48   :  { %631 = vmatpush1.bf16.msra.mxu1 %v3883_v55 }
  0x49   :  { %911 = vmatprep.subr.bf16.mxu1 %v3889_v57 }
  0xe8   :  { %v198_v63 = vpop.f32.mrf.mxu0 }
  0xe9   :  { %v199_v2 = vadd.f32 %v198_v63, %v3906_v62 }
  0xea   :  { %v200_v3 = vpop.f32.mrf.mxu0 }
  0xeb   :  { %v2847_v4 = vmul.f32 -1.442695, %v199_v2  ;;  %v271_v5 = vpop.f32.mrf.mxu1  ;;  %v3932_v2 = vld [vmem:[#allocation4 + $0xc4] ss:$16 sps:$4 sm:$0xff]   ;;  %v3934_v3 = vld [vmem:[#allocation4 + $0xcc] ss:$16 sps:$4 sm:$0xff]  }
  0xec   :  { %v272_v12 = vadd.f32 %v271_v5, %v3920_v10  ;;  %v3942_v5 = vld [vmem:[#allocation4 + $0xc8] ss:$16 sps:$4 sm:$0xff]  }
  0xed   :  { %3184 = vpow2.f32 %v2847_v4  ;;  %v273_v7 = vpop.f32.mrf.mxu1  ;;  %v3940_v4 = vld [vmem:[#allocation4 + $0xc0] ss:$16 sps:$4 sm:$0xff]  }
  0xee   :  { %v274_v9 = vadd.f32 %v273_v7, %v3913_v6  ;;  %v3946_v7 = vld [vmem:[#allocation4 + $0xa4] ss:$16 sps:$4 sm:$0xff]  }
  0xf0   :  { %v2848_v11 = vmul.f32 -1.442695, %v274_v9  ;;  %v3948_v9 = vld [vmem:[#allocation4 + $0xac] ss:$16 sps:$4 sm:$0xff]  }
  0xf2   :  { %3186 = vpow2.f32 %v2848_v11  ;;  %v3954_v11 = vld [vmem:[#allocation4 + $0xa0] ss:$16 sps:$4 sm:$0xff]  }
  0xf3   :  { %3188 = vtanh.f32 %v272_v12  ;;  %v3956_v12 = vld [vmem:[#allocation4 + $0xa8] ss:$16 sps:$4 sm:$0xff]  }
  0xfa   :  { %v3185_v13 = vpop.eup %3184 }
  0xfb   :  { %v370_v14 = vadd.f32 1.0, %v3185_v13  ;;  %v3960_v13 = vld [vmem:[#allocation4 + $0x84] ss:$16 sps:$4 sm:$0xff]  }
  0xfd   :  { %3190 = vrcp.f32 %v370_v14  ;;  %v3962_v14 = vld [vmem:[#allocation4 + $0x8c] ss:$16 sps:$4 sm:$0xff]  }
  0xff   :  { %v3187_v19 = vpop.eup %3186 }
 0x100   :  { %v377_v20 = vadd.f32 1.0, %v3187_v19  ;;  %v3189_v21 = vpop.eup %3188  ;;  %v3966_v19 = vld [vmem:[#allocation4 + $0x80] ss:$16 sps:$4 sm:$0xff]  }
 0x102   :  { %3192 = vrcp.f32 %v377_v20  ;;  %v3968_v20 = vld [vmem:[#allocation4 + $0x88] ss:$16 sps:$4 sm:$0xff]  }
 0x10a   :  { %v3191_v30 = vpop.eup %3190 }
 0x10b   :  { %v3923_v31 = vmul.f32 %v3191_v30, %v3189_v21  ;;  %v3972_v21 = vld [vmem:[#allocation4 + $0x64] ss:$16 sps:$4 sm:$0xff]   ;;  %v3974_v30 = vld [vmem:[#allocation4 + $0x6c] ss:$16 sps:$4 sm:$0xff]  }
 0x10c   :  { %5424 = vst [vmem:[#allocation31_spill] sm:$0xff] %v3972_v21  ;;  %5425 = vst [vmem:[#allocation32_spill] sm:$0xff] %v3974_v30 }
 0x10d   :  { %3194 = vtanh.f32 %v3923_v31 }
 0x10f   :  { %v3193_v32 = vpop.eup %3192 }
 0x11a   :  { %v3195_v41 = vpop.eup %3194 }
 0x11b   :  { %v382_v42 = vmul.f32 %v3195_v41, %v3193_v32  ;;  %v3978_v32 = vld [vmem:[#allocation4 + $0x60] ss:$16 sps:$4 sm:$0xff]   ;;  %v3980_v41 = vld [vmem:[#allocation4 + $0x68] ss:$16 sps:$4 sm:$0xff]  }
 0x11c   :  { %5426 = vst [vmem:[#allocation33_spill] sm:$0xff] %v3978_v32  ;;  %5427 = vst [vmem:[#allocation34_spill] sm:$0xff] %v3980_v41 }
 0x11d   :  { %v3930_v63 = vpack.c.bf16 %v382_v42, %v382_v42  ;;  %v3984_v42 = vld [vmem:[#allocation4 + $0x44] ss:$16 sps:$4 sm:$0xff]  }
 0x11e   :  { %5428 = vst [vmem:[#allocation35_spill] sm:$0xff] %v3984_v42 }
 0x11f   :  { %609 = vmatmul.mubr.bf16.vlgmr.msra.gmra.mxu0 %v3930_v63  ;;  %649 = vmatmul.mubr.bf16.vlgmr.msra.gmra.mxu1 %v3930_v63 }
 0x120   :  { %871 = vmatpush1.bf16.msra.mxu0 %v3926_v44  ;;  %912 = vmatpush1.bf16.msra.mxu1 %v3928_v58 }
 0x121   :  { %872 = vmatprep.subr.bf16.mxu0 %v3932_v2  ;;  %913 = vmatprep.subr.bf16.mxu1 %v3934_v3 }
 0x122   :  { %902 = vmatprep.mubr.bf16.mxu0 %v5186_v1  ;;  %943 = vmatprep.mubr.bf16.mxu1 %v5186_v1  ;;  %v3986_v1 = vld [vmem:[#allocation4 + $0x4c] ss:$16 sps:$4 sm:$0xff]  }
 0x123   :  { %5429 = vst [vmem:[#allocation36_spill] sm:$0xff] %v3986_v1 }
 0x124   :  { %873 = vmatpush1.bf16.msra.mxu0 %v3940_v4  ;;  %914 = vmatpush1.bf16.msra.mxu1 %v3942_v5 }
 0x125   :  { %874 = vmatprep.subr.bf16.mxu0 %v3946_v7  ;;  %915 = vmatprep.subr.bf16.mxu1 %v3948_v9 }
 0x128   :  { %875 = vmatpush1.bf16.msra.mxu0 %v3954_v11  ;;  %916 = vmatpush1.bf16.msra.mxu1 %v3956_v12 }
 0x129   :  { %876 = vmatprep.subr.bf16.mxu0 %v3960_v13  ;;  %917 = vmatprep.subr.bf16.mxu1 %v3962_v14 }
 0x12c   :  { %877 = vmatpush1.bf16.msra.mxu0 %v3966_v19  ;;  %918 = vmatpush1.bf16.msra.mxu1 %v3968_v20 }
 0x12d   :  { %878 = vmatprep.subr.bf16.mxu0 %v3972_v21  ;;  %919 = vmatprep.subr.bf16.mxu1 %v3974_v30  ;;  %v3998_v21 = vld [vmem:[#allocation4 + $0x2c] ss:$16 sps:$4 sm:$0xff]   ;;  %v4002_v30 = vld [vmem:[#allocation4 + $0x20] ss:$16 sps:$4 sm:$0xff]  }
 0x130   :  { %879 = vmatpush1.bf16.msra.mxu0 %v3978_v32  ;;  %920 = vmatpush1.bf16.msra.mxu1 %v3980_v41  ;;  %v4004_v32 = vld [vmem:[#allocation4 + $0x28] ss:$16 sps:$4 sm:$0xff]   ;;  %v4008_v41 = vld [vmem:[#allocation4 + $0x4] ss:$16 sps:$4 sm:$0xff]  }
 0x131   :  { %880 = vmatprep.subr.bf16.mxu0 %v3984_v42  ;;  %921 = vmatprep.subr.bf16.mxu1 %v3986_v1  ;;  %v4010_v42 = vld [vmem:[#allocation4 + $0xc] ss:$16 sps:$4 sm:$0xff]   ;;  %v4014_v1 = vld [vmem:[#allocation4] ss:$16 sps:$4 sm:$0xff]  }
 0x134   :  { %881 = vmatpush1.bf16.msra.mxu0 %v3990_v8  ;;  %922 = vmatpush1.bf16.msra.mxu1 %v3992_v0  ;;  %v4016_v8 = vld [vmem:[#allocation4 + $0x8] ss:$16 sps:$4 sm:$0xff]  }
 0x135   :  { %882 = vmatprep.subr.bf16.mxu0 %v3996_v60  ;;  %923 = vmatprep.subr.bf16.mxu1 %v3998_v21 }
 0x138   :  { %883 = vmatpush1.bf16.msra.mxu0 %v4002_v30  ;;  %924 = vmatpush1.bf16.msra.mxu1 %v4004_v32 }
 0x139   :  { %884 = vmatprep.subr.bf16.mxu0 %v4008_v41  ;;  %925 = vmatprep.subr.bf16.mxu1 %v4010_v42 }
 0x13c   :  { %885 = vmatpush1.bf16.msra.mxu0 %v4014_v1  ;;  %926 = vmatpush1.bf16.msra.mxu1 %v4016_v8 }
 0x13d   :  { %1365 = vmatprep.subr.bf16.mxu0 %v3763_v15  ;;  %1406 = vmatprep.subr.bf16.mxu1 %v3765_v16 }
 0x13f   :  { %903 = vmatmul.mubr.bf16.vlgmr.msra.gmra.mxu0 %v3930_v63  ;;  %944 = vmatmul.mubr.bf16.vlgmr.msra.gmra.mxu1 %v3930_v63  ;;  %v4056_v63 = vld [vmem:[#allocation6 + $0x1e4] ss:$16 sps:$4 sm:$0xff]  }
 0x140   :  { %1366 = vmatpush1.bf16.msra.mxu0 %v3767_v17  ;;  %1407 = vmatpush1.bf16.msra.mxu1 %v3769_v18  ;;  %5431 = vst [vmem:[#allocation38_spill] sm:$0xff] %v4056_v63 }
 0x141   :  { %1367 = vmatprep.subr.bf16.mxu0 %v3781_v22  ;;  %1408 = vmatprep.subr.bf16.mxu1 %v3783_v23 }
 0x144   :  { %1368 = vmatpush1.bf16.msra.mxu0 %v3786_v24  ;;  %1409 = vmatpush1.bf16.msra.mxu1 %v3788_v25 }
 0x145   :  { %1369 = vmatprep.subr.bf16.mxu0 %v3795_v26  ;;  %1410 = vmatprep.subr.bf16.mxu1 %v3797_v27 }
 0x148   :  { %1370 = vmatpush1.bf16.msra.mxu0 %v3801_v28  ;;  %1411 = vmatpush1.bf16.msra.mxu1 %v3803_v29 }
 0x149   :  { %1371 = vmatprep.subr.bf16.mxu0 %v3815_v33  ;;  %1412 = vmatprep.subr.bf16.mxu1 %v3817_v34 }
 0x14c   :  { %1372 = vmatpush1.bf16.msra.mxu0 %v3820_v35  ;;  %1413 = vmatpush1.bf16.msra.mxu1 %v3822_v36 }
 0x14d   :  { %1373 = vmatprep.subr.bf16.mxu0 %v3829_v37  ;;  %1414 = vmatprep.subr.bf16.mxu1 %v3831_v38 }
 0x150   :  { %1374 = vmatpush1.bf16.msra.mxu0 %v3835_v39  ;;  %1415 = vmatpush1.bf16.msra.mxu1 %v3837_v40 }
 0x151   :  { %1375 = vmatprep.subr.bf16.mxu0 %v3847_v43  ;;  %1416 = vmatprep.subr.bf16.mxu1 %v3855_v47 }
 0x154   :  { %1376 = vmatpush1.bf16.msra.mxu0 %v3851_v45  ;;  %1417 = vmatpush1.bf16.msra.mxu1 %v3853_v46  ;;  %v4058_v45 = vld [vmem:[#allocation6 + $0x1ec] ss:$16 sps:$4 sm:$0xff]   ;;  %v4060_v46 = vld [vmem:[#allocation6 + $0x1e0] ss:$16 sps:$4 sm:$0xff]  }
 0x155   :  { %1377 = vmatprep.subr.bf16.mxu0 %v3858_v48  ;;  %1418 = vmatprep.subr.bf16.mxu1 %v3860_v49  ;;  %5432 = vst [vmem:[#allocation39_spill] sm:$0xff] %v4058_v45  ;;  %5433 = vst [vmem:[#allocation40_spill] sm:$0xff] %v4060_v46  ;;  %v4062_v48 = vld [vmem:[#allocation6 + $0x1e8] ss:$16 sps:$4 sm:$0xff]  }
 0x156   :  { %5434 = vst [vmem:[#allocation41_spill] sm:$0xff] %v4062_v48 }
 0x158   :  { %1378 = vmatpush1.bf16.msra.mxu0 %v3868_v50  ;;  %1419 = vmatpush1.bf16.msra.mxu1 %v3870_v51  ;;  %v4102_v51 = vld [vmem:[#allocation6 + $0x164] ss:$16 sps:$4 sm:$0xff]   ;;  %v4120_v50 = vpop.f32.mrf.mxu0 }
 0x159   :  { %1379 = vmatprep.subr.bf16.mxu0 %v3874_v52  ;;  %1420 = vmatprep.subr.bf16.mxu1 %v3876_v53  ;;  %v4068_v53 = vld [vmem:[#allocation6 + $0x1c4] ss:$16 sps:$4 sm:$0xff]   ;;  %v4074_v52 = vld [vmem:[#allocation6 + $0x1c8] ss:$16 sps:$4 sm:$0xff]   ;;  %5447 = vst [vmem:[#allocation54_spill] sm:$0xff] %v4102_v51 }
 0x15a   :  { %5435 = vst [vmem:[#allocation42_spill] sm:$0xff] %v4068_v53  ;;  %5438 = vst [vmem:[#allocation45_spill] sm:$0xff] %v4074_v52  ;;  %v4136_v47 = vpop.f32.mrf.mxu0 }
 0x15c   :  { %1380 = vmatpush1.bf16.msra.mxu0 %v3881_v54  ;;  %1421 = vmatpush1.bf16.msra.mxu1 %v3883_v55  ;;  %v4070_v54 = vld [vmem:[#allocation6 + $0x1cc] ss:$16 sps:$4 sm:$0xff]   ;;  %v4072_v55 = vld [vmem:[#allocation6 + $0x1c0] ss:$16 sps:$4 sm:$0xff]   ;;  %v4152_v40 = vpop.f32.mrf.mxu0 }
 0x15d   :  { %1381 = vmatprep.subr.bf16.mxu0 %v4056_v63  ;;  %1422 = vmatprep.subr.bf16.mxu1 %v4058_v45  ;;  %5436 = vst [vmem:[#allocation43_spill] sm:$0xff] %v4070_v54  ;;  %5437 = vst [vmem:[#allocation44_spill] sm:$0xff] %v4072_v55  ;;  %v4080_v45 = vld [vmem:[#allocation6 + $0x1a4] ss:$16 sps:$4 sm:$0xff]   ;;  %v4086_v63 = vld [vmem:[#allocation6 + $0x1a8] ss:$16 sps:$4 sm:$0xff]  }
 0x15e   :  { %5439 = vst [vmem:[#allocation46_spill] sm:$0xff] %v4080_v45  ;;  %5442 = vst [vmem:[#allocation49_spill] sm:$0xff] %v4086_v63 }
 0x15f   :  { %5462 = vst [vmem:[#allocation69_spill] sm:$0xff] %v4152_v40 }
 0x160   :  { %1382 = vmatpush2.bf16.msra.mxu0 %v4060_v46  ;;  %1423 = vmatpush2.bf16.msra.mxu1 %v4062_v48  ;;  %v4082_v46 = vld [vmem:[#allocation6 + $0x1ac] ss:$16 sps:$4 sm:$0xff]   ;;  %v4084_v48 = vld [vmem:[#allocation6 + $0x1a0] ss:$16 sps:$4 sm:$0xff]  }
 0x161   :  { %1383 = vmatprep.subr.bf16.mxu0 %v4068_v53  ;;  %1424 = vmatprep.subr.bf16.mxu1 %v4070_v54  ;;  %5440 = vst [vmem:[#allocation47_spill] sm:$0xff] %v4082_v46  ;;  %5441 = vst [vmem:[#allocation48_spill] sm:$0xff] %v4084_v48  ;;  %v4092_v54 = vld [vmem:[#allocation6 + $0x184] ss:$16 sps:$4 sm:$0xff]   ;;  %v4098_v53 = vld [vmem:[#allocation6 + $0x188] ss:$16 sps:$4 sm:$0xff]  }
 0x162   :  { %5443 = vst [vmem:[#allocation50_spill] sm:$0xff] %v4092_v54  ;;  %5446 = vst [vmem:[#allocation53_spill] sm:$0xff] %v4098_v53 }
 0x164   :  { %1384 = vmatpush2.bf16.msra.mxu0 %v4072_v55  ;;  %1425 = vmatpush2.bf16.msra.mxu1 %v4074_v52  ;;  %v4094_v55 = vld [vmem:[#allocation6 + $0x18c] ss:$16 sps:$4 sm:$0xff]   ;;  %v4096_v52 = vld [vmem:[#allocation6 + $0x180] ss:$16 sps:$4 sm:$0xff]  }
 0x165   :  { %1385 = vmatprep.subr.bf16.mxu0 %v4080_v45  ;;  %1426 = vmatprep.subr.bf16.mxu1 %v4082_v46  ;;  %5444 = vst [vmem:[#allocation51_spill] sm:$0xff] %v4094_v55  ;;  %5445 = vst [vmem:[#allocation52_spill] sm:$0xff] %v4096_v52  ;;  %v4104_v45 = vld [vmem:[#allocation6 + $0x16c] ss:$16 sps:$4 sm:$0xff]   ;;  %v4114_v46 = vld [vmem:[#allocation6 + $0x144] ss:$16 sps:$4 sm:$0xff]  }
 0x166   :  { %5448 = vst [vmem:[#allocation55_spill] sm:$0xff] %v4104_v45  ;;  %5451 = vst [vmem:[#allocation58_spill] sm:$0xff] %v4114_v46 }
 0x168   :  { %1386 = vmatpush2.bf16.msra.mxu0 %v4084_v48  ;;  %1427 = vmatpush2.bf16.msra.mxu1 %v4086_v63  ;;  %v4108_v63 = vld [vmem:[#allocation6 + $0x160] ss:$16 sps:$4 sm:$0xff]   ;;  %v4110_v48 = vld [vmem:[#allocation6 + $0x168] ss:$16 sps:$4 sm:$0xff]  }
 0x169   :  { %1387 = vmatprep.subr.bf16.mxu0 %v4092_v54  ;;  %1428 = vmatprep.subr.bf16.mxu1 %v4094_v55  ;;  %5449 = vst [vmem:[#allocation56_spill] sm:$0xff] %v4108_v63  ;;  %5450 = vst [vmem:[#allocation57_spill] sm:$0xff] %v4110_v48  ;;  %v4116_v54 = vld [vmem:[#allocation6 + $0x14c] ss:$16 sps:$4 sm:$0xff]   ;;  %v4118_v55 = vpop.f32.mrf.mxu1 }
 0x16a   :  { %5452 = vst [vmem:[#allocation59_spill] sm:$0xff] %v4116_v54 }
 0x16b   :  { %v4134_v49 = vpop.f32.mrf.mxu1 }
 0x16c   :  { %1388 = vmatpush2.bf16.msra.mxu0 %v4096_v52  ;;  %1429 = vmatpush2.bf16.msra.mxu1 %v4098_v53  ;;  %v4124_v53 = vld [vmem:[#allocation6 + $0x140] ss:$16 sps:$4 sm:$0xff]   ;;  %v4126_v52 = vld [vmem:[#allocation6 + $0x148] ss:$16 sps:$4 sm:$0xff]  }
 0x16d   :  { %1389 = vmatprep.subr.bf16.mxu0 %v4102_v51  ;;  %1430 = vmatprep.subr.bf16.mxu1 %v4104_v45  ;;  %5453 = vst [vmem:[#allocation60_spill] sm:$0xff] %v4124_v53  ;;  %5454 = vst [vmem:[#allocation61_spill] sm:$0xff] %v4126_v52  ;;  %v4130_v45 = vld [vmem:[#allocation6 + $0x124] ss:$16 sps:$4 sm:$0xff]   ;;  %v4132_v51 = vld [vmem:[#allocation6 + $0x12c] ss:$16 sps:$4 sm:$0xff]   ;;  %v4138_v43 = vpop.f32.mrf.mxu1 }
 0x16e   :  { %5455 = vst [vmem:[#allocation62_spill] sm:$0xff] %v4130_v45  ;;  %5456 = vst [vmem:[#allocation63_spill] sm:$0xff] %v4132_v51 }
 0x16f   :  { %5457 = vst [vmem:[#allocation64_spill] sm:$0xff] %v4138_v43  ;;  %v4154_v39 = vpop.f32.mrf.mxu1  ;;  %v4158_v43 = vld [vmem:[#allocation6 + $0x100] ss:$16 sps:$4 sm:$0xff]  }
 0x170   :  { %1390 = vmatpush2.bf16.msra.mxu0 %v4108_v63  ;;  %1431 = vmatpush2.bf16.msra.mxu1 %v4110_v48  ;;  %v4142_v48 = vld [vmem:[#allocation6 + $0x120] ss:$16 sps:$4 sm:$0xff]   ;;  %v4144_v63 = vld [vmem:[#allocation6 + $0x128] ss:$16 sps:$4 sm:$0xff]   ;;  %5463 = vst [vmem:[#allocation70_spill] sm:$0xff] %v4154_v39  ;;  %5464 = vst [vmem:[#allocation71_spill] sm:$0xff] %v4158_v43 }
 0x171   :  { %1391 = vmatprep.subr.bf16.mxu0 %v4114_v46  ;;  %1432 = vmatprep.subr.bf16.mxu1 %v4116_v54  ;;  %5458 = vst [vmem:[#allocation65_spill] sm:$0xff] %v4142_v48  ;;  %5459 = vst [vmem:[#allocation66_spill] sm:$0xff] %v4144_v63  ;;  %v4148_v54 = vld [vmem:[#allocation6 + $0x104] ss:$16 sps:$4 sm:$0xff]   ;;  %v4150_v46 = vld [vmem:[#allocation6 + $0x10c] ss:$16 sps:$4 sm:$0xff]  }
 0x172   :  { %5460 = vst [vmem:[#allocation67_spill] sm:$0xff] %v4148_v54  ;;  %5461 = vst [vmem:[#allocation68_spill] sm:$0xff] %v4150_v46 }
 0x174   :  { %1392 = vmatpush2.bf16.msra.mxu0 %v4124_v53  ;;  %1433 = vmatpush2.bf16.msra.mxu1 %v4126_v52  ;;  %v4160_v52 = vld [vmem:[#allocation6 + $0x108] ss:$16 sps:$4 sm:$0xff]  }
 0x175   :  { %1393 = vmatprep.subr.bf16.mxu0 %v4130_v45  ;;  %1434 = vmatprep.subr.bf16.mxu1 %v4132_v51  ;;  %5465 = vst [vmem:[#allocation72_spill] sm:$0xff] %v4160_v52  ;;  %v4164_v51 = vpop.f32.mrf.mxu0  ;;  %v4166_v45 = vpop.f32.mrf.mxu1 }
 0x176   :  { %5466 = vst [vmem:[#allocation73_spill] sm:$0xff] %v4164_v51  ;;  %5467 = vst [vmem:[#allocation74_spill] sm:$0xff] %v4166_v45 }
 0x177   :  { %v4172_v39 = vpop.f32.mrf.mxu0  ;;  %v4174_v40 = vpop.f32.mrf.mxu1 }
 0x178   :  { %1394 = vmatpush2.bf16.msra.mxu0 %v4142_v48  ;;  %1435 = vmatpush2.bf16.msra.mxu1 %v4144_v63  ;;  %5468 = vst [vmem:[#allocation75_spill] sm:$0xff] %v4172_v39  ;;  %5469 = vst [vmem:[#allocation76_spill] sm:$0xff] %v4174_v40  ;;  %v5489_v48 = vsub.s32 3, %v3895_v59 }
 0x179   :  { %1395 = vmatprep.subr.bf16.mxu0 %v4148_v54  ;;  %1436 = vmatprep.subr.bf16.mxu1 %v4150_v46  ;;  %v4176_v63 = vpop.f32.mrf.mxu0  ;;  %v4178_v54 = vpop.f32.mrf.mxu1 }
 0x17a   :  { %5470 = vst [vmem:[#allocation77_spill] sm:$0xff] %v4176_v63  ;;  %5471 = vst [vmem:[#allocation78_spill] sm:$0xff] %v4178_v54 }
 0x17b   :  { %v4180_v46 = vpop.f32.mrf.mxu0  ;;  %v4182_v51 = vpop.f32.mrf.mxu1 }
 0x17c   :  { %1396 = vmatpush2.bf16.msra.mxu0 %v4158_v43  ;;  %1437 = vmatpush2.bf16.msra.mxu1 %v4160_v52  ;;  %5472 = vst [vmem:[#allocation79_spill] sm:$0xff] %v4180_v46  ;;  %5473 = vst [vmem:[#allocation80_spill] sm:$0xff] %v4182_v51 }
 0x17d   :  { %1476 = vmatprep.subr.bf16.mxu0 %v3887_v56  ;;  %1517 = vmatprep.subr.bf16.mxu1 %v3889_v57  ;;  %v4184_v45 = vpop.f32.mrf.mxu0  ;;  %v4186_v43 = vpop.f32.mrf.mxu1 }
 0x17e   :  { %5474 = vst [vmem:[#allocation81_spill] sm:$0xff] %v4184_v45  ;;  %5475 = vst [vmem:[#allocation82_spill] sm:$0xff] %v4186_v43  ;;  %v4209_v43 = vld [vmem:[%s5182_s5] sm:$0xf] }
 0x17f   :  { %v4188_v52 = vpop.f32.mrf.mxu0  ;;  %v4190_v56 = vpop.f32.mrf.mxu1  ;;  %v4224_v53 = vrot.slane %v4209_v43, %v5489_v48 }
 0x180   :  { %5476 = vst [vmem:[#allocation83_spill] sm:$0xff] %v4188_v52  ;;  %5477 = vst [vmem:[#allocation84_spill] sm:$0xff] %v4190_v56 }
 0x181   :  { %v4192_v57 = vpop.f32.mrf.mxu0  ;;  %v4194_v39 = vpop.f32.mrf.mxu1  ;;  %5490 = vst [vmem:[#allocation95_spill] sm:$0xff] %v4224_v53 }
 0x182   :  { %5478 = vst [vmem:[#allocation85_spill] sm:$0xff] %v4192_v57  ;;  %5479 = vst [vmem:[#allocation86_spill] sm:$0xff] %v4194_v39  ;;  %v5486_v57 = vsub.s32 0, %v3895_v59 }
 0x183   :  { %v4196_v40 = vpop.f32.mrf.mxu0  ;;  %v4198_v63 = vpop.f32.mrf.mxu1 }
 0x184   :  { %5480 = vst [vmem:[#allocation87_spill] sm:$0xff] %v4196_v40  ;;  %5481 = vst [vmem:[#allocation88_spill] sm:$0xff] %v4198_v63  ;;  %v4216_v39 = vrot.slane %v4209_v43, %v5486_v57 }
 0x185   :  { %v4200_v54 = vpop.f32.mrf.mxu0  ;;  %v4202_v46 = vpop.f32.mrf.mxu1 }
 0x186   :  { %5482 = vst [vmem:[#allocation89_spill] sm:$0xff] %v4200_v54  ;;  %5483 = vst [vmem:[#allocation90_spill] sm:$0xff] %v4202_v46 }
 0x187   :  { %v4204_v51 = vpop.f32.mrf.mxu0  ;;  %v4211_v56 = vpop.f32.mrf.mxu1  ;;  %5487 = vst [vmem:[#allocation93_spill] sm:$0xff] %v4216_v39 }
 0x188   :  { %5484 = vst [vmem:[#allocation91_spill] sm:$0xff] %v4204_v51  ;;  %5485 = vst [vmem:[#allocation92_spill] sm:$0xff] %v4211_v56 }
 0x189   :  { %v4218_v40 = vpop.f32.mrf.mxu0 }
 0x18a   :  { %5488 = vst [vmem:[#allocation94_spill] sm:$0xff] %v4218_v40  ;;  %v5491_v40 = vsub.s32 2, %v3895_v59 }
 0x18c   :  { %v4230_v35 = vrot.slane %v4209_v43, %v5491_v40  ;;  %v203_v40 = vadd.f32 %v4120_v50, %v3906_v62 }
 0x18e   :  { %5492 = vst [vmem:[#allocation96_spill] sm:$0xff] %v4230_v35 }
 0x1df   :  { %v610_v63 = vpop.f32.mrf.mxu0  ;;  %v650_v54 = vpop.f32.mrf.mxu1 }
 0x1e0   :  { %v611_v46 = vadd.f32 %v610_v63, %v4216_v39 }
 0x1e1   :  { %v612_v52 = vpop.f32.mrf.mxu0  ;;  %v652_v51 = vpop.f32.mrf.mxu1 }
 0x1e2   :  { %v2881_v45 = vmul.f32 -1.442695, %v611_v46  ;;  %v653_v36 = vadd.f32 %v652_v51, %v4224_v53  ;;  %v651_v46 = vadd.f32 %v650_v54, %v4230_v35 }
 0x1e3   :  { %v613_v56 = vpop.f32.mrf.mxu0  ;;  %v654_v38 = vpop.f32.mrf.mxu1 }
 0x1e4   :  { %3196 = vpow2.f32 %v2881_v45  ;;  %v2882_v52 = vmul.f32 -1.442695, %v653_v36  ;;  %v5295_v38 = vsub.s32 1, %v3895_v59 }
 0x1e5   :  { %v614_v37 = vpop.f32.mrf.mxu0  ;;  %v655_v57 = vpop.f32.mrf.mxu1 }
 0x1e6   :  { %3198 = vpow2.f32 %v2882_v52  ;;  %v4237_v37 = vrot.slane %v3901_v61, %v5295_v38 }
 0x1e7   :  { %3200 = vtanh.f32 %v651_v46 }
 0x1e8   :  { %v205_v56 = vadd.f32 %v4136_v47, %v4237_v37  ;;  %v278_v47 = vadd.f32 %v4134_v49, %v3913_v6 }
 0x1f1   :  { %v3197_v63 = vpop.eup %3196 }
 0x1f2   :  { %v660_v39 = vadd.f32 1.0, %v3197_v63 }
 0x1f3   :  { %v3199_v45 = vpop.eup %3198 }
 0x1f4   :  { %3202 = vrcp.f32 %v660_v39  ;;  %v667_v48 = vadd.f32 1.0, %v3199_v45  ;;  %v3201_v54 = vpop.eup %3200 }
 0x1f6   :  { %3204 = vrcp.f32 %v667_v48 }
 0x1ff   :  { %v904_v36 = vpop.f32.mrf.mxu0  ;;  %v945_v51 = vpop.f32.mrf.mxu1 }
 0x200   :  { %v952_v57 = vadd.f32 %v904_v36, %v203_v40  ;;  %v276_v36 = vadd.f32 %v4118_v55, %v3920_v10 }
 0x201   :  { %v3203_v39 = vpop.eup %3202  ;;  %v906_v52 = vpop.f32.mrf.mxu0 }
 0x202   :  { %v947_v46 = vpop.f32.mrf.mxu1  ;;  %v4243_v63 = vmul.f32 %v3203_v39, %v3201_v54  ;;  %v2915_v35 = vmul.f32 -1.442695, %v952_v57  ;;  %v953_v53 = vadd.f32 %v906_v52, %v205_v56  ;;  %v954_v56 = vadd.f32 %v945_v51, %v276_v36 }
 0x203   :  { %v908_v61 = vpop.f32.mrf.mxu0  ;;  %v955_v40 = vadd.f32 %v947_v46, %v278_v47  ;;  %v3205_v57 = vpop.eup %3204 }
 0x204   :  { %v949_v38 = vpop.f32.mrf.mxu1  ;;  %3206 = vtanh.f32 %v4243_v63  ;;  %v2917_v50 = vmul.f32 -1.442695, %v953_v53 }
 0x205   :  { %3208 = vpow2.f32 %v2915_v35  ;;  %v909_v45 = vpop.f32.mrf.mxu0  ;;  %v2916_v54 = vmul.f32 -1.442695, %v955_v40 }
 0x206   :  { %v950_v62 = vpop.f32.mrf.mxu1  ;;  %3210 = vpow2.f32 %v2917_v50 }
 0x207   :  { %3212 = vpow2.f32 %v2916_v54 }
 0x208   :  { %3214 = vtanh.f32 %v954_v56  ;;  %v5494_v56 = vld [vmem:[#allocation31_spill] sm:$0xff] }
 0x211   :  { %v3207_v48 = vpop.eup %3206 }
 0x212   :  { %v3209_v39 = vpop.eup %3208  ;;  %v672_v38 = vmul.f32 %v3207_v48, %v3205_v57  ;;  %v5495_v48 = vld [vmem:[#allocation32_spill] sm:$0xff] }
 0x213   :  { %v3211_v52 = vpop.eup %3210  ;;  %v959_v61 = vadd.f32 1.0, %v3209_v39  ;;  %v5496_v39 = vld [vmem:[#allocation33_spill] sm:$0xff] }
 0x214   :  { %v972_v35 = vadd.f32 1.0, %v3211_v52  ;;  %v673_v53 = vpack.c.bf16 %v672_v38, %v672_v38  ;;  %v3213_v49 = vpop.eup %3212  ;;  %v5497_v38 = vld [vmem:[#allocation34_spill] sm:$0xff]  ;;  %v5498_v52 = vld [vmem:[#allocation35_spill] sm:$0xff] }
 0x215   :  { %3216 = vrcp.f32 %v959_v61  ;;  %v3215_v62 = vpop.eup %3214  ;;  %v966_v50 = vadd.f32 1.0, %v3213_v49  ;;  %v5499_v61 = vld [vmem:[#allocation36_spill] sm:$0xff]  ;;  %v5516_v49 = vld [vmem:[#allocation25_spill] sm:$0xff] }
 0x216   :  { %3218 = vrcp.f32 %v972_v35  ;;  %1397 = vmatprep.mubr.bf16.mxu0 %v673_v53  ;;  %1438 = vmatprep.mubr.bf16.mxu1 %v673_v53  ;;  %v5500_v35 = vld [vmem:[#allocation37_spill] sm:$0xff]  ;;  %v5515_v53 = vld [vmem:[#allocation24_spill] sm:$0xff] }
 0x217   :  { %3220 = vrcp.f32 %v966_v50  ;;  %v5520_v50 = vld [vmem:[#allocation39_spill] sm:$0xff] }
 0x222   :  { %v3217_v46 = vpop.eup %3216 }
 0x223   :  { %v3219_v55 = vpop.eup %3218  ;;  %v976_v45 = vmul.f32 %v3217_v46, %v3215_v62  ;;  %v5517_v62 = vld [vmem:[#allocation26_spill] sm:$0xff]  ;;  %v5518_v46 = vld [vmem:[#allocation27_spill] sm:$0xff] }
 0x224   :  { %v975_v51 = vmul.f32 %v3219_v55, %v3923_v31  ;;  %v3221_v40 = vpop.eup %3220  ;;  %v5493_v31 = vmov 0   ;;  %v5519_v55 = vld [vmem:[#allocation38_spill] sm:$0xff] }
 0x226   :  { %v4251_v47 = vadd.f32 %v976_v45, %v975_v51  ;;  %v5521_v45 = vld [vmem:[#allocation40_spill] sm:$0xff]  ;;  %v5522_v51 = vld [vmem:[#allocation41_spill] sm:$0xff] }
 0x228   :  { %3222 = vtanh.f32 %v4251_v47 }
 0x235   :  { %v3223_v36 = vpop.eup %3222 }
 0x236   :  { %v979_v54 = vmul.f32 %v3223_v36, %v3221_v40  ;;  %v5523_v40 = vld [vmem:[#allocation42_spill] sm:$0xff]  ;;  %v5524_v36 = vld [vmem:[#allocation43_spill] sm:$0xff] }
 0x238   :  { %v980_v57 = vpack.c.bf16 %v979_v54, %v979_v54  ;;  %v5525_v54 = vld [vmem:[#allocation44_spill] sm:$0xff] }
 0x23a   :  { %1398 = vmatmul.mubr.bf16.vlgmr.msra.gmra.mxu0 %v980_v57  ;;  %1439 = vmatmul.mubr.bf16.vlgmr.msra.gmra.mxu1 %v980_v57 }
 0x23b   :  { %1477 = vmatpush1.bf16.msra.mxu0 %v3926_v44  ;;  %1518 = vmatpush1.bf16.msra.mxu1 %v3928_v58 }
 0x23c   :  { %1478 = vmatprep.subr.bf16.mxu0 %v3932_v2  ;;  %1519 = vmatprep.subr.bf16.mxu1 %v3934_v3 }
 0x23d   :  { %1508 = vmatprep.mubr.bf16.mxu0 %v5493_v31  ;;  %1549 = vmatprep.mubr.bf16.mxu1 %v5493_v31 }
 0x23f   :  { %1479 = vmatpush1.bf16.msra.mxu0 %v3940_v4  ;;  %1520 = vmatpush1.bf16.msra.mxu1 %v3942_v5 }
 0x240   :  { %1480 = vmatprep.subr.bf16.mxu0 %v3946_v7  ;;  %1521 = vmatprep.subr.bf16.mxu1 %v3948_v9 }
 0x243   :  { %1481 = vmatpush1.bf16.msra.mxu0 %v3954_v11  ;;  %1522 = vmatpush1.bf16.msra.mxu1 %v3956_v12 }
 0x244   :  { %1482 = vmatprep.subr.bf16.mxu0 %v3960_v13  ;;  %1523 = vmatprep.subr.bf16.mxu1 %v3962_v14 }
 0x247   :  { %1483 = vmatpush1.bf16.msra.mxu0 %v3966_v19  ;;  %1524 = vmatpush1.bf16.msra.mxu1 %v3968_v20 }
 0x248   :  { %1484 = vmatprep.subr.bf16.mxu0 %v5494_v56  ;;  %1525 = vmatprep.subr.bf16.mxu1 %v5495_v48 }
 0x24b   :  { %1485 = vmatpush1.bf16.msra.mxu0 %v5496_v39  ;;  %1526 = vmatpush1.bf16.msra.mxu1 %v5497_v38 }
 0x24c   :  { %1486 = vmatprep.subr.bf16.mxu0 %v5498_v52  ;;  %1527 = vmatprep.subr.bf16.mxu1 %v5499_v61 }
 0x24f   :  { %1487 = vmatpush1.bf16.msra.mxu0 %v5500_v35  ;;  %1528 = vmatpush1.bf16.msra.mxu1 %v3992_v0 }
 0x250   :  { %1488 = vmatprep.subr.bf16.mxu0 %v3996_v60  ;;  %1529 = vmatprep.subr.bf16.mxu1 %v3998_v21 }
 0x253   :  { %1489 = vmatpush1.bf16.msra.mxu0 %v4002_v30  ;;  %1530 = vmatpush1.bf16.msra.mxu1 %v4004_v32 }
 0x254   :  { %1490 = vmatprep.subr.bf16.mxu0 %v4008_v41  ;;  %1531 = vmatprep.subr.bf16.mxu1 %v4010_v42 }
 0x257   :  { %1491 = vmatpush1.bf16.msra.mxu0 %v4014_v1  ;;  %1532 = vmatpush1.bf16.msra.mxu1 %v4016_v8 }
 0x258   :  { %1587 = vmatprep.subr.bf16.mxu0 %v3763_v15  ;;  %1628 = vmatprep.subr.bf16.mxu1 %v3765_v16  ;;  %v5501_v15 = vld [vmem:[#allocation10_spill] sm:$0xff]  ;;  %v5502_v16 = vld [vmem:[#allocation11_spill] sm:$0xff] }
 0x25a   :  { %1509 = vmatmul.mubr.bf16.vlgmr.msra.gmra.mxu0 %v980_v57  ;;  %1550 = vmatmul.mubr.bf16.vlgmr.msra.gmra.mxu1 %v980_v57  ;;  %v5526_v57 = vld [vmem:[#allocation45_spill] sm:$0xff] }
 0x25b   :  { %1588 = vmatpush1.bf16.msra.mxu0 %v3767_v17  ;;  %1629 = vmatpush1.bf16.msra.mxu1 %v3769_v18  ;;  %v5503_v17 = vld [vmem:[#allocation12_spill] sm:$0xff]  ;;  %v5504_v18 = vld [vmem:[#allocation13_spill] sm:$0xff] }
 0x25c   :  { %1589 = vmatprep.subr.bf16.mxu0 %v3781_v22  ;;  %1630 = vmatprep.subr.bf16.mxu1 %v3783_v23  ;;  %v5505_v22 = vld [vmem:[#allocation14_spill] sm:$0xff]  ;;  %v5506_v23 = vld [vmem:[#allocation15_spill] sm:$0xff] }
 0x25f   :  { %1590 = vmatpush1.bf16.msra.mxu0 %v3786_v24  ;;  %1631 = vmatpush1.bf16.msra.mxu1 %v3788_v25  ;;  %v5507_v24 = vld [vmem:[#allocation16_spill] sm:$0xff]  ;;  %v5508_v25 = vld [vmem:[#allocation19_spill] sm:$0xff] }
 0x260   :  { %1591 = vmatprep.subr.bf16.mxu0 %v3795_v26  ;;  %1632 = vmatprep.subr.bf16.mxu1 %v3797_v27  ;;  %v5509_v26 = vld [vmem:[#allocation17_spill] sm:$0xff]  ;;  %v5510_v27 = vld [vmem:[#allocation18_spill] sm:$0xff] }
 0x263   :  { %1592 = vmatpush1.bf16.msra.mxu0 %v3801_v28  ;;  %1633 = vmatpush1.bf16.msra.mxu1 %v3803_v29  ;;  %v5511_v28 = vld [vmem:[#allocation20_spill] sm:$0xff]  ;;  %v5512_v29 = vld [vmem:[#allocation21_spill] sm:$0xff] }
 0x264   :  { %1593 = vmatprep.subr.bf16.mxu0 %v3815_v33  ;;  %1634 = vmatprep.subr.bf16.mxu1 %v3817_v34  ;;  %v5513_v33 = vld [vmem:[#allocation22_spill] sm:$0xff]  ;;  %v5514_v34 = vld [vmem:[#allocation23_spill] sm:$0xff] }
 0x267   :  { %1594 = vmatpush1.bf16.msra.mxu0 %v5501_v15  ;;  %1635 = vmatpush1.bf16.msra.mxu1 %v5502_v16  ;;  %v5527_v15 = vld [vmem:[#allocation46_spill] sm:$0xff]  ;;  %v5528_v16 = vld [vmem:[#allocation47_spill] sm:$0xff] }
 0x268   :  { %1595 = vmatprep.subr.bf16.mxu0 %v5503_v17  ;;  %1636 = vmatprep.subr.bf16.mxu1 %v5504_v18  ;;  %v5529_v17 = vld [vmem:[#allocation48_spill] sm:$0xff]  ;;  %v5530_v18 = vld [vmem:[#allocation49_spill] sm:$0xff] }
 0x26b   :  { %1596 = vmatpush1.bf16.msra.mxu0 %v5505_v22  ;;  %1637 = vmatpush1.bf16.msra.mxu1 %v5506_v23  ;;  %v5531_v22 = vld [vmem:[#allocation50_spill] sm:$0xff]  ;;  %v5532_v23 = vld [vmem:[#allocation51_spill] sm:$0xff] }
 0x26c   :  { %1597 = vmatprep.subr.bf16.mxu0 %v5507_v24  ;;  %1638 = vmatprep.subr.bf16.mxu1 %v5508_v25  ;;  %v5533_v24 = vld [vmem:[#allocation52_spill] sm:$0xff]  ;;  %v5534_v25 = vld [vmem:[#allocation53_spill] sm:$0xff] }
 0x26f   :  { %1598 = vmatpush1.bf16.msra.mxu0 %v5509_v26  ;;  %1639 = vmatpush1.bf16.msra.mxu1 %v5510_v27  ;;  %v5535_v26 = vld [vmem:[#allocation54_spill] sm:$0xff]  ;;  %v5536_v27 = vld [vmem:[#allocation55_spill] sm:$0xff] }
 0x270   :  { %1599 = vmatprep.subr.bf16.mxu0 %v5511_v28  ;;  %1640 = vmatprep.subr.bf16.mxu1 %v5512_v29  ;;  %v5537_v28 = vld [vmem:[#allocation56_spill] sm:$0xff]  ;;  %v5538_v29 = vld [vmem:[#allocation57_spill] sm:$0xff] }
 0x273   :  { %1600 = vmatpush1.bf16.msra.mxu0 %v5513_v33  ;;  %1641 = vmatpush1.bf16.msra.mxu1 %v5514_v34  ;;  %v5539_v33 = vld [vmem:[#allocation58_spill] sm:$0xff]  ;;  %v5540_v34 = vld [vmem:[#allocation59_spill] sm:$0xff] }
 0x274   :  { %1601 = vmatprep.subr.bf16.mxu0 %v5515_v53  ;;  %1642 = vmatprep.subr.bf16.mxu1 %v5516_v49  ;;  %v5541_v53 = vld [vmem:[#allocation60_spill] sm:$0xff]  ;;  %v5542_v49 = vld [vmem:[#allocation61_spill] sm:$0xff] }
 0x277   :  { %1602 = vmatpush1.bf16.msra.mxu0 %v5517_v62  ;;  %1643 = vmatpush1.bf16.msra.mxu1 %v5518_v46  ;;  %v5543_v62 = vld [vmem:[#allocation62_spill] sm:$0xff]  ;;  %v5544_v46 = vld [vmem:[#allocation63_spill] sm:$0xff] }
 0x278   :  { %1603 = vmatprep.subr.bf16.mxu0 %v5519_v55  ;;  %1644 = vmatprep.subr.bf16.mxu1 %v5520_v50 }
 0x27b   :  { %1604 = vmatpush2.bf16.msra.mxu0 %v5521_v45  ;;  %1645 = vmatpush2.bf16.msra.mxu1 %v5522_v51 }
 0x27c   :  { %1605 = vmatprep.subr.bf16.mxu0 %v5523_v40  ;;  %1646 = vmatprep.subr.bf16.mxu1 %v5524_v36 }
 0x27f   :  { %1606 = vmatpush2.bf16.msra.mxu0 %v5525_v54  ;;  %1647 = vmatpush2.bf16.msra.mxu1 %v5526_v57 }
 0x280   :  { %1607 = vmatprep.subr.bf16.mxu0 %v5527_v15  ;;  %1648 = vmatprep.subr.bf16.mxu1 %v5528_v16  ;;  %v5557_v16 = vld [vmem:[#allocation96_spill] sm:$0xff] }
 0x283   :  { %1608 = vmatpush2.bf16.msra.mxu0 %v5529_v17  ;;  %1649 = vmatpush2.bf16.msra.mxu1 %v5530_v18 }
 0x284   :  { %1609 = vmatprep.subr.bf16.mxu0 %v5531_v22  ;;  %1650 = vmatprep.subr.bf16.mxu1 %v5532_v23 }
 0x287   :  { %1610 = vmatpush2.bf16.msra.mxu0 %v5533_v24  ;;  %1651 = vmatpush2.bf16.msra.mxu1 %v5534_v25  ;;  %v5545_v25 = vld [vmem:[#allocation65_spill] sm:$0xff] }
 0x288   :  { %1611 = vmatprep.subr.bf16.mxu0 %v5535_v26  ;;  %1652 = vmatprep.subr.bf16.mxu1 %v5536_v27  ;;  %v5546_v26 = vld [vmem:[#allocation66_spill] sm:$0xff]  ;;  %v5547_v27 = vld [vmem:[#allocation67_spill] sm:$0xff] }
 0x28b   :  { %1612 = vmatpush2.bf16.msra.mxu0 %v5537_v28  ;;  %1653 = vmatpush2.bf16.msra.mxu1 %v5538_v29  ;;  %v5548_v28 = vld [vmem:[#allocation68_spill] sm:$0xff]  ;;  %v5549_v29 = vld [vmem:[#allocation71_spill] sm:$0xff] }
 0x28c   :  { %1613 = vmatprep.subr.bf16.mxu0 %v5539_v33  ;;  %1654 = vmatprep.subr.bf16.mxu1 %v5540_v34  ;;  %v5550_v33 = vld [vmem:[#allocation72_spill] sm:$0xff] }
 0x28d   :  { %v5551_v34 = vld [vmem:[#allocation28_spill] sm:$0xff] }
 0x28f   :  { %1614 = vmatpush2.bf16.msra.mxu0 %v5541_v53  ;;  %1655 = vmatpush2.bf16.msra.mxu1 %v5542_v49  ;;  %v5552_v53 = vld [vmem:[#allocation29_spill] sm:$0xff] }
 0x290   :  { %1615 = vmatprep.subr.bf16.mxu0 %v5543_v62  ;;  %1656 = vmatprep.subr.bf16.mxu1 %v5544_v46  ;;  %v5553_v62 = vsub.s32 1, %v3895_v59  ;;  %v5556_v59 = vld [vmem:[#allocation95_spill] sm:$0xff] }
 0x292   :  { %v4355_v46 = vrot.slane %v4209_v43, %v5553_v62 }
 0x293   :  { %1616 = vmatpush2.bf16.msra.mxu0 %v5545_v25  ;;  %1657 = vmatpush2.bf16.msra.mxu1 %v5546_v26  ;;  %v5555_v26 = vld [vmem:[#allocation93_spill] sm:$0xff] }
 0x294   :  { %1617 = vmatprep.subr.bf16.mxu0 %v5547_v27  ;;  %1658 = vmatprep.subr.bf16.mxu1 %v5548_v28  ;;  %5554 = vst [vmem:[#allocation31_spill] sm:$0xff] %v4355_v46 }
 0x297   :  { %1618 = vmatpush2.bf16.msra.mxu0 %v5549_v29  ;;  %1659 = vmatpush2.bf16.msra.mxu1 %v5550_v33 }
 0x298   :  { %1698 = vmatprep.subr.bf16.mxu0 %v5551_v34  ;;  %1739 = vmatprep.subr.bf16.mxu1 %v5552_v53 }
 0x2fa   :  { %v1399_v25 = vpop.f32.mrf.mxu0  ;;  %v1440_v49 = vpop.f32.mrf.mxu1 }
 0x2fb   :  { %v1400_v24 = vadd.f32 %v1399_v25, %v5555_v26  ;;  %v1441_v15 = vadd.f32 %v1440_v49, %v5557_v16 }
 0x2fc   :  { %v1401_v27 = vpop.f32.mrf.mxu0  ;;  %v1442_v23 = vpop.f32.mrf.mxu1 }
 0x2fd   :  { %v2982_v28 = vmul.f32 -1.442695, %v1400_v24  ;;  %v1402_v29 = vadd.f32 %v1401_v27, %v4355_v46  ;;  %v1443_v17 = vadd.f32 %v1442_v23, %v5556_v59  ;;  %v5559_v27 = vld [vmem:[#allocation69_spill] sm:$0xff] }
 0x2fe   :  { %v1403_v22 = vpop.f32.mrf.mxu0  ;;  %v1444_v33 = vpop.f32.mrf.mxu1 }
 0x2ff   :  { %3224 = vpow2.f32 %v2982_v28  ;;  %v2984_v34 = vmul.f32 -1.442695, %v1402_v29  ;;  %v2983_v43 = vmul.f32 -1.442695, %v1443_v17  ;;  %v5558_v22 = vld [vmem:[#allocation30_spill] sm:$0xff] }
 0x300   :  { %v1404_v18 = vpop.f32.mrf.mxu0  ;;  %v1445_v53 = vpop.f32.mrf.mxu1  ;;  %v209_v28 = vadd.f32 %v5559_v27, %v5558_v22 }
 0x301   :  { %3226 = vpow2.f32 %v2984_v34  ;;  %v5560_v34 = vld [vmem:[#allocation73_spill] sm:$0xff] }
 0x302   :  { %3228 = vpow2.f32 %v2983_v43  ;;  %v211_v23 = vadd.f32 %v5560_v34, %v4237_v37 }
 0x30c   :  { %v3225_v62 = vpop.eup %3224 }
 0x30d   :  { %v1450_v57 = vadd.f32 1.0, %v3225_v62 }
 0x30e   :  { %v3227_v25 = vpop.eup %3226 }
 0x30f   :  { %3230 = vrcp.f32 %v1450_v57  ;;  %v1463_v24 = vadd.f32 1.0, %v3227_v25  ;;  %v3229_v33 = vpop.eup %3228 }
 0x310   :  { %3232 = vtanh.f32 %v1441_v15  ;;  %v1457_v25 = vadd.f32 1.0, %v3229_v33  ;;  %v5562_v33 = vld [vmem:[#allocation64_spill] sm:$0xff] }
 0x311   :  { %3234 = vrcp.f32 %v1463_v24 }
 0x31a   :  { %v1510_v29 = vpop.f32.mrf.mxu0  ;;  %v1551_v18 = vpop.f32.mrf.mxu1 }
 0x31b   :  { %v1558_v17 = vadd.f32 %v1510_v29, %v209_v28  ;;  %v5561_v28 = vld [vmem:[#allocation70_spill] sm:$0xff] }
 0x31c   :  { %v3231_v53 = vpop.eup %3230  ;;  %v1512_v59 = vpop.f32.mrf.mxu0 }
 0x31d   :  { %v1553_v49 = vpop.f32.mrf.mxu1  ;;  %v3233_v62 = vpop.eup %3232  ;;  %v2985_v16 = vmul.f32 -1.442695, %v1558_v17  ;;  %v1559_v43 = vadd.f32 %v1512_v59, %v211_v23  ;;  %v284_v59 = vadd.f32 %v5561_v28, %v3913_v6  ;;  %v282_v23 = vadd.f32 %v5562_v33, %v3920_v10 }
 0x31e   :  { %v3235_v57 = vpop.eup %3234  ;;  %v1514_v15 = vpop.f32.mrf.mxu0  ;;  %v1467_v46 = vmul.f32 %v3233_v62, %v3231_v53 }
 0x31f   :  { %v1555_v24 = vpop.f32.mrf.mxu1  ;;  %v1466_v27 = vmul.f32 %v3235_v57, %v4243_v63  ;;  %3236 = vpow2.f32 %v2985_v16  ;;  %v2987_v22 = vmul.f32 -1.442695, %v1559_v43  ;;  %v1561_v29 = vadd.f32 %v1553_v49, %v284_v59 }
 0x320   :  { %v1515_v26 = vpop.f32.mrf.mxu0  ;;  %v1560_v17 = vadd.f32 %v1551_v18, %v282_v23 }
 0x321   :  { %v1556_v54 = vpop.f32.mrf.mxu1  ;;  %3238 = vpow2.f32 %v2987_v22  ;;  %v4366_v34 = vadd.f32 %v1467_v46, %v1466_v27  ;;  %v2986_v53 = vmul.f32 -1.442695, %v1561_v29 }
 0x322   :  { %3240 = vrcp.f32 %v1457_v25 }
 0x323   :  { %3242 = vtanh.f32 %v4366_v34 }
 0x324   :  { %3244 = vtanh.f32 %v1560_v17  ;;  %v4502_v17 = vld [vmem:[#allocation6 + $0x8] ss:$16 sps:$4 sm:$0xff]  }
 0x325   :  { %3246 = vpow2.f32 %v2986_v53  ;;  %5579 = vst [vmem:[#allocation20_spill] sm:$0xff] %v4502_v17  ;;  %v5580_v53 = vld [vmem:[#allocation44_spill] sm:$0xff] }
 0x32c   :  { %v3237_v63 = vpop.eup %3236 }
 0x32d   :  { %v1565_v16 = vadd.f32 1.0, %v3237_v63  ;;  %v5581_v63 = vld [vmem:[#allocation45_spill] sm:$0xff] }
 0x32e   :  { %v3239_v26 = vpop.eup %3238 }
 0x32f   :  { %v3241_v54 = vpop.eup %3240  ;;  %3248 = vrcp.f32 %v1565_v16  ;;  %v1578_v46 = vadd.f32 1.0, %v3239_v26  ;;  %v5582_v16 = vld [vmem:[#allocation46_spill] sm:$0xff]  ;;  %v5583_v26 = vld [vmem:[#allocation47_spill] sm:$0xff] }
 0x330   :  { %v3243_v22 = vpop.eup %3242 }
 0x331   :  { %3250 = vrcp.f32 %v1578_v46  ;;  %v1470_v62 = vmul.f32 %v3243_v22, %v3241_v54  ;;  %v3245_v49 = vpop.eup %3244  ;;  %v5584_v54 = vld [vmem:[#allocation48_spill] sm:$0xff]  ;;  %v5591_v46 = vld [vmem:[#allocation55_spill] sm:$0xff] }
 0x332   :  { %v3247_v57 = vpop.eup %3246  ;;  %v5592_v22 = vld [vmem:[#allocation56_spill] sm:$0xff] }
 0x333   :  { %v1471_v43 = vpack.c.bf16 %v1470_v62, %v1470_v62  ;;  %v1572_v24 = vadd.f32 1.0, %v3247_v57  ;;  %v5593_v62 = vld [vmem:[#allocation57_spill] sm:$0xff]  ;;  %v5596_v57 = vld [vmem:[#allocation60_spill] sm:$0xff] }
 0x335   :  { %1619 = vmatprep.mubr.bf16.mxu0 %v1471_v43  ;;  %1660 = vmatprep.mubr.bf16.mxu1 %v1471_v43  ;;  %3252 = vrcp.f32 %v1572_v24  ;;  %v5594_v43 = vld [vmem:[#allocation58_spill] sm:$0xff]  ;;  %v5600_v24 = vld [vmem:[#allocation65_spill] sm:$0xff] }
 0x33c   :  { %v3249_v25 = vpop.eup %3248 }
 0x33d   :  { %v1582_v15 = vmul.f32 %v3249_v25, %v3245_v49  ;;  %v5595_v49 = vld [vmem:[#allocation59_spill] sm:$0xff]  ;;  %v5597_v25 = vld [vmem:[#allocation61_spill] sm:$0xff] }
 0x33e   :  { %v3251_v18 = vpop.eup %3250 }
 0x33f   :  { %v1581_v27 = vmul.f32 %v3251_v18, %v4251_v47  ;;  %v4478_v47 = vld [vmem:[#allocation6 + $0x48] ss:$16 sps:$4 sm:$0xff]  }
 0x340   :  { %5571 = vst [vmem:[#allocation12_spill] sm:$0xff] %v4478_v47  ;;  %v5599_v18 = vld [vmem:[#allocation63_spill] sm:$0xff] }
 0x341   :  { %v4374_v28 = vadd.f32 %v1582_v15, %v1581_v27  ;;  %v5598_v15 = vld [vmem:[#allocation62_spill] sm:$0xff] }
 0x342   :  { %v3253_v59 = vpop.eup %3252  ;;  %v5601_v27 = vld [vmem:[#allocation66_spill] sm:$0xff] }
 0x343   :  { %3254 = vtanh.f32 %v4374_v28 }
 0x350   :  { %v3255_v29 = vpop.eup %3254 }
 0x351   :  { %v1585_v33 = vmul.f32 %v3255_v29, %v3253_v59  ;;  %v5602_v59 = vld [vmem:[#allocation67_spill] sm:$0xff]  ;;  %v5603_v29 = vld [vmem:[#allocation68_spill] sm:$0xff] }
 0x353   :  { %v1586_v23 = vpack.c.bf16 %v1585_v33, %v1585_v33  ;;  %v5604_v33 = vld [vmem:[#allocation71_spill] sm:$0xff] }
 0x355   :  { %1620 = vmatmul.mubr.bf16.vlgmr.msra.gmra.mxu0 %v1586_v23  ;;  %1661 = vmatmul.mubr.bf16.vlgmr.msra.gmra.mxu1 %v1586_v23 }
 0x356   :  { %1699 = vmatpush1.bf16.msra.mxu0 %v3926_v44  ;;  %1740 = vmatpush1.bf16.msra.mxu1 %v3928_v58  ;;  %v4409_v44 = vld [vmem:[#allocation6 + $0xe4] ss:$16 sps:$4 sm:$0xff]   ;;  %v4418_v58 = vld [vmem:[#allocation6 + $0xe8] ss:$16 sps:$4 sm:$0xff]  }
 0x357   :  { %1700 = vmatprep.subr.bf16.mxu0 %v3932_v2  ;;  %1741 = vmatprep.subr.bf16.mxu1 %v3934_v3  ;;  %v4427_v2 = vld [vmem:[#allocation6 + $0xc0] ss:$16 sps:$4 sm:$0xff]   ;;  %v4430_v3 = vld [vmem:[#allocation6 + $0xc8] ss:$16 sps:$4 sm:$0xff]  }
 0x358   :  { %1730 = vmatprep.mubr.bf16.mxu0 %v5493_v31  ;;  %1771 = vmatprep.mubr.bf16.mxu1 %v5493_v31 }
 0x35a   :  { %1701 = vmatpush1.bf16.msra.mxu0 %v3940_v4  ;;  %1742 = vmatpush1.bf16.msra.mxu1 %v3942_v5  ;;  %v4433_v4 = vld [vmem:[#allocation6 + $0xa4] ss:$16 sps:$4 sm:$0xff]   ;;  %v4436_v5 = vld [vmem:[#allocation6 + $0xac] ss:$16 sps:$4 sm:$0xff]  }
 0x35b   :  { %1702 = vmatprep.subr.bf16.mxu0 %v3946_v7  ;;  %1743 = vmatprep.subr.bf16.mxu1 %v3948_v9  ;;  %v4439_v7 = vld [vmem:[#allocation6 + $0xa0] ss:$16 sps:$4 sm:$0xff]   ;;  %v4442_v9 = vld [vmem:[#allocation6 + $0xa8] ss:$16 sps:$4 sm:$0xff]  }
 0x35e   :  { %1703 = vmatpush1.bf16.msra.mxu0 %v3954_v11  ;;  %1744 = vmatpush1.bf16.msra.mxu1 %v3956_v12  ;;  %v4445_v11 = vld [vmem:[#allocation6 + $0x84] ss:$16 sps:$4 sm:$0xff]   ;;  %v4448_v12 = vld [vmem:[#allocation6 + $0x8c] ss:$16 sps:$4 sm:$0xff]  }
 0x35f   :  { %1704 = vmatprep.subr.bf16.mxu0 %v3960_v13  ;;  %1745 = vmatprep.subr.bf16.mxu1 %v3962_v14  ;;  %v4451_v13 = vld [vmem:[#allocation6 + $0x80] ss:$16 sps:$4 sm:$0xff]   ;;  %v4454_v14 = vld [vmem:[#allocation6 + $0x88] ss:$16 sps:$4 sm:$0xff]  }
 0x360   :  { %5563 = vst [vmem:[#allocation32_spill] sm:$0xff] %v4454_v14 }
 0x362   :  { %1705 = vmatpush1.bf16.msra.mxu0 %v3966_v19  ;;  %1746 = vmatpush1.bf16.msra.mxu1 %v3968_v20  ;;  %v4457_v19 = vld [vmem:[#allocation6 + $0x64] ss:$16 sps:$4 sm:$0xff]   ;;  %v4460_v20 = vld [vmem:[#allocation6 + $0x6c] ss:$16 sps:$4 sm:$0xff]  }
 0x363   :  { %1706 = vmatprep.subr.bf16.mxu0 %v5494_v56  ;;  %1747 = vmatprep.subr.bf16.mxu1 %v5495_v48  ;;  %5564 = vst [vmem:[#allocation33_spill] sm:$0xff] %v4457_v19  ;;  %5565 = vst [vmem:[#allocation34_spill] sm:$0xff] %v4460_v20  ;;  %v4481_v56 = vld [vmem:[#allocation6 + $0x24] ss:$16 sps:$4 sm:$0xff]   ;;  %v4484_v48 = vld [vmem:[#allocation6 + $0x2c] ss:$16 sps:$4 sm:$0xff]  }
 0x364   :  { %5572 = vst [vmem:[#allocation13_spill] sm:$0xff] %v4481_v56  ;;  %5573 = vst [vmem:[#allocation14_spill] sm:$0xff] %v4484_v48 }
 0x366   :  { %1707 = vmatpush1.bf16.msra.mxu0 %v5496_v39  ;;  %1748 = vmatpush1.bf16.msra.mxu1 %v5497_v38  ;;  %v4487_v39 = vld [vmem:[#allocation6 + $0x20] ss:$16 sps:$4 sm:$0xff]   ;;  %v4490_v38 = vld [vmem:[#allocation6 + $0x28] ss:$16 sps:$4 sm:$0xff]  }
 0x367   :  { %1708 = vmatprep.subr.bf16.mxu0 %v5498_v52  ;;  %1749 = vmatprep.subr.bf16.mxu1 %v5499_v61  ;;  %5574 = vst [vmem:[#allocation15_spill] sm:$0xff] %v4487_v39  ;;  %5575 = vst [vmem:[#allocation16_spill] sm:$0xff] %v4490_v38  ;;  %v4493_v52 = vld [vmem:[#allocation6 + $0x4] ss:$16 sps:$4 sm:$0xff]   ;;  %v4496_v61 = vld [vmem:[#allocation6 + $0xc] ss:$16 sps:$4 sm:$0xff]  }
 0x368   :  { %5576 = vst [vmem:[#allocation19_spill] sm:$0xff] %v4493_v52  ;;  %5577 = vst [vmem:[#allocation17_spill] sm:$0xff] %v4496_v61 }
 0x36a   :  { %1709 = vmatpush1.bf16.msra.mxu0 %v5500_v35  ;;  %1750 = vmatpush1.bf16.msra.mxu1 %v3992_v0  ;;  %v4412_v0 = vld [vmem:[#allocation6 + $0xec] ss:$16 sps:$4 sm:$0xff]   ;;  %v4499_v35 = vld [vmem:[#allocation6] ss:$16 sps:$4 sm:$0xff]  }
 0x36b   :  { %1710 = vmatprep.subr.bf16.mxu0 %v3996_v60  ;;  %1751 = vmatprep.subr.bf16.mxu1 %v3998_v21  ;;  %v4415_v60 = vld [vmem:[#allocation6 + $0xe0] ss:$16 sps:$4 sm:$0xff]   ;;  %5578 = vst [vmem:[#allocation18_spill] sm:$0xff] %v4499_v35 }
 0x36c   :  { %v4463_v21 = vld [vmem:[#allocation6 + $0x60] ss:$16 sps:$4 sm:$0xff]  }
 0x36d   :  { %5566 = vst [vmem:[#allocation35_spill] sm:$0xff] %v4463_v21 }
 0x36e   :  { %1711 = vmatpush1.bf16.msra.mxu0 %v4002_v30  ;;  %1752 = vmatpush1.bf16.msra.mxu1 %v4004_v32  ;;  %v4466_v30 = vld [vmem:[#allocation6 + $0x68] ss:$16 sps:$4 sm:$0xff]   ;;  %v4469_v32 = vld [vmem:[#allocation6 + $0x44] ss:$16 sps:$4 sm:$0xff]  }
 0x36f   :  { %1712 = vmatprep.subr.bf16.mxu0 %v4008_v41  ;;  %1753 = vmatprep.subr.bf16.mxu1 %v4010_v42  ;;  %5567 = vst [vmem:[#allocation36_spill] sm:$0xff] %v4466_v30  ;;  %5568 = vst [vmem:[#allocation37_spill] sm:$0xff] %v4469_v32  ;;  %v4472_v41 = vld [vmem:[#allocation6 + $0x4c] ss:$16 sps:$4 sm:$0xff]   ;;  %v4475_v42 = vld [vmem:[#allocation6 + $0x40] ss:$16 sps:$4 sm:$0xff]  }
 0x370   :  { %5569 = vst [vmem:[#allocation10_spill] sm:$0xff] %v4472_v41  ;;  %5570 = vst [vmem:[#allocation11_spill] sm:$0xff] %v4475_v42 }
 0x372   :  { %1713 = vmatpush1.bf16.msra.mxu0 %v4014_v1  ;;  %1754 = vmatpush1.bf16.msra.mxu1 %v4016_v8  ;;  %v4421_v1 = vld [vmem:[#allocation6 + $0xc4] ss:$16 sps:$4 sm:$0xff]   ;;  %v4424_v8 = vld [vmem:[#allocation6 + $0xcc] ss:$16 sps:$4 sm:$0xff]  }
 0x373   :  { %1809 = vmatprep.subr.bf16.mxu0 %v4409_v44  ;;  %1850 = vmatprep.subr.bf16.mxu1 %v4412_v0 }
 0x375   :  { %1731 = vmatmul.mubr.bf16.vlgmr.msra.gmra.mxu0 %v1586_v23  ;;  %1772 = vmatmul.mubr.bf16.vlgmr.msra.gmra.mxu1 %v1586_v23  ;;  %v5605_v23 = vld [vmem:[#allocation72_spill] sm:$0xff] }
 0x376   :  { %1810 = vmatpush1.bf16.msra.mxu0 %v4415_v60  ;;  %1851 = vmatpush1.bf16.msra.mxu1 %v4418_v58 }
 0x377   :  { %1811 = vmatprep.subr.bf16.mxu0 %v4421_v1  ;;  %1852 = vmatprep.subr.bf16.mxu1 %v4424_v8 }
 0x37a   :  { %1812 = vmatpush1.bf16.msra.mxu0 %v4427_v2  ;;  %1853 = vmatpush1.bf16.msra.mxu1 %v4430_v3 }
 0x37b   :  { %1813 = vmatprep.subr.bf16.mxu0 %v4433_v4  ;;  %1854 = vmatprep.subr.bf16.mxu1 %v4436_v5 }
 0x37e   :  { %1814 = vmatpush1.bf16.msra.mxu0 %v4439_v7  ;;  %1855 = vmatpush1.bf16.msra.mxu1 %v4442_v9 }
 0x37f   :  { %1815 = vmatprep.subr.bf16.mxu0 %v4445_v11  ;;  %1856 = vmatprep.subr.bf16.mxu1 %v4448_v12 }
 0x382   :  { %1816 = vmatpush1.bf16.msra.mxu0 %v4451_v13  ;;  %1857 = vmatpush1.bf16.msra.mxu1 %v4454_v14 }
 0x383   :  { %1817 = vmatprep.subr.bf16.mxu0 %v4457_v19  ;;  %1858 = vmatprep.subr.bf16.mxu1 %v4460_v20 }
 0x386   :  { %1818 = vmatpush1.bf16.msra.mxu0 %v4463_v21  ;;  %1859 = vmatpush1.bf16.msra.mxu1 %v4466_v30 }
 0x387   :  { %1819 = vmatprep.subr.bf16.mxu0 %v4469_v32  ;;  %1860 = vmatprep.subr.bf16.mxu1 %v4472_v41 }
 0x38a   :  { %1820 = vmatpush1.bf16.msra.mxu0 %v4475_v42  ;;  %1861 = vmatpush1.bf16.msra.mxu1 %v4478_v47 }
 0x38b   :  { %1821 = vmatprep.subr.bf16.mxu0 %v4481_v56  ;;  %1862 = vmatprep.subr.bf16.mxu1 %v4484_v48 }
 0x38e   :  { %1822 = vmatpush1.bf16.msra.mxu0 %v4487_v39  ;;  %1863 = vmatpush1.bf16.msra.mxu1 %v4490_v38 }
 0x38f   :  { %1823 = vmatprep.subr.bf16.mxu0 %v4493_v52  ;;  %1864 = vmatprep.subr.bf16.mxu1 %v4496_v61 }
 0x392   :  { %1824 = vmatpush1.bf16.msra.mxu0 %v4499_v35  ;;  %1865 = vmatpush1.bf16.msra.mxu1 %v4502_v17 }
 0x393   :  { %1825 = vmatprep.subr.bf16.mxu0 %v5519_v55  ;;  %1866 = vmatprep.subr.bf16.mxu1 %v5520_v50  ;;  %v5585_v55 = vld [vmem:[#allocation49_spill] sm:$0xff]  ;;  %v5586_v50 = vld [vmem:[#allocation50_spill] sm:$0xff] }
 0x396   :  { %1826 = vmatpush2.bf16.msra.mxu0 %v5521_v45  ;;  %1867 = vmatpush2.bf16.msra.mxu1 %v5522_v51  ;;  %v5587_v45 = vld [vmem:[#allocation51_spill] sm:$0xff]  ;;  %v5588_v51 = vld [vmem:[#allocation52_spill] sm:$0xff] }
 0x397   :  { %1827 = vmatprep.subr.bf16.mxu0 %v5523_v40  ;;  %1868 = vmatprep.subr.bf16.mxu1 %v5524_v36  ;;  %v5589_v40 = vld [vmem:[#allocation53_spill] sm:$0xff]  ;;  %v5590_v36 = vld [vmem:[#allocation54_spill] sm:$0xff] }
 0x39a   :  { %1828 = vmatpush2.bf16.msra.mxu0 %v5580_v53  ;;  %1869 = vmatpush2.bf16.msra.mxu1 %v5581_v63  ;;  %v4537_v53 = vld [vmem:[#allocation4 + $0xe4] ss:$16 sps:$4 sm:$0xff]   ;;  %v4540_v63 = vld [vmem:[#allocation4 + $0xec] ss:$16 sps:$4 sm:$0xff]  }
 0x39b   :  { %1829 = vmatprep.subr.bf16.mxu0 %v5582_v16  ;;  %1870 = vmatprep.subr.bf16.mxu1 %v5583_v26  ;;  %5606 = vst [vmem:[#allocation21_spill] sm:$0xff] %v4537_v53  ;;  %5607 = vst [vmem:[#allocation22_spill] sm:$0xff] %v4540_v63 }
 0x39e   :  { %1830 = vmatpush2.bf16.msra.mxu0 %v5584_v54  ;;  %1871 = vmatpush2.bf16.msra.mxu1 %v5585_v55  ;;  %v5608_v54 = vld [vmem:[#allocation93_spill] sm:$0xff] }
 0x39f   :  { %1831 = vmatprep.subr.bf16.mxu0 %v5586_v50  ;;  %1872 = vmatprep.subr.bf16.mxu1 %v5587_v45 }
 0x3a2   :  { %1832 = vmatpush2.bf16.msra.mxu0 %v5588_v51  ;;  %1873 = vmatpush2.bf16.msra.mxu1 %v5589_v40  ;;  %v5609_v40 = vld [vmem:[#allocation31_spill] sm:$0xff] }
 0x3a3   :  { %1833 = vmatprep.subr.bf16.mxu0 %v5590_v36  ;;  %1874 = vmatprep.subr.bf16.mxu1 %v5591_v46 }
 0x3a6   :  { %1834 = vmatpush2.bf16.msra.mxu0 %v5592_v22  ;;  %1875 = vmatpush2.bf16.msra.mxu1 %v5593_v62 }
 0x3a7   :  { %1835 = vmatprep.subr.bf16.mxu0 %v5594_v43  ;;  %1876 = vmatprep.subr.bf16.mxu1 %v5595_v49 }
 0x3aa   :  { %1836 = vmatpush2.bf16.msra.mxu0 %v5596_v57  ;;  %1877 = vmatpush2.bf16.msra.mxu1 %v5597_v25  ;;  %v5610_v57 = vld [vmem:[#allocation95_spill] sm:$0xff] }
 0x3ab   :  { %1837 = vmatprep.subr.bf16.mxu0 %v5598_v15  ;;  %1878 = vmatprep.subr.bf16.mxu1 %v5599_v18 }
 0x3ae   :  { %1838 = vmatpush2.bf16.msra.mxu0 %v5600_v24  ;;  %1879 = vmatpush2.bf16.msra.mxu1 %v5601_v27  ;;  %v5611_v24 = vld [vmem:[#allocation96_spill] sm:$0xff] }
 0x3af   :  { %1839 = vmatprep.subr.bf16.mxu0 %v5602_v59  ;;  %1880 = vmatprep.subr.bf16.mxu1 %v5603_v29 }
 0x3b2   :  { %1840 = vmatpush2.bf16.msra.mxu0 %v5604_v33  ;;  %1881 = vmatpush2.bf16.msra.mxu1 %v5605_v23  ;;  %v5612_v23 = vld [vmem:[#allocation30_spill] sm:$0xff] }
 0x3b3   :  { %1920 = vmatprep.subr.bf16.mxu0 %v4537_v53  ;;  %1961 = vmatprep.subr.bf16.mxu1 %v4540_v63 }
 0x415   :  { %v1621_v16 = vpop.f32.mrf.mxu0  ;;  %v1662_v26 = vpop.f32.mrf.mxu1 }
 0x416   :  { %v1622_v55 = vadd.f32 %v1621_v16, %v5608_v54  ;;  %v1663_v27 = vadd.f32 %v1662_v26, %v5611_v24  ;;  %v5613_v16 = vld [vmem:[#allocation75_spill] sm:$0xff] }
 0x417   :  { %v1623_v50 = vpop.f32.mrf.mxu0  ;;  %v1664_v45 = vpop.f32.mrf.mxu1 }
 0x418   :  { %v2988_v51 = vmul.f32 -1.442695, %v1622_v55  ;;  %v1624_v36 = vadd.f32 %v1623_v50, %v5609_v40  ;;  %v1665_v25 = vadd.f32 %v1664_v45, %v5610_v57  ;;  %v213_v55 = vadd.f32 %v5613_v16, %v5612_v23 }
 0x419   :  { %v1625_v46 = vpop.f32.mrf.mxu0  ;;  %v1666_v22 = vpop.f32.mrf.mxu1 }
 0x41a   :  { %3256 = vpow2.f32 %v2988_v51  ;;  %v2990_v62 = vmul.f32 -1.442695, %v1624_v36  ;;  %v2989_v15 = vmul.f32 -1.442695, %v1665_v25  ;;  %v5614_v46 = vld [vmem:[#allocation77_spill] sm:$0xff] }
 0x41b   :  { %v1626_v43 = vpop.f32.mrf.mxu0  ;;  %v1667_v49 = vpop.f32.mrf.mxu1  ;;  %v215_v45 = vadd.f32 %v5614_v46, %v4237_v37 }
 0x41c   :  { %3258 = vpow2.f32 %v2990_v62 }
 0x41d   :  { %3260 = vpow2.f32 %v2989_v15 }
 0x427   :  { %v3257_v18 = vpop.eup %3256 }
 0x428   :  { %v1672_v59 = vadd.f32 1.0, %v3257_v18 }
 0x429   :  { %v3259_v29 = vpop.eup %3258 }
 0x42a   :  { %3262 = vrcp.f32 %v1672_v59  ;;  %v1685_v33 = vadd.f32 1.0, %v3259_v29  ;;  %v3261_v36 = vpop.eup %3260 }
 0x42b   :  { %3264 = vtanh.f32 %v1663_v27  ;;  %v1679_v59 = vadd.f32 1.0, %v3261_v36  ;;  %v5616_v36 = vld [vmem:[#allocation74_spill] sm:$0xff] }
 0x42c   :  { %3266 = vrcp.f32 %v1685_v33 }
 0x435   :  { %v1732_v50 = vpop.f32.mrf.mxu0  ;;  %v1773_v51 = vpop.f32.mrf.mxu1 }
 0x436   :  { %v1780_v22 = vadd.f32 %v1732_v50, %v213_v55  ;;  %v5615_v55 = vld [vmem:[#allocation76_spill] sm:$0xff] }
 0x437   :  { %v3263_v62 = vpop.eup %3262  ;;  %v1734_v43 = vpop.f32.mrf.mxu0  ;;  %v288_v50 = vadd.f32 %v5615_v55, %v3913_v6 }
 0x438   :  { %v1775_v26 = vpop.f32.mrf.mxu1  ;;  %v3265_v49 = vpop.eup %3264  ;;  %v2991_v25 = vmul.f32 -1.442695, %v1780_v22  ;;  %v1781_v15 = vadd.f32 %v1734_v43, %v215_v45  ;;  %v286_v22 = vadd.f32 %v5616_v36, %v3920_v10 }
 0x439   :  { %v3267_v18 = vpop.eup %3266  ;;  %v1736_v27 = vpop.f32.mrf.mxu0  ;;  %v1689_v33 = vmul.f32 %v3265_v49, %v3263_v62  ;;  %v1783_v45 = vadd.f32 %v1775_v26, %v288_v50 }
 0x43a   :  { %v1777_v29 = vpop.f32.mrf.mxu1  ;;  %v1688_v16 = vmul.f32 %v3267_v18, %v4366_v34  ;;  %3268 = vpow2.f32 %v2991_v25  ;;  %v2993_v23 = vmul.f32 -1.442695, %v1781_v15  ;;  %v1782_v62 = vadd.f32 %v1773_v51, %v286_v22 }
 0x43b   :  { %v1737_v24 = vpop.f32.mrf.mxu0  ;;  %v2992_v43 = vmul.f32 -1.442695, %v1783_v45 }
 0x43c   :  { %v1778_v57 = vpop.f32.mrf.mxu1  ;;  %3270 = vpow2.f32 %v2993_v23  ;;  %v4552_v46 = vadd.f32 %v1689_v33, %v1688_v16 }
 0x43d   :  { %3272 = vrcp.f32 %v1679_v59 }
 0x43e   :  { %3274 = vtanh.f32 %v4552_v46 }
 0x43f   :  { %3276 = vtanh.f32 %v1782_v62  ;;  %v4567_v62 = vld [vmem:[#allocation4 + $0xe0] ss:$16 sps:$4 sm:$0xff]  }
 0x440   :  { %3278 = vpow2.f32 %v2992_v43  ;;  %v4570_v43 = vld [vmem:[#allocation4 + $0xe8] ss:$16 sps:$4 sm:$0xff]  }
 0x447   :  { %v3269_v34 = vpop.eup %3268 }
 0x448   :  { %v1787_v49 = vadd.f32 1.0, %v3269_v34  ;;  %v4576_v34 = vld [vmem:[#allocation4 + $0xcc] ss:$16 sps:$4 sm:$0xff]  }
 0x449   :  { %v3271_v24 = vpop.eup %3270 }
 0x44a   :  { %v3273_v57 = vpop.eup %3272  ;;  %3280 = vrcp.f32 %v1787_v49  ;;  %v1800_v23 = vadd.f32 1.0, %v3271_v24  ;;  %v4581_v49 = vld [vmem:[#allocation4 + $0xc0] ss:$16 sps:$4 sm:$0xff]   ;;  %v4584_v24 = vld [vmem:[#allocation4 + $0xc8] ss:$16 sps:$4 sm:$0xff]  }
 0x44b   :  { %v3275_v25 = vpop.eup %3274 }
 0x44c   :  { %3282 = vrcp.f32 %v1800_v23  ;;  %v1692_v15 = vmul.f32 %v3275_v25, %v3273_v57  ;;  %v3277_v26 = vpop.eup %3276  ;;  %v4587_v57 = vld [vmem:[#allocation4 + $0xa4] ss:$16 sps:$4 sm:$0xff]   ;;  %v4590_v23 = vld [vmem:[#allocation4 + $0xac] ss:$16 sps:$4 sm:$0xff]   ;;  %v4593_v25 = vld [vmem:[#allocation4 + $0xa0] ss:$16 sps:$4 sm:$0xff]  }
 0x44d   :  { %v3279_v59 = vpop.eup %3278 }
 0x44e   :  { %v1693_v18 = vpack.c.bf16 %v1692_v15, %v1692_v15  ;;  %v1794_v33 = vadd.f32 1.0, %v3279_v59  ;;  %v4596_v15 = vld [vmem:[#allocation4 + $0xa8] ss:$16 sps:$4 sm:$0xff]   ;;  %v4605_v59 = vld [vmem:[#allocation4 + $0x80] ss:$16 sps:$4 sm:$0xff]  }
 0x450   :  { %1841 = vmatprep.mubr.bf16.mxu0 %v1693_v18  ;;  %1882 = vmatprep.mubr.bf16.mxu1 %v1693_v18  ;;  %3284 = vrcp.f32 %v1794_v33  ;;  %v4599_v18 = vld [vmem:[#allocation4 + $0x84] ss:$16 sps:$4 sm:$0xff]   ;;  %v4617_v33 = vld [vmem:[#allocation4 + $0x60] ss:$16 sps:$4 sm:$0xff]  }
 0x451   :  { %5618 = vst [vmem:[#allocation24_spill] sm:$0xff] %v4617_v33 }
 0x457   :  { %v3281_v27 = vpop.eup %3280 }
 0x458   :  { %v1804_v29 = vmul.f32 %v3281_v27, %v3277_v26  ;;  %v4602_v26 = vld [vmem:[#allocation4 + $0x8c] ss:$16 sps:$4 sm:$0xff]   ;;  %v4608_v27 = vld [vmem:[#allocation4 + $0x88] ss:$16 sps:$4 sm:$0xff]  }
 0x459   :  { %v3283_v51 = vpop.eup %3282 }
 0x45a   :  { %v1803_v16 = vmul.f32 %v3283_v51, %v4374_v28  ;;  %v4573_v28 = vld [vmem:[#allocation4 + $0xc4] ss:$16 sps:$4 sm:$0xff]   ;;  %v4614_v51 = vld [vmem:[#allocation4 + $0x6c] ss:$16 sps:$4 sm:$0xff]  }
 0x45b   :  { %5617 = vst [vmem:[#allocation23_spill] sm:$0xff] %v4614_v51 }
 0x45c   :  { %v4560_v55 = vadd.f32 %v1804_v29, %v1803_v16  ;;  %v4611_v29 = vld [vmem:[#allocation4 + $0x64] ss:$16 sps:$4 sm:$0xff]   ;;  %v4620_v16 = vld [vmem:[#allocation4 + $0x68] ss:$16 sps:$4 sm:$0xff]  }
 0x45d   :  { %v3285_v50 = vpop.eup %3284  ;;  %5619 = vst [vmem:[#allocation25_spill] sm:$0xff] %v4620_v16 }
 0x45e   :  { %3286 = vtanh.f32 %v4560_v55 }
 0x46b   :  { %v3287_v45 = vpop.eup %3286 }
 0x46c   :  { %v1807_v36 = vmul.f32 %v3287_v45, %v3285_v50  ;;  %v4623_v50 = vld [vmem:[#allocation4 + $0x44] ss:$16 sps:$4 sm:$0xff]   ;;  %v4626_v45 = vld [vmem:[#allocation4 + $0x4c] ss:$16 sps:$4 sm:$0xff]  }
 0x46d   :  { %5620 = vst [vmem:[#allocation26_spill] sm:$0xff] %v4623_v50  ;;  %5621 = vst [vmem:[#allocation27_spill] sm:$0xff] %v4626_v45 }
 0x46e   :  { %v4563_v22 = vpack.c.bf16 %v1807_v36, %v1807_v36  ;;  %v4629_v36 = vld [vmem:[#allocation4 + $0x40] ss:$16 sps:$4 sm:$0xff]  }
 0x46f   :  { %5622 = vst [vmem:[#allocation38_spill] sm:$0xff] %v4629_v36 }
 0x470   :  { %1842 = vmatmul.mubr.bf16.vlgmr.msra.gmra.mxu0 %v4563_v22  ;;  %1883 = vmatmul.mubr.bf16.vlgmr.msra.gmra.mxu1 %v4563_v22 }
 0x471   :  { %1921 = vmatpush1.bf16.msra.mxu0 %v4567_v62  ;;  %1962 = vmatpush1.bf16.msra.mxu1 %v4570_v43 }
 0x472   :  { %1922 = vmatprep.subr.bf16.mxu0 %v4573_v28  ;;  %1963 = vmatprep.subr.bf16.mxu1 %v4576_v34 }
 0x473   :  { %1952 = vmatprep.mubr.bf16.mxu0 %v5493_v31  ;;  %1993 = vmatprep.mubr.bf16.mxu1 %v5493_v31 }
 0x475   :  { %1923 = vmatpush1.bf16.msra.mxu0 %v4581_v49  ;;  %1964 = vmatpush1.bf16.msra.mxu1 %v4584_v24 }
 0x476   :  { %1924 = vmatprep.subr.bf16.mxu0 %v4587_v57  ;;  %1965 = vmatprep.subr.bf16.mxu1 %v4590_v23 }
 0x479   :  { %1925 = vmatpush1.bf16.msra.mxu0 %v4593_v25  ;;  %1966 = vmatpush1.bf16.msra.mxu1 %v4596_v15 }
 0x47a   :  { %1926 = vmatprep.subr.bf16.mxu0 %v4599_v18  ;;  %1967 = vmatprep.subr.bf16.mxu1 %v4602_v26 }
 0x47d   :  { %1927 = vmatpush1.bf16.msra.mxu0 %v4605_v59  ;;  %1968 = vmatpush1.bf16.msra.mxu1 %v4608_v27 }
 0x47e   :  { %1928 = vmatprep.subr.bf16.mxu0 %v4611_v29  ;;  %1969 = vmatprep.subr.bf16.mxu1 %v4614_v51  ;;  %v4632_v51 = vld [vmem:[#allocation4 + $0x48] ss:$16 sps:$4 sm:$0xff]  }
 0x47f   :  { %5623 = vst [vmem:[#allocation39_spill] sm:$0xff] %v4632_v51 }
 0x481   :  { %1929 = vmatpush1.bf16.msra.mxu0 %v4617_v33  ;;  %1970 = vmatpush1.bf16.msra.mxu1 %v4620_v16  ;;  %v4635_v33 = vld [vmem:[#allocation4 + $0x24] ss:$16 sps:$4 sm:$0xff]   ;;  %v4638_v16 = vld [vmem:[#allocation4 + $0x2c] ss:$16 sps:$4 sm:$0xff]  }
 0x482   :  { %1930 = vmatprep.subr.bf16.mxu0 %v4623_v50  ;;  %1971 = vmatprep.subr.bf16.mxu1 %v4626_v45  ;;  %5624 = vst [vmem:[#allocation40_spill] sm:$0xff] %v4635_v33  ;;  %5625 = vst [vmem:[#allocation41_spill] sm:$0xff] %v4638_v16  ;;  %v4641_v50 = vld [vmem:[#allocation4 + $0x20] ss:$16 sps:$4 sm:$0xff]   ;;  %v4644_v45 = vld [vmem:[#allocation4 + $0x28] ss:$16 sps:$4 sm:$0xff]  }
 0x485   :  { %1931 = vmatpush1.bf16.msra.mxu0 %v4629_v36  ;;  %1972 = vmatpush1.bf16.msra.mxu1 %v4632_v51  ;;  %v4647_v36 = vld [vmem:[#allocation4 + $0x4] ss:$16 sps:$4 sm:$0xff]   ;;  %v4650_v51 = vld [vmem:[#allocation4 + $0xc] ss:$16 sps:$4 sm:$0xff]  }
 0x486   :  { %1932 = vmatprep.subr.bf16.mxu0 %v4635_v33  ;;  %1973 = vmatprep.subr.bf16.mxu1 %v4638_v16  ;;  %v4653_v33 = vld [vmem:[#allocation4] ss:$16 sps:$4 sm:$0xff]   ;;  %v4656_v16 = vld [vmem:[#allocation4 + $0x8] ss:$16 sps:$4 sm:$0xff]  }
 0x489   :  { %1933 = vmatpush1.bf16.msra.mxu0 %v4641_v50  ;;  %1974 = vmatpush1.bf16.msra.mxu1 %v4644_v45 }
 0x48a   :  { %1934 = vmatprep.subr.bf16.mxu0 %v4647_v36  ;;  %1975 = vmatprep.subr.bf16.mxu1 %v4650_v51 }
 0x48d   :  { %1935 = vmatpush1.bf16.msra.mxu0 %v4653_v33  ;;  %1976 = vmatpush1.bf16.msra.mxu1 %v4656_v16 }
 0x48e   :  { %2031 = vmatprep.subr.bf16.mxu0 %v4409_v44  ;;  %2072 = vmatprep.subr.bf16.mxu1 %v4412_v0 }
 0x490   :  { %1953 = vmatmul.mubr.bf16.vlgmr.msra.gmra.mxu0 %v4563_v22  ;;  %1994 = vmatmul.mubr.bf16.vlgmr.msra.gmra.mxu1 %v4563_v22  ;;  %v4693_v22 = vld [vmem:[#allocation6 + $0x1e4] ss:$16 sps:$4 sm:$0xff]  }
 0x491   :  { %2032 = vmatpush1.bf16.msra.mxu0 %v4415_v60  ;;  %2073 = vmatpush1.bf16.msra.mxu1 %v4418_v58  ;;  %5626 = vst [vmem:[#allocation42_spill] sm:$0xff] %v4693_v22 }
 0x492   :  { %2033 = vmatprep.subr.bf16.mxu0 %v4421_v1  ;;  %2074 = vmatprep.subr.bf16.mxu1 %v4424_v8 }
 0x495   :  { %2034 = vmatpush1.bf16.msra.mxu0 %v4427_v2  ;;  %2075 = vmatpush1.bf16.msra.mxu1 %v4430_v3 }
 0x496   :  { %2035 = vmatprep.subr.bf16.mxu0 %v4433_v4  ;;  %2076 = vmatprep.subr.bf16.mxu1 %v4436_v5 }
 0x499   :  { %2036 = vmatpush1.bf16.msra.mxu0 %v4439_v7  ;;  %2077 = vmatpush1.bf16.msra.mxu1 %v4442_v9 }
 0x49a   :  { %2037 = vmatprep.subr.bf16.mxu0 %v4445_v11  ;;  %2078 = vmatprep.subr.bf16.mxu1 %v4448_v12 }
 0x49d   :  { %2038 = vmatpush1.bf16.msra.mxu0 %v4451_v13  ;;  %2079 = vmatpush1.bf16.msra.mxu1 %v4454_v14 }
 0x49e   :  { %2039 = vmatprep.subr.bf16.mxu0 %v4457_v19  ;;  %2080 = vmatprep.subr.bf16.mxu1 %v4460_v20 }
 0x4a1   :  { %2040 = vmatpush1.bf16.msra.mxu0 %v4463_v21  ;;  %2081 = vmatpush1.bf16.msra.mxu1 %v4466_v30  ;;  %v5659_v21 = vld [vmem:[#allocation96_spill] sm:$0xff] }
 0x4a2   :  { %2041 = vmatprep.subr.bf16.mxu0 %v4469_v32  ;;  %2082 = vmatprep.subr.bf16.mxu1 %v4472_v41 }
 0x4a5   :  { %2042 = vmatpush1.bf16.msra.mxu0 %v4475_v42  ;;  %2083 = vmatpush1.bf16.msra.mxu1 %v4478_v47  ;;  %v4696_v47 = vld [vmem:[#allocation6 + $0x1ec] ss:$16 sps:$4 sm:$0xff]  }
 0x4a6   :  { %2043 = vmatprep.subr.bf16.mxu0 %v4481_v56  ;;  %2084 = vmatprep.subr.bf16.mxu1 %v4484_v48  ;;  %5627 = vst [vmem:[#allocation43_spill] sm:$0xff] %v4696_v47  ;;  %v4699_v48 = vld [vmem:[#allocation6 + $0x1e0] ss:$16 sps:$4 sm:$0xff]  }
 0x4a7   :  { %5628 = vst [vmem:[#allocation28_spill] sm:$0xff] %v4699_v48 }
 0x4a9   :  { %2044 = vmatpush1.bf16.msra.mxu0 %v4487_v39  ;;  %2085 = vmatpush1.bf16.msra.mxu1 %v4490_v38  ;;  %v4702_v38 = vld [vmem:[#allocation6 + $0x1e8] ss:$16 sps:$4 sm:$0xff]  }
 0x4aa   :  { %2045 = vmatprep.subr.bf16.mxu0 %v4493_v52  ;;  %2086 = vmatprep.subr.bf16.mxu1 %v4496_v61  ;;  %5629 = vst [vmem:[#allocation29_spill] sm:$0xff] %v4702_v38  ;;  %v4705_v61 = vld [vmem:[#allocation6 + $0x1c4] ss:$16 sps:$4 sm:$0xff]  }
 0x4ab   :  { %5630 = vst [vmem:[#allocation69_spill] sm:$0xff] %v4705_v61 }
 0x4ad   :  { %2046 = vmatpush1.bf16.msra.mxu0 %v4499_v35  ;;  %2087 = vmatpush1.bf16.msra.mxu1 %v4502_v17  ;;  %v4708_v17 = vld [vmem:[#allocation6 + $0x1cc] ss:$16 sps:$4 sm:$0xff]  }
 0x4ae   :  { %2047 = vmatprep.subr.bf16.mxu0 %v4693_v22  ;;  %2088 = vmatprep.subr.bf16.mxu1 %v4696_v47  ;;  %5631 = vst [vmem:[#allocation73_spill] sm:$0xff] %v4708_v17  ;;  %v4711_v22 = vld [vmem:[#allocation6 + $0x1c0] ss:$16 sps:$4 sm:$0xff]   ;;  %v4714_v47 = vld [vmem:[#allocation6 + $0x1c8] ss:$16 sps:$4 sm:$0xff]  }
 0x4af   :  { %5632 = vst [vmem:[#allocation70_spill] sm:$0xff] %v4711_v22  ;;  %5633 = vst [vmem:[#allocation64_spill] sm:$0xff] %v4714_v47 }
 0x4b1   :  { %2048 = vmatpush2.bf16.msra.mxu0 %v4699_v48  ;;  %2089 = vmatpush2.bf16.msra.mxu1 %v4702_v38  ;;  %v4717_v48 = vld [vmem:[#allocation6 + $0x1a4] ss:$16 sps:$4 sm:$0xff]   ;;  %v4720_v38 = vld [vmem:[#allocation6 + $0x1ac] ss:$16 sps:$4 sm:$0xff]  }
 0x4b2   :  { %2049 = vmatprep.subr.bf16.mxu0 %v4705_v61  ;;  %2090 = vmatprep.subr.bf16.mxu1 %v4708_v17  ;;  %5634 = vst [vmem:[#allocation44_spill] sm:$0xff] %v4717_v48  ;;  %5635 = vst [vmem:[#allocation45_spill] sm:$0xff] %v4720_v38  ;;  %v4723_v61 = vld [vmem:[#allocation6 + $0x1a0] ss:$16 sps:$4 sm:$0xff]   ;;  %v4726_v17 = vld [vmem:[#allocation6 + $0x1a8] ss:$16 sps:$4 sm:$0xff]  }
 0x4b3   :  { %5636 = vst [vmem:[#allocation46_spill] sm:$0xff] %v4723_v61  ;;  %5637 = vst [vmem:[#allocation47_spill] sm:$0xff] %v4726_v17 }
 0x4b5   :  { %2050 = vmatpush2.bf16.msra.mxu0 %v4711_v22  ;;  %2091 = vmatpush2.bf16.msra.mxu1 %v4714_v47  ;;  %v4729_v22 = vld [vmem:[#allocation6 + $0x184] ss:$16 sps:$4 sm:$0xff]   ;;  %v4732_v47 = vld [vmem:[#allocation6 + $0x18c] ss:$16 sps:$4 sm:$0xff]  }
 0x4b6   :  { %2051 = vmatprep.subr.bf16.mxu0 %v4717_v48  ;;  %2092 = vmatprep.subr.bf16.mxu1 %v4720_v38  ;;  %5638 = vst [vmem:[#allocation48_spill] sm:$0xff] %v4729_v22  ;;  %5639 = vst [vmem:[#allocation49_spill] sm:$0xff] %v4732_v47  ;;  %v4735_v48 = vld [vmem:[#allocation6 + $0x180] ss:$16 sps:$4 sm:$0xff]   ;;  %v4738_v38 = vld [vmem:[#allocation6 + $0x188] ss:$16 sps:$4 sm:$0xff]  }
 0x4b7   :  { %5640 = vst [vmem:[#allocation50_spill] sm:$0xff] %v4735_v48  ;;  %5641 = vst [vmem:[#allocation51_spill] sm:$0xff] %v4738_v38 }
 0x4b9   :  { %2052 = vmatpush2.bf16.msra.mxu0 %v4723_v61  ;;  %2093 = vmatpush2.bf16.msra.mxu1 %v4726_v17  ;;  %v4741_v61 = vld [vmem:[#allocation6 + $0x164] ss:$16 sps:$4 sm:$0xff]   ;;  %v4744_v17 = vld [vmem:[#allocation6 + $0x16c] ss:$16 sps:$4 sm:$0xff]  }
 0x4ba   :  { %2053 = vmatprep.subr.bf16.mxu0 %v4729_v22  ;;  %2094 = vmatprep.subr.bf16.mxu1 %v4732_v47  ;;  %5642 = vst [vmem:[#allocation52_spill] sm:$0xff] %v4741_v61  ;;  %5643 = vst [vmem:[#allocation53_spill] sm:$0xff] %v4744_v17  ;;  %v4747_v22 = vld [vmem:[#allocation6 + $0x160] ss:$16 sps:$4 sm:$0xff]   ;;  %v4750_v47 = vld [vmem:[#allocation6 + $0x168] ss:$16 sps:$4 sm:$0xff]  }
 0x4bb   :  { %5644 = vst [vmem:[#allocation54_spill] sm:$0xff] %v4747_v22  ;;  %5645 = vst [vmem:[#allocation55_spill] sm:$0xff] %v4750_v47 }
 0x4bd   :  { %2054 = vmatpush2.bf16.msra.mxu0 %v4735_v48  ;;  %2095 = vmatpush2.bf16.msra.mxu1 %v4738_v38  ;;  %v4753_v48 = vld [vmem:[#allocation6 + $0x144] ss:$16 sps:$4 sm:$0xff]   ;;  %v4756_v38 = vld [vmem:[#allocation6 + $0x14c] ss:$16 sps:$4 sm:$0xff]  }
 0x4be   :  { %2055 = vmatprep.subr.bf16.mxu0 %v4741_v61  ;;  %2096 = vmatprep.subr.bf16.mxu1 %v4744_v17  ;;  %5646 = vst [vmem:[#allocation56_spill] sm:$0xff] %v4753_v48  ;;  %5647 = vst [vmem:[#allocation57_spill] sm:$0xff] %v4756_v38  ;;  %v4759_v61 = vld [vmem:[#allocation6 + $0x140] ss:$16 sps:$4 sm:$0xff]   ;;  %v4762_v17 = vld [vmem:[#allocation6 + $0x148] ss:$16 sps:$4 sm:$0xff]  }
 0x4bf   :  { %5648 = vst [vmem:[#allocation58_spill] sm:$0xff] %v4759_v61  ;;  %5649 = vst [vmem:[#allocation59_spill] sm:$0xff] %v4762_v17 }
 0x4c1   :  { %2056 = vmatpush2.bf16.msra.mxu0 %v4747_v22  ;;  %2097 = vmatpush2.bf16.msra.mxu1 %v4750_v47  ;;  %v4765_v22 = vld [vmem:[#allocation6 + $0x124] ss:$16 sps:$4 sm:$0xff]   ;;  %v4768_v47 = vld [vmem:[#allocation6 + $0x12c] ss:$16 sps:$4 sm:$0xff]  }
 0x4c2   :  { %2057 = vmatprep.subr.bf16.mxu0 %v4753_v48  ;;  %2098 = vmatprep.subr.bf16.mxu1 %v4756_v38  ;;  %5650 = vst [vmem:[#allocation60_spill] sm:$0xff] %v4765_v22  ;;  %5651 = vst [vmem:[#allocation61_spill] sm:$0xff] %v4768_v47  ;;  %v4771_v48 = vld [vmem:[#allocation6 + $0x120] ss:$16 sps:$4 sm:$0xff]   ;;  %v4774_v38 = vld [vmem:[#allocation6 + $0x128] ss:$16 sps:$4 sm:$0xff]  }
 0x4c3   :  { %5652 = vst [vmem:[#allocation62_spill] sm:$0xff] %v4771_v48  ;;  %5653 = vst [vmem:[#allocation63_spill] sm:$0xff] %v4774_v38 }
 0x4c5   :  { %2058 = vmatpush2.bf16.msra.mxu0 %v4759_v61  ;;  %2099 = vmatpush2.bf16.msra.mxu1 %v4762_v17  ;;  %v4777_v61 = vld [vmem:[#allocation6 + $0x104] ss:$16 sps:$4 sm:$0xff]   ;;  %v4780_v17 = vld [vmem:[#allocation6 + $0x10c] ss:$16 sps:$4 sm:$0xff]  }
 0x4c6   :  { %2059 = vmatprep.subr.bf16.mxu0 %v4765_v22  ;;  %2100 = vmatprep.subr.bf16.mxu1 %v4768_v47  ;;  %5654 = vst [vmem:[#allocation65_spill] sm:$0xff] %v4777_v61  ;;  %5655 = vst [vmem:[#allocation66_spill] sm:$0xff] %v4780_v17  ;;  %v4783_v22 = vld [vmem:[#allocation6 + $0x100] ss:$16 sps:$4 sm:$0xff]   ;;  %v4786_v47 = vld [vmem:[#allocation6 + $0x108] ss:$16 sps:$4 sm:$0xff]  }
 0x4c7   :  { %5656 = vst [vmem:[#allocation67_spill] sm:$0xff] %v4783_v22  ;;  %5657 = vst [vmem:[#allocation68_spill] sm:$0xff] %v4786_v47 }
 0x4c9   :  { %2060 = vmatpush2.bf16.msra.mxu0 %v4771_v48  ;;  %2101 = vmatpush2.bf16.msra.mxu1 %v4774_v38 }
 0x4ca   :  { %2061 = vmatprep.subr.bf16.mxu0 %v4777_v61  ;;  %2102 = vmatprep.subr.bf16.mxu1 %v4780_v17 }
 0x4cd   :  { %2062 = vmatpush2.bf16.msra.mxu0 %v4783_v22  ;;  %2103 = vmatpush2.bf16.msra.mxu1 %v4786_v47  ;;  %v5658_v47 = vld [vmem:[#allocation95_spill] sm:$0xff] }
 0x4ce   :  { %2142 = vmatprep.subr.bf16.mxu0 %v4537_v53  ;;  %2183 = vmatprep.subr.bf16.mxu1 %v4540_v63 }
 0x530   :  { %v1843_v38 = vpop.f32.mrf.mxu0  ;;  %v1884_v48 = vpop.f32.mrf.mxu1 }
 0x531   :  { %v1844_v61 = vadd.f32 %v1843_v38, %v5608_v54  ;;  %v1885_v20 = vadd.f32 %v1884_v48, %v5659_v21 }
 0x532   :  { %v1845_v35 = vpop.f32.mrf.mxu0  ;;  %v1886_v52 = vpop.f32.mrf.mxu1 }
 0x533   :  { %v2994_v39 = vmul.f32 -1.442695, %v1844_v61  ;;  %v1846_v17 = vadd.f32 %v1845_v35, %v5609_v40  ;;  %v1887_v53 = vadd.f32 %v1886_v52, %v5658_v47 }
 0x534   :  { %v1847_v56 = vpop.f32.mrf.mxu0  ;;  %v1888_v42 = vpop.f32.mrf.mxu1 }
 0x535   :  { %3288 = vpow2.f32 %v2994_v39  ;;  %v2996_v22 = vmul.f32 -1.442695, %v1846_v17  ;;  %v2995_v30 = vmul.f32 -1.442695, %v1887_v53  ;;  %v5660_v56 = vld [vmem:[#allocation30_spill] sm:$0xff]  ;;  %v5661_v42 = vld [vmem:[#allocation79_spill] sm:$0xff] }
 0x536   :  { %v1848_v41 = vpop.f32.mrf.mxu0  ;;  %v1889_v32 = vpop.f32.mrf.mxu1  ;;  %v219_v39 = vadd.f32 %v5661_v42, %v5660_v56  ;;  %v5662_v17 = vld [vmem:[#allocation81_spill] sm:$0xff] }
 0x537   :  { %3290 = vpow2.f32 %v2996_v22  ;;  %v221_v52 = vadd.f32 %v5662_v17, %v4237_v37 }
 0x538   :  { %3292 = vpow2.f32 %v2995_v30 }
 0x542   :  { %v3289_v63 = vpop.eup %3288 }
 0x543   :  { %v1894_v19 = vadd.f32 1.0, %v3289_v63 }
 0x544   :  { %v3291_v38 = vpop.eup %3290 }
 0x545   :  { %3294 = vrcp.f32 %v1894_v19  ;;  %v1907_v61 = vadd.f32 1.0, %v3291_v38  ;;  %v3293_v32 = vpop.eup %3292 }
 0x546   :  { %3296 = vtanh.f32 %v1885_v20  ;;  %v1901_v38 = vadd.f32 1.0, %v3293_v32  ;;  %v5664_v32 = vld [vmem:[#allocation78_spill] sm:$0xff] }
 0x547   :  { %3298 = vrcp.f32 %v1907_v61 }
 0x550   :  { %v1954_v35 = vpop.f32.mrf.mxu0  ;;  %v1995_v41 = vpop.f32.mrf.mxu1 }
 0x551   :  { %v2002_v53 = vadd.f32 %v1954_v35, %v219_v39  ;;  %v5663_v39 = vld [vmem:[#allocation80_spill] sm:$0xff] }
 0x552   :  { %v3295_v22 = vpop.eup %3294  ;;  %v1956_v47 = vpop.f32.mrf.mxu0 }
 0x553   :  { %v1997_v48 = vpop.f32.mrf.mxu1  ;;  %v3297_v63 = vpop.eup %3296  ;;  %v2997_v21 = vmul.f32 -1.442695, %v2002_v53  ;;  %v2003_v30 = vadd.f32 %v1956_v47, %v221_v52  ;;  %v294_v47 = vadd.f32 %v5663_v39, %v3913_v6  ;;  %v292_v52 = vadd.f32 %v5664_v32, %v3920_v10 }
 0x554   :  { %v3299_v19 = vpop.eup %3298  ;;  %v1958_v20 = vpop.f32.mrf.mxu0  ;;  %v1911_v40 = vmul.f32 %v3297_v63, %v3295_v22 }
 0x555   :  { %v1999_v61 = vpop.f32.mrf.mxu1  ;;  %v1910_v42 = vmul.f32 %v3299_v19, %v4552_v46  ;;  %3300 = vpow2.f32 %v2997_v21  ;;  %v2999_v56 = vmul.f32 -1.442695, %v2003_v30  ;;  %v2005_v35 = vadd.f32 %v1997_v48, %v294_v47 }
 0x556   :  { %v1959_v54 = vpop.f32.mrf.mxu0  ;;  %v2004_v53 = vadd.f32 %v1995_v41, %v292_v52 }
 0x557   :  { %v2000_v14 = vpop.f32.mrf.mxu1  ;;  %3302 = vpow2.f32 %v2999_v56  ;;  %v4800_v17 = vadd.f32 %v1911_v40, %v1910_v42  ;;  %v2998_v22 = vmul.f32 -1.442695, %v2005_v35 }
 0x558   :  { %3304 = vrcp.f32 %v1901_v38 }
 0x559   :  { %3306 = vtanh.f32 %v4800_v17 }
 0x55a   :  { %3308 = vtanh.f32 %v2004_v53  ;;  %v5666_v53 = vld [vmem:[#allocation24_spill] sm:$0xff] }
 0x55b   :  { %3310 = vpow2.f32 %v2998_v22  ;;  %v5667_v22 = vld [vmem:[#allocation25_spill] sm:$0xff] }
 0x562   :  { %v3301_v46 = vpop.eup %3300 }
 0x563   :  { %v2009_v21 = vadd.f32 1.0, %v3301_v46  ;;  %v5668_v46 = vld [vmem:[#allocation26_spill] sm:$0xff] }
 0x564   :  { %v3303_v54 = vpop.eup %3302 }
 0x565   :  { %v3305_v14 = vpop.eup %3304  ;;  %3312 = vrcp.f32 %v2009_v21  ;;  %v2022_v40 = vadd.f32 1.0, %v3303_v54  ;;  %v5669_v21 = vld [vmem:[#allocation27_spill] sm:$0xff]  ;;  %v5670_v54 = vld [vmem:[#allocation38_spill] sm:$0xff] }
 0x566   :  { %v3307_v56 = vpop.eup %3306 }
 0x567   :  { %3314 = vrcp.f32 %v2022_v40  ;;  %v1914_v63 = vmul.f32 %v3307_v56, %v3305_v14  ;;  %v3309_v48 = vpop.eup %3308  ;;  %v5671_v14 = vld [vmem:[#allocation39_spill] sm:$0xff]  ;;  %v5672_v40 = vld [vmem:[#allocation40_spill] sm:$0xff]  ;;  %v5673_v56 = vld [vmem:[#allocation41_spill] sm:$0xff] }
 0x568   :  { %v3311_v19 = vpop.eup %3310 }
 0x569   :  { %v1915_v30 = vpack.c.bf16 %v1914_v63, %v1914_v63  ;;  %v2016_v61 = vadd.f32 1.0, %v3311_v19  ;;  %v5689_v63 = vld [vmem:[#allocation18_spill] sm:$0xff]  ;;  %v5692_v19 = vld [vmem:[#allocation43_spill] sm:$0xff] }
 0x56b   :  { %2063 = vmatprep.mubr.bf16.mxu0 %v1915_v30  ;;  %2104 = vmatprep.mubr.bf16.mxu1 %v1915_v30  ;;  %3316 = vrcp.f32 %v2016_v61  ;;  %v5690_v30 = vld [vmem:[#allocation20_spill] sm:$0xff]  ;;  %v5696_v61 = vld [vmem:[#allocation73_spill] sm:$0xff] }
 0x572   :  { %v3313_v38 = vpop.eup %3312 }
 0x573   :  { %v2026_v20 = vmul.f32 %v3313_v38, %v3309_v48  ;;  %v5691_v48 = vld [vmem:[#allocation42_spill] sm:$0xff]  ;;  %v5693_v38 = vld [vmem:[#allocation28_spill] sm:$0xff] }
 0x574   :  { %v3315_v41 = vpop.eup %3314 }
 0x575   :  { %v2025_v42 = vmul.f32 %v3315_v41, %v4560_v55  ;;  %v5665_v55 = vld [vmem:[#allocation23_spill] sm:$0xff]  ;;  %v5695_v41 = vld [vmem:[#allocation69_spill] sm:$0xff] }
 0x577   :  { %v4808_v39 = vadd.f32 %v2026_v20, %v2025_v42  ;;  %v5694_v20 = vld [vmem:[#allocation29_spill] sm:$0xff]  ;;  %v5697_v42 = vld [vmem:[#allocation70_spill] sm:$0xff] }
 0x578   :  { %v3317_v47 = vpop.eup %3316 }
 0x579   :  { %3318 = vtanh.f32 %v4808_v39 }
 0x586   :  { %v3319_v35 = vpop.eup %3318 }
 0x587   :  { %v2029_v32 = vmul.f32 %v3319_v35, %v3317_v47  ;;  %v5698_v47 = vld [vmem:[#allocation64_spill] sm:$0xff] }
 0x588   :  { %v5699_v35 = vld [vmem:[#allocation44_spill] sm:$0xff] }
 0x589   :  { %v2030_v52 = vpack.c.bf16 %v2029_v32, %v2029_v32  ;;  %v5700_v32 = vld [vmem:[#allocation45_spill] sm:$0xff] }
 0x58b   :  { %2064 = vmatmul.mubr.bf16.vlgmr.msra.gmra.mxu0 %v2030_v52  ;;  %2105 = vmatmul.mubr.bf16.vlgmr.msra.gmra.mxu1 %v2030_v52 }
 0x58c   :  { %2143 = vmatpush1.bf16.msra.mxu0 %v4567_v62  ;;  %2184 = vmatpush1.bf16.msra.mxu1 %v4570_v43 }
 0x58d   :  { %2144 = vmatprep.subr.bf16.mxu0 %v4573_v28  ;;  %2185 = vmatprep.subr.bf16.mxu1 %v4576_v34 }
 0x58e   :  { %2174 = vmatprep.mubr.bf16.mxu0 %v5493_v31  ;;  %2215 = vmatprep.mubr.bf16.mxu1 %v5493_v31 }
 0x590   :  { %2145 = vmatpush1.bf16.msra.mxu0 %v4581_v49  ;;  %2186 = vmatpush1.bf16.msra.mxu1 %v4584_v24 }
 0x591   :  { %2146 = vmatprep.subr.bf16.mxu0 %v4587_v57  ;;  %2187 = vmatprep.subr.bf16.mxu1 %v4590_v23 }
 0x594   :  { %2147 = vmatpush1.bf16.msra.mxu0 %v4593_v25  ;;  %2188 = vmatpush1.bf16.msra.mxu1 %v4596_v15 }
 0x595   :  { %2148 = vmatprep.subr.bf16.mxu0 %v4599_v18  ;;  %2189 = vmatprep.subr.bf16.mxu1 %v4602_v26 }
 0x598   :  { %2149 = vmatpush1.bf16.msra.mxu0 %v4605_v59  ;;  %2190 = vmatpush1.bf16.msra.mxu1 %v4608_v27 }
 0x599   :  { %2150 = vmatprep.subr.bf16.mxu0 %v4611_v29  ;;  %2191 = vmatprep.subr.bf16.mxu1 %v5665_v55 }
 0x59c   :  { %2151 = vmatpush1.bf16.msra.mxu0 %v5666_v53  ;;  %2192 = vmatpush1.bf16.msra.mxu1 %v5667_v22 }
 0x59d   :  { %2152 = vmatprep.subr.bf16.mxu0 %v5668_v46  ;;  %2193 = vmatprep.subr.bf16.mxu1 %v5669_v21 }
 0x5a0   :  { %2153 = vmatpush1.bf16.msra.mxu0 %v5670_v54  ;;  %2194 = vmatpush1.bf16.msra.mxu1 %v5671_v14 }
 0x5a1   :  { %2154 = vmatprep.subr.bf16.mxu0 %v5672_v40  ;;  %2195 = vmatprep.subr.bf16.mxu1 %v5673_v56 }
 0x5a4   :  { %2155 = vmatpush1.bf16.msra.mxu0 %v4641_v50  ;;  %2196 = vmatpush1.bf16.msra.mxu1 %v4644_v45 }
 0x5a5   :  { %2156 = vmatprep.subr.bf16.mxu0 %v4647_v36  ;;  %2197 = vmatprep.subr.bf16.mxu1 %v4650_v51 }
 0x5a8   :  { %2157 = vmatpush1.bf16.msra.mxu0 %v4653_v33  ;;  %2198 = vmatpush1.bf16.msra.mxu1 %v4656_v16 }
 0x5a9   :  { %2253 = vmatprep.subr.bf16.mxu0 %v4409_v44  ;;  %2294 = vmatprep.subr.bf16.mxu1 %v4412_v0  ;;  %v5674_v44 = vld [vmem:[#allocation32_spill] sm:$0xff]  ;;  %v5675_v0 = vld [vmem:[#allocation33_spill] sm:$0xff] }
 0x5ab   :  { %2175 = vmatmul.mubr.bf16.vlgmr.msra.gmra.mxu0 %v2030_v52  ;;  %2216 = vmatmul.mubr.bf16.vlgmr.msra.gmra.mxu1 %v2030_v52  ;;  %v5701_v52 = vld [vmem:[#allocation46_spill] sm:$0xff] }
 0x5ac   :  { %2254 = vmatpush1.bf16.msra.mxu0 %v4415_v60  ;;  %2295 = vmatpush1.bf16.msra.mxu1 %v4418_v58  ;;  %v5676_v60 = vld [vmem:[#allocation34_spill] sm:$0xff]  ;;  %v5677_v58 = vld [vmem:[#allocation35_spill] sm:$0xff] }
 0x5ad   :  { %2255 = vmatprep.subr.bf16.mxu0 %v4421_v1  ;;  %2296 = vmatprep.subr.bf16.mxu1 %v4424_v8  ;;  %v5678_v1 = vld [vmem:[#allocation36_spill] sm:$0xff]  ;;  %v5679_v8 = vld [vmem:[#allocation37_spill] sm:$0xff] }
 0x5b0   :  { %2256 = vmatpush1.bf16.msra.mxu0 %v4427_v2  ;;  %2297 = vmatpush1.bf16.msra.mxu1 %v4430_v3  ;;  %v5680_v2 = vld [vmem:[#allocation10_spill] sm:$0xff]  ;;  %v5681_v3 = vld [vmem:[#allocation11_spill] sm:$0xff] }
 0x5b1   :  { %2257 = vmatprep.subr.bf16.mxu0 %v4433_v4  ;;  %2298 = vmatprep.subr.bf16.mxu1 %v4436_v5  ;;  %v5682_v4 = vld [vmem:[#allocation12_spill] sm:$0xff]  ;;  %v5683_v5 = vld [vmem:[#allocation13_spill] sm:$0xff] }
 0x5b4   :  { %2258 = vmatpush1.bf16.msra.mxu0 %v4439_v7  ;;  %2299 = vmatpush1.bf16.msra.mxu1 %v4442_v9  ;;  %v5684_v7 = vld [vmem:[#allocation14_spill] sm:$0xff]  ;;  %v5685_v9 = vld [vmem:[#allocation15_spill] sm:$0xff] }
 0x5b5   :  { %2259 = vmatprep.subr.bf16.mxu0 %v4445_v11  ;;  %2300 = vmatprep.subr.bf16.mxu1 %v4448_v12  ;;  %v5686_v11 = vld [vmem:[#allocation16_spill] sm:$0xff]  ;;  %v5687_v12 = vld [vmem:[#allocation19_spill] sm:$0xff] }
 0x5b8   :  { %2260 = vmatpush1.bf16.msra.mxu0 %v4451_v13  ;;  %2301 = vmatpush1.bf16.msra.mxu1 %v5674_v44  ;;  %v5688_v13 = vld [vmem:[#allocation17_spill] sm:$0xff]  ;;  %v5702_v44 = vld [vmem:[#allocation47_spill] sm:$0xff] }
 0x5b9   :  { %2261 = vmatprep.subr.bf16.mxu0 %v5675_v0  ;;  %2302 = vmatprep.subr.bf16.mxu1 %v5676_v60  ;;  %v5703_v0 = vld [vmem:[#allocation48_spill] sm:$0xff]  ;;  %v5704_v60 = vld [vmem:[#allocation49_spill] sm:$0xff] }
 0x5bc   :  { %2262 = vmatpush1.bf16.msra.mxu0 %v5677_v58  ;;  %2303 = vmatpush1.bf16.msra.mxu1 %v5678_v1  ;;  %v5705_v58 = vld [vmem:[#allocation50_spill] sm:$0xff]  ;;  %v5706_v1 = vld [vmem:[#allocation51_spill] sm:$0xff] }
 0x5bd   :  { %2263 = vmatprep.subr.bf16.mxu0 %v5679_v8  ;;  %2304 = vmatprep.subr.bf16.mxu1 %v5680_v2  ;;  %v5707_v8 = vld [vmem:[#allocation52_spill] sm:$0xff]  ;;  %v5708_v2 = vld [vmem:[#allocation53_spill] sm:$0xff] }
 0x5c0   :  { %2264 = vmatpush1.bf16.msra.mxu0 %v5681_v3  ;;  %2305 = vmatpush1.bf16.msra.mxu1 %v5682_v4  ;;  %v5709_v3 = vld [vmem:[#allocation54_spill] sm:$0xff]  ;;  %v5710_v4 = vld [vmem:[#allocation55_spill] sm:$0xff] }
 0x5c1   :  { %2265 = vmatprep.subr.bf16.mxu0 %v5683_v5  ;;  %2306 = vmatprep.subr.bf16.mxu1 %v5684_v7  ;;  %v5711_v5 = vld [vmem:[#allocation56_spill] sm:$0xff]  ;;  %v5712_v7 = vld [vmem:[#allocation57_spill] sm:$0xff] }
 0x5c4   :  { %2266 = vmatpush1.bf16.msra.mxu0 %v5685_v9  ;;  %2307 = vmatpush1.bf16.msra.mxu1 %v5686_v11  ;;  %v5713_v9 = vld [vmem:[#allocation58_spill] sm:$0xff]  ;;  %v5714_v11 = vld [vmem:[#allocation59_spill] sm:$0xff] }
 0x5c5   :  { %2267 = vmatprep.subr.bf16.mxu0 %v5687_v12  ;;  %2308 = vmatprep.subr.bf16.mxu1 %v5688_v13  ;;  %v5715_v12 = vld [vmem:[#allocation60_spill] sm:$0xff]  ;;  %v5716_v13 = vld [vmem:[#allocation61_spill] sm:$0xff] }
 0x5c8   :  { %2268 = vmatpush1.bf16.msra.mxu0 %v5689_v63  ;;  %2309 = vmatpush1.bf16.msra.mxu1 %v5690_v30  ;;  %v5717_v63 = vld [vmem:[#allocation62_spill] sm:$0xff]  ;;  %v5718_v30 = vld [vmem:[#allocation63_spill] sm:$0xff] }
 0x5c9   :  { %2269 = vmatprep.subr.bf16.mxu0 %v5691_v48  ;;  %2310 = vmatprep.subr.bf16.mxu1 %v5692_v19 }
 0x5cc   :  { %2270 = vmatpush2.bf16.msra.mxu0 %v5693_v38  ;;  %2311 = vmatpush2.bf16.msra.mxu1 %v5694_v20 }
 0x5cd   :  { %2271 = vmatprep.subr.bf16.mxu0 %v5695_v41  ;;  %2312 = vmatprep.subr.bf16.mxu1 %v5696_v61 }
 0x5d0   :  { %2272 = vmatpush2.bf16.msra.mxu0 %v5697_v42  ;;  %2313 = vmatpush2.bf16.msra.mxu1 %v5698_v47 }
 0x5d1   :  { %2273 = vmatprep.subr.bf16.mxu0 %v5699_v35  ;;  %2314 = vmatprep.subr.bf16.mxu1 %v5700_v32  ;;  %v5728_v32 = vld [vmem:[#allocation96_spill] sm:$0xff] }
 0x5d4   :  { %2274 = vmatpush2.bf16.msra.mxu0 %v5701_v52  ;;  %2315 = vmatpush2.bf16.msra.mxu1 %v5702_v44 }
 0x5d5   :  { %2275 = vmatprep.subr.bf16.mxu0 %v5703_v0  ;;  %2316 = vmatprep.subr.bf16.mxu1 %v5704_v60 }
 0x5d8   :  { %2276 = vmatpush2.bf16.msra.mxu0 %v5705_v58  ;;  %2317 = vmatpush2.bf16.msra.mxu1 %v5706_v1 }
 0x5d9   :  { %2277 = vmatprep.subr.bf16.mxu0 %v5707_v8  ;;  %2318 = vmatprep.subr.bf16.mxu1 %v5708_v2  ;;  %v5719_v2 = vld [vmem:[#allocation65_spill] sm:$0xff] }
 0x5da   :  { %v5725_v8 = vld [vmem:[#allocation93_spill] sm:$0xff] }
 0x5dc   :  { %2278 = vmatpush2.bf16.msra.mxu0 %v5709_v3  ;;  %2319 = vmatpush2.bf16.msra.mxu1 %v5710_v4  ;;  %v5720_v3 = vld [vmem:[#allocation66_spill] sm:$0xff]  ;;  %v5721_v4 = vld [vmem:[#allocation67_spill] sm:$0xff] }
 0x5dd   :  { %2279 = vmatprep.subr.bf16.mxu0 %v5711_v5  ;;  %2320 = vmatprep.subr.bf16.mxu1 %v5712_v7  ;;  %v5722_v5 = vld [vmem:[#allocation68_spill] sm:$0xff]  ;;  %v5723_v7 = vld [vmem:[#allocation21_spill] sm:$0xff] }
 0x5e0   :  { %2280 = vmatpush2.bf16.msra.mxu0 %v5713_v9  ;;  %2321 = vmatpush2.bf16.msra.mxu1 %v5714_v11  ;;  %v5724_v9 = vld [vmem:[#allocation22_spill] sm:$0xff] }
 0x5e1   :  { %2281 = vmatprep.subr.bf16.mxu0 %v5715_v12  ;;  %2322 = vmatprep.subr.bf16.mxu1 %v5716_v13 }
 0x5e4   :  { %2282 = vmatpush2.bf16.msra.mxu0 %v5717_v63  ;;  %2323 = vmatpush2.bf16.msra.mxu1 %v5718_v30  ;;  %v5726_v30 = vld [vmem:[#allocation31_spill] sm:$0xff] }
 0x5e5   :  { %2283 = vmatprep.subr.bf16.mxu0 %v5719_v2  ;;  %2324 = vmatprep.subr.bf16.mxu1 %v5720_v3 }
 0x5e8   :  { %2284 = vmatpush2.bf16.msra.mxu0 %v5721_v4  ;;  %2325 = vmatpush2.bf16.msra.mxu1 %v5722_v5  ;;  %v5727_v5 = vld [vmem:[#allocation95_spill] sm:$0xff] }
 0x5e9   :  { %2364 = vmatprep.subr.bf16.mxu0 %v5723_v7  ;;  %2405 = vmatprep.subr.bf16.mxu1 %v5724_v9 }
 0x64b   :  { %v2065_v11 = vpop.f32.mrf.mxu0  ;;  %v2106_v12 = vpop.f32.mrf.mxu1 }
 0x64c   :  { %v2066_v13 = vadd.f32 %v2065_v11, %v5725_v8  ;;  %v2107_v35 = vadd.f32 %v2106_v12, %v5728_v32 }
 0x64d   :  { %v2067_v1 = vpop.f32.mrf.mxu0  ;;  %v2108_v63 = vpop.f32.mrf.mxu1 }
 0x64e   :  { %v3000_v58 = vmul.f32 -1.442695, %v2066_v13  ;;  %v2068_v60 = vadd.f32 %v2067_v1, %v5726_v30  ;;  %v2109_v7 = vadd.f32 %v2108_v63, %v5727_v5  ;;  %v5729_v1 = vld [vmem:[#allocation30_spill] sm:$0xff] }
 0x64f   :  { %v2069_v2 = vpop.f32.mrf.mxu0  ;;  %v2110_v0 = vpop.f32.mrf.mxu1 }
 0x650   :  { %3320 = vpow2.f32 %v3000_v58  ;;  %v3002_v3 = vmul.f32 -1.442695, %v2068_v60  ;;  %v3001_v52 = vmul.f32 -1.442695, %v2109_v7  ;;  %v5730_v0 = vld [vmem:[#allocation83_spill] sm:$0xff] }
 0x651   :  { %v2070_v4 = vpop.f32.mrf.mxu0  ;;  %v2111_v44 = vpop.f32.mrf.mxu1  ;;  %v223_v58 = vadd.f32 %v5730_v0, %v5729_v1 }
 0x652   :  { %3322 = vpow2.f32 %v3002_v3  ;;  %v5731_v3 = vld [vmem:[#allocation85_spill] sm:$0xff] }
 0x653   :  { %3324 = vpow2.f32 %v3001_v52  ;;  %v225_v4 = vadd.f32 %v5731_v3, %v4237_v37 }
 0x65d   :  { %v3321_v9 = vpop.eup %3320 }
 0x65e   :  { %v2116_v47 = vadd.f32 1.0, %v3321_v9 }
 0x65f   :  { %v3323_v11 = vpop.eup %3322 }
 0x660   :  { %3326 = vrcp.f32 %v2116_v47  ;;  %v2129_v13 = vadd.f32 1.0, %v3323_v11  ;;  %v3325_v44 = vpop.eup %3324 }
 0x661   :  { %3328 = vtanh.f32 %v2107_v35  ;;  %v2123_v11 = vadd.f32 1.0, %v3325_v44  ;;  %v5733_v44 = vld [vmem:[#allocation82_spill] sm:$0xff] }
 0x662   :  { %3330 = vrcp.f32 %v2129_v13 }
 0x66b   :  { %v2176_v60 = vpop.f32.mrf.mxu0  ;;  %v2217_v2 = vpop.f32.mrf.mxu1 }
 0x66c   :  { %v2224_v63 = vadd.f32 %v2176_v60, %v223_v58  ;;  %v5732_v58 = vld [vmem:[#allocation84_spill] sm:$0xff] }
 0x66d   :  { %v3327_v7 = vpop.eup %3326  ;;  %v2178_v5 = vpop.f32.mrf.mxu0 }
 0x66e   :  { %v2219_v12 = vpop.f32.mrf.mxu1  ;;  %v3329_v9 = vpop.eup %3328  ;;  %v3003_v32 = vmul.f32 -1.442695, %v2224_v63  ;;  %v2225_v52 = vadd.f32 %v2178_v5, %v225_v4  ;;  %v298_v5 = vadd.f32 %v5732_v58, %v3913_v6  ;;  %v296_v4 = vadd.f32 %v5733_v44, %v3920_v10 }
 0x66f   :  { %v3331_v47 = vpop.eup %3330  ;;  %v2180_v35 = vpop.f32.mrf.mxu0  ;;  %v2133_v30 = vmul.f32 %v3329_v9, %v3327_v7 }
 0x670   :  { %v2221_v13 = vpop.f32.mrf.mxu1  ;;  %v2132_v0 = vmul.f32 %v3331_v47, %v4800_v17  ;;  %3332 = vpow2.f32 %v3003_v32  ;;  %v3005_v1 = vmul.f32 -1.442695, %v2225_v52  ;;  %v2227_v60 = vadd.f32 %v2219_v12, %v298_v5 }
 0x671   :  { %v2181_v8 = vpop.f32.mrf.mxu0  ;;  %v2226_v63 = vadd.f32 %v2217_v2, %v296_v4 }
 0x672   :  { %v2222_v42 = vpop.f32.mrf.mxu1  ;;  %3334 = vpow2.f32 %v3005_v1  ;;  %v4918_v3 = vadd.f32 %v2133_v30, %v2132_v0  ;;  %v3004_v7 = vmul.f32 -1.442695, %v2227_v60 }
 0x673   :  { %3336 = vrcp.f32 %v2123_v11 }
 0x674   :  { %3338 = vtanh.f32 %v4918_v3 }
 0x675   :  { %3340 = vtanh.f32 %v2226_v63  ;;  %v5054_v63 = vld [vmem:[#allocation6 + $0x8] ss:$16 sps:$4 sm:$0xff]  }
 0x676   :  { %3342 = vpow2.f32 %v3004_v7  ;;  %v5734_v7 = vld [vmem:[#allocation70_spill] sm:$0xff] }
 0x67d   :  { %v3333_v17 = vpop.eup %3332 }
 0x67e   :  { %v2231_v32 = vadd.f32 1.0, %v3333_v17  ;;  %v5735_v17 = vld [vmem:[#allocation64_spill] sm:$0xff] }
 0x67f   :  { %v3335_v8 = vpop.eup %3334 }
 0x680   :  { %v3337_v42 = vpop.eup %3336  ;;  %3344 = vrcp.f32 %v2231_v32  ;;  %v2244_v30 = vadd.f32 1.0, %v3335_v8  ;;  %v5736_v32 = vld [vmem:[#allocation44_spill] sm:$0xff]  ;;  %v5737_v8 = vld [vmem:[#allocation45_spill] sm:$0xff] }
 0x681   :  { %v3339_v1 = vpop.eup %3338 }
 0x682   :  { %3346 = vrcp.f32 %v2244_v30  ;;  %v2136_v9 = vmul.f32 %v3339_v1, %v3337_v42  ;;  %v3341_v12 = vpop.eup %3340  ;;  %v5738_v42 = vld [vmem:[#allocation46_spill] sm:$0xff]  ;;  %v5745_v30 = vld [vmem:[#allocation53_spill] sm:$0xff] }
 0x683   :  { %v3343_v47 = vpop.eup %3342  ;;  %v5746_v1 = vld [vmem:[#allocation54_spill] sm:$0xff] }
 0x684   :  { %v2137_v52 = vpack.c.bf16 %v2136_v9, %v2136_v9  ;;  %v2238_v13 = vadd.f32 1.0, %v3343_v47  ;;  %v5747_v9 = vld [vmem:[#allocation55_spill] sm:$0xff]  ;;  %v5750_v47 = vld [vmem:[#allocation58_spill] sm:$0xff] }
 0x686   :  { %2285 = vmatprep.mubr.bf16.mxu0 %v2137_v52  ;;  %2326 = vmatprep.mubr.bf16.mxu1 %v2137_v52  ;;  %3348 = vrcp.f32 %v2238_v13  ;;  %v5748_v52 = vld [vmem:[#allocation56_spill] sm:$0xff]  ;;  %v5754_v13 = vld [vmem:[#allocation62_spill] sm:$0xff] }
 0x68d   :  { %v3345_v11 = vpop.eup %3344 }
 0x68e   :  { %v2248_v35 = vmul.f32 %v3345_v11, %v3341_v12  ;;  %v5749_v12 = vld [vmem:[#allocation57_spill] sm:$0xff]  ;;  %v5751_v11 = vld [vmem:[#allocation59_spill] sm:$0xff] }
 0x68f   :  { %v3347_v2 = vpop.eup %3346 }
 0x690   :  { %v2247_v0 = vmul.f32 %v3347_v2, %v4808_v39  ;;  %v5024_v39 = vld [vmem:[#allocation6 + $0x4c] ss:$16 sps:$4 sm:$0xff]  }
 0x691   :  { %v5753_v2 = vld [vmem:[#allocation61_spill] sm:$0xff] }
 0x692   :  { %v4926_v58 = vadd.f32 %v2248_v35, %v2247_v0  ;;  %v5752_v35 = vld [vmem:[#allocation60_spill] sm:$0xff]  ;;  %v5755_v0 = vld [vmem:[#allocation63_spill] sm:$0xff] }
 0x693   :  { %v3349_v5 = vpop.eup %3348 }
 0x694   :  { %3350 = vtanh.f32 %v4926_v58 }
 0x6a1   :  { %v3351_v60 = vpop.eup %3350 }
 0x6a2   :  { %v2251_v44 = vmul.f32 %v3351_v60, %v3349_v5  ;;  %v5756_v5 = vld [vmem:[#allocation65_spill] sm:$0xff]  ;;  %v5757_v60 = vld [vmem:[#allocation66_spill] sm:$0xff] }
 0x6a4   :  { %v2252_v4 = vpack.c.bf16 %v2251_v44, %v2251_v44  ;;  %v5758_v44 = vld [vmem:[#allocation67_spill] sm:$0xff] }
 0x6a6   :  { %2286 = vmatmul.mubr.bf16.vlgmr.msra.gmra.mxu0 %v2252_v4  ;;  %2327 = vmatmul.mubr.bf16.vlgmr.msra.gmra.mxu1 %v2252_v4 }
 0x6a7   :  { %2365 = vmatpush1.bf16.msra.mxu0 %v4567_v62  ;;  %2406 = vmatpush1.bf16.msra.mxu1 %v4570_v43  ;;  %v4961_v62 = vld [vmem:[#allocation6 + $0xe4] ss:$16 sps:$4 sm:$0xff]   ;;  %v4964_v43 = vld [vmem:[#allocation6 + $0xec] ss:$16 sps:$4 sm:$0xff]  }
 0x6a8   :  { %2366 = vmatprep.subr.bf16.mxu0 %v4573_v28  ;;  %2407 = vmatprep.subr.bf16.mxu1 %v4576_v34  ;;  %v4967_v28 = vld [vmem:[#allocation6 + $0xe0] ss:$16 sps:$4 sm:$0xff]   ;;  %v4970_v34 = vld [vmem:[#allocation6 + $0xe8] ss:$16 sps:$4 sm:$0xff]  }
 0x6a9   :  { %2396 = vmatprep.mubr.bf16.mxu0 %v5493_v31  ;;  %2437 = vmatprep.mubr.bf16.mxu1 %v5493_v31 }
 0x6ab   :  { %2367 = vmatpush1.bf16.msra.mxu0 %v4581_v49  ;;  %2408 = vmatpush1.bf16.msra.mxu1 %v4584_v24  ;;  %v4973_v49 = vld [vmem:[#allocation6 + $0xc4] ss:$16 sps:$4 sm:$0xff]   ;;  %v4976_v24 = vld [vmem:[#allocation6 + $0xcc] ss:$16 sps:$4 sm:$0xff]  }
 0x6ac   :  { %2368 = vmatprep.subr.bf16.mxu0 %v4587_v57  ;;  %2409 = vmatprep.subr.bf16.mxu1 %v4590_v23  ;;  %v4979_v57 = vld [vmem:[#allocation6 + $0xc0] ss:$16 sps:$4 sm:$0xff]   ;;  %v4982_v23 = vld [vmem:[#allocation6 + $0xc8] ss:$16 sps:$4 sm:$0xff]  }
 0x6af   :  { %2369 = vmatpush1.bf16.msra.mxu0 %v4593_v25  ;;  %2410 = vmatpush1.bf16.msra.mxu1 %v4596_v15  ;;  %v4985_v25 = vld [vmem:[#allocation6 + $0xa4] ss:$16 sps:$4 sm:$0xff]   ;;  %v4988_v15 = vld [vmem:[#allocation6 + $0xac] ss:$16 sps:$4 sm:$0xff]  }
 0x6b0   :  { %2370 = vmatprep.subr.bf16.mxu0 %v4599_v18  ;;  %2411 = vmatprep.subr.bf16.mxu1 %v4602_v26  ;;  %v4991_v18 = vld [vmem:[#allocation6 + $0xa0] ss:$16 sps:$4 sm:$0xff]   ;;  %v4994_v26 = vld [vmem:[#allocation6 + $0xa8] ss:$16 sps:$4 sm:$0xff]  }
 0x6b3   :  { %2371 = vmatpush1.bf16.msra.mxu0 %v4605_v59  ;;  %2412 = vmatpush1.bf16.msra.mxu1 %v4608_v27  ;;  %v4997_v59 = vld [vmem:[#allocation6 + $0x84] ss:$16 sps:$4 sm:$0xff]   ;;  %v5000_v27 = vld [vmem:[#allocation6 + $0x8c] ss:$16 sps:$4 sm:$0xff]  }
 0x6b4   :  { %2372 = vmatprep.subr.bf16.mxu0 %v4611_v29  ;;  %2413 = vmatprep.subr.bf16.mxu1 %v5665_v55  ;;  %v5003_v29 = vld [vmem:[#allocation6 + $0x80] ss:$16 sps:$4 sm:$0xff]  }
 0x6b5   :  { %v5027_v55 = vld [vmem:[#allocation6 + $0x40] ss:$16 sps:$4 sm:$0xff]  }
 0x6b7   :  { %2373 = vmatpush1.bf16.msra.mxu0 %v5666_v53  ;;  %2414 = vmatpush1.bf16.msra.mxu1 %v5667_v22  ;;  %v5030_v53 = vld [vmem:[#allocation6 + $0x48] ss:$16 sps:$4 sm:$0xff]   ;;  %v5033_v22 = vld [vmem:[#allocation6 + $0x24] ss:$16 sps:$4 sm:$0xff]  }
 0x6b8   :  { %2374 = vmatprep.subr.bf16.mxu0 %v5668_v46  ;;  %2415 = vmatprep.subr.bf16.mxu1 %v5669_v21  ;;  %v5036_v46 = vld [vmem:[#allocation6 + $0x2c] ss:$16 sps:$4 sm:$0xff]   ;;  %v5039_v21 = vld [vmem:[#allocation6 + $0x20] ss:$16 sps:$4 sm:$0xff]  }
 0x6bb   :  { %2375 = vmatpush1.bf16.msra.mxu0 %v5670_v54  ;;  %2416 = vmatpush1.bf16.msra.mxu1 %v5671_v14  ;;  %v5042_v54 = vld [vmem:[#allocation6 + $0x28] ss:$16 sps:$4 sm:$0xff]   ;;  %v5045_v14 = vld [vmem:[#allocation6 + $0x4] ss:$16 sps:$4 sm:$0xff]  }
 0x6bc   :  { %2376 = vmatprep.subr.bf16.mxu0 %v5672_v40  ;;  %2417 = vmatprep.subr.bf16.mxu1 %v5673_v56  ;;  %v5048_v40 = vld [vmem:[#allocation6 + $0xc] ss:$16 sps:$4 sm:$0xff]   ;;  %v5051_v56 = vld [vmem:[#allocation6] ss:$16 sps:$4 sm:$0xff]  }
 0x6bf   :  { %2377 = vmatpush1.bf16.msra.mxu0 %v4641_v50  ;;  %2418 = vmatpush1.bf16.msra.mxu1 %v4644_v45  ;;  %v5015_v50 = vld [vmem:[#allocation6 + $0x60] ss:$16 sps:$4 sm:$0xff]   ;;  %v5018_v45 = vld [vmem:[#allocation6 + $0x68] ss:$16 sps:$4 sm:$0xff]  }
 0x6c0   :  { %2378 = vmatprep.subr.bf16.mxu0 %v4647_v36  ;;  %2419 = vmatprep.subr.bf16.mxu1 %v4650_v51  ;;  %v5006_v51 = vld [vmem:[#allocation6 + $0x88] ss:$16 sps:$4 sm:$0xff]   ;;  %v5021_v36 = vld [vmem:[#allocation6 + $0x44] ss:$16 sps:$4 sm:$0xff]  }
 0x6c3   :  { %2379 = vmatpush1.bf16.msra.mxu0 %v4653_v33  ;;  %2420 = vmatpush1.bf16.msra.mxu1 %v4656_v16  ;;  %v5009_v33 = vld [vmem:[#allocation6 + $0x64] ss:$16 sps:$4 sm:$0xff]   ;;  %v5012_v16 = vld [vmem:[#allocation6 + $0x6c] ss:$16 sps:$4 sm:$0xff]  }
 0x6c4   :  { %2475 = vmatprep.subr.bf16.mxu0 %v4961_v62  ;;  %2516 = vmatprep.subr.bf16.mxu1 %v4964_v43 }
 0x6c6   :  { %2397 = vmatmul.mubr.bf16.vlgmr.msra.gmra.mxu0 %v2252_v4  ;;  %2438 = vmatmul.mubr.bf16.vlgmr.msra.gmra.mxu1 %v2252_v4  ;;  %v5759_v4 = vld [vmem:[#allocation68_spill] sm:$0xff] }
 0x6c7   :  { %2476 = vmatpush1.bf16.msra.mxu0 %v4967_v28  ;;  %2517 = vmatpush1.bf16.msra.mxu1 %v4970_v34 }
 0x6c8   :  { %2477 = vmatprep.subr.bf16.mxu0 %v4973_v49  ;;  %2518 = vmatprep.subr.bf16.mxu1 %v4976_v24 }
 0x6cb   :  { %2478 = vmatpush1.bf16.msra.mxu0 %v4979_v57  ;;  %2519 = vmatpush1.bf16.msra.mxu1 %v4982_v23 }
 0x6cc   :  { %2479 = vmatprep.subr.bf16.mxu0 %v4985_v25  ;;  %2520 = vmatprep.subr.bf16.mxu1 %v4988_v15 }
 0x6cf   :  { %2480 = vmatpush1.bf16.msra.mxu0 %v4991_v18  ;;  %2521 = vmatpush1.bf16.msra.mxu1 %v4994_v26 }
 0x6d0   :  { %2481 = vmatprep.subr.bf16.mxu0 %v4997_v59  ;;  %2522 = vmatprep.subr.bf16.mxu1 %v5000_v27 }
 0x6d3   :  { %2482 = vmatpush1.bf16.msra.mxu0 %v5003_v29  ;;  %2523 = vmatpush1.bf16.msra.mxu1 %v5006_v51 }
 0x6d4   :  { %2483 = vmatprep.subr.bf16.mxu0 %v5009_v33  ;;  %2524 = vmatprep.subr.bf16.mxu1 %v5012_v16 }
 0x6d7   :  { %2484 = vmatpush1.bf16.msra.mxu0 %v5015_v50  ;;  %2525 = vmatpush1.bf16.msra.mxu1 %v5018_v45 }
 0x6d8   :  { %2485 = vmatprep.subr.bf16.mxu0 %v5021_v36  ;;  %2526 = vmatprep.subr.bf16.mxu1 %v5024_v39 }
 0x6db   :  { %2486 = vmatpush1.bf16.msra.mxu0 %v5027_v55  ;;  %2527 = vmatpush1.bf16.msra.mxu1 %v5030_v53 }
 0x6dc   :  { %2487 = vmatprep.subr.bf16.mxu0 %v5033_v22  ;;  %2528 = vmatprep.subr.bf16.mxu1 %v5036_v46 }
 0x6df   :  { %2488 = vmatpush1.bf16.msra.mxu0 %v5039_v21  ;;  %2529 = vmatpush1.bf16.msra.mxu1 %v5042_v54 }
 0x6e0   :  { %2489 = vmatprep.subr.bf16.mxu0 %v5045_v14  ;;  %2530 = vmatprep.subr.bf16.mxu1 %v5048_v40 }
 0x6e3   :  { %2490 = vmatpush1.bf16.msra.mxu0 %v5051_v56  ;;  %2531 = vmatpush1.bf16.msra.mxu1 %v5054_v63 }
 0x6e4   :  { %2491 = vmatprep.subr.bf16.mxu0 %v5691_v48  ;;  %2532 = vmatprep.subr.bf16.mxu1 %v5692_v19  ;;  %v5739_v48 = vld [vmem:[#allocation47_spill] sm:$0xff]  ;;  %v5740_v19 = vld [vmem:[#allocation48_spill] sm:$0xff] }
 0x6e7   :  { %2492 = vmatpush2.bf16.msra.mxu0 %v5693_v38  ;;  %2533 = vmatpush2.bf16.msra.mxu1 %v5694_v20  ;;  %v5741_v38 = vld [vmem:[#allocation49_spill] sm:$0xff]  ;;  %v5742_v20 = vld [vmem:[#allocation50_spill] sm:$0xff] }
 0x6e8   :  { %2493 = vmatprep.subr.bf16.mxu0 %v5695_v41  ;;  %2534 = vmatprep.subr.bf16.mxu1 %v5696_v61  ;;  %v5743_v41 = vld [vmem:[#allocation51_spill] sm:$0xff]  ;;  %v5744_v61 = vld [vmem:[#allocation52_spill] sm:$0xff] }
 0x6eb   :  { %2494 = vmatpush2.bf16.msra.mxu0 %v5734_v7  ;;  %2535 = vmatpush2.bf16.msra.mxu1 %v5735_v17  ;;  %v3560_v7 = vld [vmem:[#allocation4 + $0xe4] ss:$16 sps:$4 sm:$0xff]   ;;  %v3561_v17 = vld [vmem:[#allocation4 + $0xec] ss:$16 sps:$4 sm:$0xff]  }
 0x6ec   :  { %2495 = vmatprep.subr.bf16.mxu0 %v5736_v32  ;;  %2536 = vmatprep.subr.bf16.mxu1 %v5737_v8 }
 0x6ef   :  { %2496 = vmatpush2.bf16.msra.mxu0 %v5738_v42  ;;  %2537 = vmatpush2.bf16.msra.mxu1 %v5739_v48  ;;  %v5760_v42 = vld [vmem:[#allocation93_spill] sm:$0xff] }
 0x6f0   :  { %2497 = vmatprep.subr.bf16.mxu0 %v5740_v19  ;;  %2538 = vmatprep.subr.bf16.mxu1 %v5741_v38 }
 0x6f3   :  { %2498 = vmatpush2.bf16.msra.mxu0 %v5742_v20  ;;  %2539 = vmatpush2.bf16.msra.mxu1 %v5743_v41  ;;  %v5761_v41 = vld [vmem:[#allocation31_spill] sm:$0xff] }
 0x6f4   :  { %2499 = vmatprep.subr.bf16.mxu0 %v5744_v61  ;;  %2540 = vmatprep.subr.bf16.mxu1 %v5745_v30 }
 0x6f7   :  { %2500 = vmatpush2.bf16.msra.mxu0 %v5746_v1  ;;  %2541 = vmatpush2.bf16.msra.mxu1 %v5747_v9 }
 0x6f8   :  { %2501 = vmatprep.subr.bf16.mxu0 %v5748_v52  ;;  %2542 = vmatprep.subr.bf16.mxu1 %v5749_v12 }
 0x6fb   :  { %2502 = vmatpush2.bf16.msra.mxu0 %v5750_v47  ;;  %2543 = vmatpush2.bf16.msra.mxu1 %v5751_v11  ;;  %v5762_v47 = vld [vmem:[#allocation95_spill] sm:$0xff] }
 0x6fc   :  { %2503 = vmatprep.subr.bf16.mxu0 %v5752_v35  ;;  %2544 = vmatprep.subr.bf16.mxu1 %v5753_v2 }
 0x6ff   :  { %2504 = vmatpush2.bf16.msra.mxu0 %v5754_v13  ;;  %2545 = vmatpush2.bf16.msra.mxu1 %v5755_v0  ;;  %v5763_v13 = vld [vmem:[#allocation96_spill] sm:$0xff] }
 0x700   :  { %2505 = vmatprep.subr.bf16.mxu0 %v5756_v5  ;;  %2546 = vmatprep.subr.bf16.mxu1 %v5757_v60 }
 0x703   :  { %2506 = vmatpush2.bf16.msra.mxu0 %v5758_v44  ;;  %2547 = vmatpush2.bf16.msra.mxu1 %v5759_v4  ;;  %v5764_v4 = vld [vmem:[#allocation30_spill] sm:$0xff] }
 0x704   :  { %2586 = vmatprep.subr.bf16.mxu0 %v3560_v7  ;;  %2627 = vmatprep.subr.bf16.mxu1 %v3561_v17  ;;  %v5765_v7 = vld [vmem:[#allocation87_spill] sm:$0xff] }
 0x705   :  { %v229_v17 = vadd.f32 %v5765_v7, %v5764_v4 }
 0x766   :  { %v2287_v32 = vpop.f32.mrf.mxu0  ;;  %v2328_v8 = vpop.f32.mrf.mxu1 }
 0x767   :  { %v2288_v48 = vadd.f32 %v2287_v32, %v5760_v42  ;;  %v2329_v0 = vadd.f32 %v2328_v8, %v5763_v13 }
 0x768   :  { %v2289_v19 = vpop.f32.mrf.mxu0  ;;  %v2330_v38 = vpop.f32.mrf.mxu1 }
 0x769   :  { %v3006_v20 = vmul.f32 -1.442695, %v2288_v48  ;;  %v2290_v61 = vadd.f32 %v2289_v19, %v5761_v41  ;;  %v2331_v11 = vadd.f32 %v2330_v38, %v5762_v47 }
 0x76a   :  { %v2291_v30 = vpop.f32.mrf.mxu0  ;;  %v2332_v1 = vpop.f32.mrf.mxu1 }
 0x76b   :  { %3352 = vpow2.f32 %v3006_v20  ;;  %v3008_v9 = vmul.f32 -1.442695, %v2290_v61  ;;  %v3007_v35 = vmul.f32 -1.442695, %v2331_v11  ;;  %v5766_v20 = vld [vmem:[#allocation89_spill] sm:$0xff] }
 0x76c   :  { %v2292_v52 = vpop.f32.mrf.mxu0  ;;  %v2333_v12 = vpop.f32.mrf.mxu1  ;;  %v231_v38 = vadd.f32 %v5766_v20, %v4237_v37 }
 0x76d   :  { %3354 = vpow2.f32 %v3008_v9 }
 0x76e   :  { %3356 = vpow2.f32 %v3007_v35 }
 0x778   :  { %v3353_v2 = vpop.eup %3352 }
 0x779   :  { %v2338_v5 = vadd.f32 1.0, %v3353_v2 }
 0x77a   :  { %v3355_v60 = vpop.eup %3354 }
 0x77b   :  { %3358 = vrcp.f32 %v2338_v5  ;;  %v2351_v44 = vadd.f32 1.0, %v3355_v60  ;;  %v3357_v19 = vpop.eup %3356 }
 0x77c   :  { %3360 = vtanh.f32 %v2329_v0  ;;  %v2345_v35 = vadd.f32 1.0, %v3357_v19  ;;  %v5768_v19 = vld [vmem:[#allocation86_spill] sm:$0xff] }
 0x77d   :  { %3362 = vrcp.f32 %v2351_v44 }
 0x786   :  { %v2398_v32 = vpop.f32.mrf.mxu0  ;;  %v2439_v48 = vpop.f32.mrf.mxu1 }
 0x787   :  { %v2446_v61 = vadd.f32 %v2398_v32, %v229_v17  ;;  %v5767_v17 = vld [vmem:[#allocation88_spill] sm:$0xff] }
 0x788   :  { %v3359_v30 = vpop.eup %3358  ;;  %v2400_v1 = vpop.f32.mrf.mxu0  ;;  %v304_v32 = vadd.f32 %v5767_v17, %v3913_v6 }
 0x789   :  { %v2441_v8 = vpop.f32.mrf.mxu1  ;;  %v3361_v9 = vpop.eup %3360  ;;  %v3009_v52 = vmul.f32 -1.442695, %v2446_v61  ;;  %v2447_v12 = vadd.f32 %v2400_v1, %v231_v38  ;;  %v302_v61 = vadd.f32 %v5768_v19, %v3920_v10 }
 0x78a   :  { %v3363_v11 = vpop.eup %3362  ;;  %v2402_v2 = vpop.f32.mrf.mxu0  ;;  %v2355_v5 = vmul.f32 %v3361_v9, %v3359_v30  ;;  %v2449_v38 = vadd.f32 %v2441_v8, %v304_v32 }
 0x78b   :  { %v2443_v0 = vpop.f32.mrf.mxu1  ;;  %v2354_v60 = vmul.f32 %v3363_v11, %v4918_v3  ;;  %3364 = vpow2.f32 %v3009_v52  ;;  %v3011_v44 = vmul.f32 -1.442695, %v2447_v12  ;;  %v2448_v30 = vadd.f32 %v2439_v48, %v302_v61 }
 0x78c   :  { %v2403_v7 = vpop.f32.mrf.mxu0  ;;  %v3010_v1 = vmul.f32 -1.442695, %v2449_v38 }
 0x78d   :  { %v2444_v4 = vpop.f32.mrf.mxu1  ;;  %3366 = vpow2.f32 %v3011_v44  ;;  %v5098_v20 = vadd.f32 %v2355_v5, %v2354_v60 }
 0x78e   :  { %3368 = vrcp.f32 %v2345_v35 }
 0x78f   :  { %3370 = vtanh.f32 %v5098_v20 }
 0x790   :  { %3372 = vtanh.f32 %v2448_v30  ;;  %v3562_v30 = vld [vmem:[#allocation4 + $0xe0] ss:$16 sps:$4 sm:$0xff]  }
 0x791   :  { %3374 = vpow2.f32 %v3010_v1  ;;  %v3563_v1 = vld [vmem:[#allocation4 + $0xe8] ss:$16 sps:$4 sm:$0xff]  }
 0x798   :  { %v3365_v3 = vpop.eup %3364 }
 0x799   :  { %v2453_v9 = vadd.f32 1.0, %v3365_v3  ;;  %v3564_v3 = vld [vmem:[#allocation4 + $0xc4] ss:$16 sps:$4 sm:$0xff]  }
 0x79a   :  { %v3367_v52 = vpop.eup %3366 }
 0x79b   :  { %v3369_v4 = vpop.eup %3368  ;;  %3376 = vrcp.f32 %v2453_v9  ;;  %v2466_v12 = vadd.f32 1.0, %v3367_v52  ;;  %v3566_v9 = vld [vmem:[#allocation4 + $0xc0] ss:$16 sps:$4 sm:$0xff]   ;;  %v3567_v52 = vld [vmem:[#allocation4 + $0xc8] ss:$16 sps:$4 sm:$0xff]  }
 0x79c   :  { %v3371_v11 = vpop.eup %3370 }
 0x79d   :  { %3378 = vrcp.f32 %v2466_v12  ;;  %v2358_v35 = vmul.f32 %v3371_v11, %v3369_v4  ;;  %v3373_v8 = vpop.eup %3372  ;;  %v3568_v4 = vld [vmem:[#allocation4 + $0xa4] ss:$16 sps:$4 sm:$0xff]   ;;  %v3569_v12 = vld [vmem:[#allocation4 + $0xac] ss:$16 sps:$4 sm:$0xff]   ;;  %v3570_v11 = vld [vmem:[#allocation4 + $0xa0] ss:$16 sps:$4 sm:$0xff]  }
 0x79e   :  { %v3375_v0 = vpop.eup %3374 }
 0x79f   :  { %v2359_v2 = vpack.c.bf16 %v2358_v35, %v2358_v35  ;;  %v2460_v44 = vadd.f32 1.0, %v3375_v0  ;;  %v3571_v35 = vld [vmem:[#allocation4 + $0xa8] ss:$16 sps:$4 sm:$0xff]   ;;  %v3574_v0 = vld [vmem:[#allocation4 + $0x80] ss:$16 sps:$4 sm:$0xff]  }
 0x7a1   :  { %2507 = vmatprep.mubr.bf16.mxu0 %v2359_v2  ;;  %2548 = vmatprep.mubr.bf16.mxu1 %v2359_v2  ;;  %3380 = vrcp.f32 %v2460_v44  ;;  %v3572_v2 = vld [vmem:[#allocation4 + $0x84] ss:$16 sps:$4 sm:$0xff]   ;;  %v3579_v44 = vld [vmem:[#allocation4 + $0x68] ss:$16 sps:$4 sm:$0xff]  }
 0x7a8   :  { %v3377_v5 = vpop.eup %3376 }
 0x7a9   :  { %v2470_v60 = vmul.f32 %v3377_v5, %v3373_v8  ;;  %v3573_v8 = vld [vmem:[#allocation4 + $0x8c] ss:$16 sps:$4 sm:$0xff]   ;;  %v3575_v5 = vld [vmem:[#allocation4 + $0x88] ss:$16 sps:$4 sm:$0xff]  }
 0x7aa   :  { %v3379_v48 = vpop.eup %3378 }
 0x7ab   :  { %v2469_v7 = vmul.f32 %v3379_v48, %v4926_v58  ;;  %v3565_v58 = vld [vmem:[#allocation4 + $0xcc] ss:$16 sps:$4 sm:$0xff]   ;;  %v3578_v48 = vld [vmem:[#allocation4 + $0x60] ss:$16 sps:$4 sm:$0xff]  }
 0x7ad   :  { %v5106_v17 = vadd.f32 %v2470_v60, %v2469_v7  ;;  %v3577_v60 = vld [vmem:[#allocation4 + $0x6c] ss:$16 sps:$4 sm:$0xff]   ;;  %v3580_v7 = vld [vmem:[#allocation4 + $0x44] ss:$16 sps:$4 sm:$0xff]  }
 0x7ae   :  { %v3381_v32 = vpop.eup %3380 }
 0x7af   :  { %3382 = vtanh.f32 %v5106_v17 }
 0x7bc   :  { %v3383_v38 = vpop.eup %3382 }
 0x7bd   :  { %v2473_v19 = vmul.f32 %v3383_v38, %v3381_v32  ;;  %v3581_v32 = vld [vmem:[#allocation4 + $0x4c] ss:$16 sps:$4 sm:$0xff]   ;;  %v3582_v38 = vld [vmem:[#allocation4 + $0x40] ss:$16 sps:$4 sm:$0xff]  }
 0x7bf   :  { %v5109_v61 = vpack.c.bf16 %v2473_v19, %v2473_v19  ;;  %v3583_v19 = vld [vmem:[#allocation4 + $0x48] ss:$16 sps:$4 sm:$0xff]  }
 0x7c1   :  { %2508 = vmatmul.mubr.bf16.vlgmr.msra.gmra.mxu0 %v5109_v61  ;;  %2549 = vmatmul.mubr.bf16.vlgmr.msra.gmra.mxu1 %v5109_v61 }
 0x7c2   :  { %2587 = vmatpush1.bf16.msra.mxu0 %v3562_v30  ;;  %2628 = vmatpush1.bf16.msra.mxu1 %v3563_v1  ;;  %v3584_v30 = vld [vmem:[#allocation4 + $0x24] ss:$16 sps:$4 sm:$0xff]   ;;  %v3585_v1 = vld [vmem:[#allocation4 + $0x2c] ss:$16 sps:$4 sm:$0xff]  }
 0x7c3   :  { %2588 = vmatprep.subr.bf16.mxu0 %v3564_v3  ;;  %2629 = vmatprep.subr.bf16.mxu1 %v3565_v58  ;;  %v3586_v3 = vld [vmem:[#allocation4 + $0x20] ss:$16 sps:$4 sm:$0xff]   ;;  %v3587_v58 = vld [vmem:[#allocation4 + $0x28] ss:$16 sps:$4 sm:$0xff]  }
 0x7c4   :  { %2618 = vmatprep.mubr.bf16.mxu0 %v5493_v31  ;;  %2659 = vmatprep.mubr.bf16.mxu1 %v5493_v31  ;;  %v3576_v31 = vld [vmem:[#allocation4 + $0x64] ss:$16 sps:$4 sm:$0xff]  }
 0x7c6   :  { %2589 = vmatpush1.bf16.msra.mxu0 %v3566_v9  ;;  %2630 = vmatpush1.bf16.msra.mxu1 %v3567_v52  ;;  %v3588_v9 = vld [vmem:[#allocation4 + $0x4] ss:$16 sps:$4 sm:$0xff]   ;;  %v3589_v52 = vld [vmem:[#allocation4 + $0xc] ss:$16 sps:$4 sm:$0xff]  }
 0x7c7   :  { %2590 = vmatprep.subr.bf16.mxu0 %v3568_v4  ;;  %2631 = vmatprep.subr.bf16.mxu1 %v3569_v12  ;;  %v3590_v4 = vld [vmem:[#allocation4] ss:$16 sps:$4 sm:$0xff]   ;;  %v3591_v12 = vld [vmem:[#allocation4 + $0x8] ss:$16 sps:$4 sm:$0xff]  }
 0x7ca   :  { %2591 = vmatpush1.bf16.msra.mxu0 %v3570_v11  ;;  %2632 = vmatpush1.bf16.msra.mxu1 %v3571_v35 }
 0x7cb   :  { %2592 = vmatprep.subr.bf16.mxu0 %v3572_v2  ;;  %2633 = vmatprep.subr.bf16.mxu1 %v3573_v8 }
 0x7ce   :  { %2593 = vmatpush1.bf16.msra.mxu0 %v3574_v0  ;;  %2634 = vmatpush1.bf16.msra.mxu1 %v3575_v5 }
 0x7cf   :  { %2594 = vmatprep.subr.bf16.mxu0 %v3576_v31  ;;  %2635 = vmatprep.subr.bf16.mxu1 %v3577_v60 }
 0x7d2   :  { %2595 = vmatpush1.bf16.msra.mxu0 %v3578_v48  ;;  %2636 = vmatpush1.bf16.msra.mxu1 %v3579_v44 }
 0x7d3   :  { %2596 = vmatprep.subr.bf16.mxu0 %v3580_v7  ;;  %2637 = vmatprep.subr.bf16.mxu1 %v3581_v32 }
 0x7d6   :  { %2597 = vmatpush1.bf16.msra.mxu0 %v3582_v38  ;;  %2638 = vmatpush1.bf16.msra.mxu1 %v3583_v19 }
 0x7d7   :  { %2598 = vmatprep.subr.bf16.mxu0 %v3584_v30  ;;  %2639 = vmatprep.subr.bf16.mxu1 %v3585_v1 }
 0x7da   :  { %2599 = vmatpush1.bf16.msra.mxu0 %v3586_v3  ;;  %2640 = vmatpush1.bf16.msra.mxu1 %v3587_v58 }
 0x7db   :  { %2600 = vmatprep.subr.bf16.mxu0 %v3588_v9  ;;  %2641 = vmatprep.subr.bf16.mxu1 %v3589_v52  ;;  %v5769_v9 = vld [vmem:[#allocation30_spill] sm:$0xff]  ;;  %v5770_v52 = vld [vmem:[#allocation91_spill] sm:$0xff] }
 0x7de   :  { %2601 = vmatpush1.bf16.msra.mxu0 %v3590_v4  ;;  %2642 = vmatpush1.bf16.msra.mxu1 %v3591_v12  ;;  %v233_v4 = vadd.f32 %v5770_v52, %v5769_v9 }
 0x7df   :  { %2697 = vmatprep.subr.bf16.mxu0 %v4961_v62  ;;  %2738 = vmatprep.subr.bf16.mxu1 %v4964_v43  ;;  %v3592_v62 = vld [vmem:[#allocation6 + $0x1e4] ss:$16 sps:$4 sm:$0xff]   ;;  %v3593_v43 = vld [vmem:[#allocation6 + $0x1ec] ss:$16 sps:$4 sm:$0xff]  }
 0x7e1   :  { %2619 = vmatmul.mubr.bf16.vlgmr.msra.gmra.mxu0 %v5109_v61  ;;  %2660 = vmatmul.mubr.bf16.vlgmr.msra.gmra.mxu1 %v5109_v61 }
 0x7e2   :  { %2698 = vmatpush1.bf16.msra.mxu0 %v4967_v28  ;;  %2739 = vmatpush1.bf16.msra.mxu1 %v4970_v34  ;;  %v3594_v28 = vld [vmem:[#allocation6 + $0x1e0] ss:$16 sps:$4 sm:$0xff]   ;;  %v3595_v34 = vld [vmem:[#allocation6 + $0x1e8] ss:$16 sps:$4 sm:$0xff]  }
 0x7e3   :  { %2699 = vmatprep.subr.bf16.mxu0 %v4973_v49  ;;  %2740 = vmatprep.subr.bf16.mxu1 %v4976_v24  ;;  %v3596_v49 = vld [vmem:[#allocation6 + $0x1c4] ss:$16 sps:$4 sm:$0xff]   ;;  %v3597_v24 = vld [vmem:[#allocation6 + $0x1cc] ss:$16 sps:$4 sm:$0xff]  }
 0x7e6   :  { %2700 = vmatpush1.bf16.msra.mxu0 %v4979_v57  ;;  %2741 = vmatpush1.bf16.msra.mxu1 %v4982_v23  ;;  %v3598_v57 = vld [vmem:[#allocation6 + $0x1c0] ss:$16 sps:$4 sm:$0xff]   ;;  %v3599_v23 = vld [vmem:[#allocation6 + $0x1c8] ss:$16 sps:$4 sm:$0xff]  }
 0x7e7   :  { %2701 = vmatprep.subr.bf16.mxu0 %v4985_v25  ;;  %2742 = vmatprep.subr.bf16.mxu1 %v4988_v15  ;;  %v3600_v25 = vld [vmem:[#allocation6 + $0x1a4] ss:$16 sps:$4 sm:$0xff]   ;;  %v3601_v15 = vld [vmem:[#allocation6 + $0x1ac] ss:$16 sps:$4 sm:$0xff]  }
 0x7ea   :  { %2702 = vmatpush1.bf16.msra.mxu0 %v4991_v18  ;;  %2743 = vmatpush1.bf16.msra.mxu1 %v4994_v26  ;;  %v3602_v18 = vld [vmem:[#allocation6 + $0x1a0] ss:$16 sps:$4 sm:$0xff]   ;;  %v3603_v26 = vld [vmem:[#allocation6 + $0x1a8] ss:$16 sps:$4 sm:$0xff]  }
 0x7eb   :  { %2703 = vmatprep.subr.bf16.mxu0 %v4997_v59  ;;  %2744 = vmatprep.subr.bf16.mxu1 %v5000_v27  ;;  %v3604_v59 = vld [vmem:[#allocation6 + $0x184] ss:$16 sps:$4 sm:$0xff]   ;;  %v3605_v27 = vld [vmem:[#allocation6 + $0x18c] ss:$16 sps:$4 sm:$0xff]  }
 0x7ee   :  { %2704 = vmatpush1.bf16.msra.mxu0 %v5003_v29  ;;  %2745 = vmatpush1.bf16.msra.mxu1 %v5006_v51  ;;  %v3606_v29 = vld [vmem:[#allocation6 + $0x180] ss:$16 sps:$4 sm:$0xff]   ;;  %v3607_v51 = vld [vmem:[#allocation6 + $0x188] ss:$16 sps:$4 sm:$0xff]  }
 0x7ef   :  { %2705 = vmatprep.subr.bf16.mxu0 %v5009_v33  ;;  %2746 = vmatprep.subr.bf16.mxu1 %v5012_v16  ;;  %v3608_v33 = vld [vmem:[#allocation6 + $0x164] ss:$16 sps:$4 sm:$0xff]   ;;  %v3609_v16 = vld [vmem:[#allocation6 + $0x16c] ss:$16 sps:$4 sm:$0xff]  }
 0x7f2   :  { %2706 = vmatpush1.bf16.msra.mxu0 %v5015_v50  ;;  %2747 = vmatpush1.bf16.msra.mxu1 %v5018_v45  ;;  %v3610_v50 = vld [vmem:[#allocation6 + $0x160] ss:$16 sps:$4 sm:$0xff]   ;;  %v3611_v45 = vld [vmem:[#allocation6 + $0x168] ss:$16 sps:$4 sm:$0xff]  }
 0x7f3   :  { %2707 = vmatprep.subr.bf16.mxu0 %v5021_v36  ;;  %2748 = vmatprep.subr.bf16.mxu1 %v5024_v39  ;;  %v3612_v36 = vld [vmem:[#allocation6 + $0x144] ss:$16 sps:$4 sm:$0xff]   ;;  %v3613_v39 = vld [vmem:[#allocation6 + $0x14c] ss:$16 sps:$4 sm:$0xff]  }
 0x7f6   :  { %2708 = vmatpush1.bf16.msra.mxu0 %v5027_v55  ;;  %2749 = vmatpush1.bf16.msra.mxu1 %v5030_v53  ;;  %v3614_v55 = vld [vmem:[#allocation6 + $0x140] ss:$16 sps:$4 sm:$0xff]   ;;  %v3615_v53 = vld [vmem:[#allocation6 + $0x148] ss:$16 sps:$4 sm:$0xff]  }
 0x7f7   :  { %2709 = vmatprep.subr.bf16.mxu0 %v5033_v22  ;;  %2750 = vmatprep.subr.bf16.mxu1 %v5036_v46  ;;  %v3616_v22 = vld [vmem:[#allocation6 + $0x124] ss:$16 sps:$4 sm:$0xff]   ;;  %v3617_v46 = vld [vmem:[#allocation6 + $0x12c] ss:$16 sps:$4 sm:$0xff]  }
 0x7fa   :  { %2710 = vmatpush1.bf16.msra.mxu0 %v5039_v21  ;;  %2751 = vmatpush1.bf16.msra.mxu1 %v5042_v54  ;;  %v3618_v21 = vld [vmem:[#allocation6 + $0x120] ss:$16 sps:$4 sm:$0xff]   ;;  %v3619_v54 = vld [vmem:[#allocation6 + $0x128] ss:$16 sps:$4 sm:$0xff]  }
 0x7fb   :  { %2711 = vmatprep.subr.bf16.mxu0 %v5045_v14  ;;  %2752 = vmatprep.subr.bf16.mxu1 %v5048_v40  ;;  %v3620_v14 = vld [vmem:[#allocation6 + $0x104] ss:$16 sps:$4 sm:$0xff]   ;;  %v3621_v40 = vld [vmem:[#allocation6 + $0x10c] ss:$16 sps:$4 sm:$0xff]  }
 0x7fe   :  { %2712 = vmatpush1.bf16.msra.mxu0 %v5051_v56  ;;  %2753 = vmatpush1.bf16.msra.mxu1 %v5054_v63  ;;  %v3622_v56 = vld [vmem:[#allocation6 + $0x100] ss:$16 sps:$4 sm:$0xff]   ;;  %v3623_v63 = vld [vmem:[#allocation6 + $0x108] ss:$16 sps:$4 sm:$0xff]  }
 0x7ff   :  { %2713 = vmatprep.subr.bf16.mxu0 %v3592_v62  ;;  %2754 = vmatprep.subr.bf16.mxu1 %v3593_v43 }
 0x802   :  { %2714 = vmatpush2.bf16.msra.mxu0 %v3594_v28  ;;  %2755 = vmatpush2.bf16.msra.mxu1 %v3595_v34  ;;  %v5771_v28 = vld [vmem:[#allocation94_spill] sm:$0xff] }
 0x803   :  { %2715 = vmatprep.subr.bf16.mxu0 %v3596_v49  ;;  %2756 = vmatprep.subr.bf16.mxu1 %v3597_v24  ;;  %v235_v34 = vadd.f32 %v5771_v28, %v4237_v37 }
 0x806   :  { %2716 = vmatpush2.bf16.msra.mxu0 %v3598_v57  ;;  %2757 = vmatpush2.bf16.msra.mxu1 %v3599_v23 }
 0x807   :  { %2717 = vmatprep.subr.bf16.mxu0 %v3600_v25  ;;  %2758 = vmatprep.subr.bf16.mxu1 %v3601_v15 }
 0x80a   :  { %2718 = vmatpush2.bf16.msra.mxu0 %v3602_v18  ;;  %2759 = vmatpush2.bf16.msra.mxu1 %v3603_v26 }
 0x80b   :  { %2719 = vmatprep.subr.bf16.mxu0 %v3604_v59  ;;  %2760 = vmatprep.subr.bf16.mxu1 %v3605_v27 }
 0x80e   :  { %2720 = vmatpush2.bf16.msra.mxu0 %v3606_v29  ;;  %2761 = vmatpush2.bf16.msra.mxu1 %v3607_v51 }
 0x80f   :  { %2721 = vmatprep.subr.bf16.mxu0 %v3608_v33  ;;  %2762 = vmatprep.subr.bf16.mxu1 %v3609_v16 }
 0x812   :  { %2722 = vmatpush2.bf16.msra.mxu0 %v3610_v50  ;;  %2763 = vmatpush2.bf16.msra.mxu1 %v3611_v45 }
 0x813   :  { %2723 = vmatprep.subr.bf16.mxu0 %v3612_v36  ;;  %2764 = vmatprep.subr.bf16.mxu1 %v3613_v39  ;;  %v5772_v36 = vld [vmem:[#allocation92_spill] sm:$0xff] }
 0x814   :  { %v308_v39 = vadd.f32 %v5772_v36, %v3913_v6 }
 0x816   :  { %2724 = vmatpush2.bf16.msra.mxu0 %v3614_v55  ;;  %2765 = vmatpush2.bf16.msra.mxu1 %v3615_v53  ;;  %v5773_v53 = vld [vmem:[#allocation90_spill] sm:$0xff] }
 0x817   :  { %2725 = vmatprep.subr.bf16.mxu0 %v3616_v22  ;;  %2766 = vmatprep.subr.bf16.mxu1 %v3617_v46  ;;  %v306_v22 = vadd.f32 %v5773_v53, %v3920_v10 }
 0x81a   :  { %2726 = vmatpush2.bf16.msra.mxu0 %v3618_v21  ;;  %2767 = vmatpush2.bf16.msra.mxu1 %v3619_v54 }
 0x81b   :  { %2727 = vmatprep.subr.bf16.mxu0 %v3620_v14  ;;  %2768 = vmatprep.subr.bf16.mxu1 %v3621_v40 }
 0x81e   :  { %2728 = vmatpush2.bf16.msra.mxu0 %v3622_v56  ;;  %2769 = vmatpush2.bf16.msra.mxu1 %v3623_v63 }
 0x881   :  { %v2509_v61 = vpop.f32.mrf.mxu0  ;;  %v2550_v11 = vpop.f32.mrf.mxu1 }
 0x882   :  { %v2510_v35 = vadd.f32 %v2509_v61, %v5760_v42  ;;  %v2551_v30 = vadd.f32 %v2550_v11, %v5763_v13 }
 0x883   :  { %v2511_v2 = vpop.f32.mrf.mxu0  ;;  %v2552_v8 = vpop.f32.mrf.mxu1 }
 0x884   :  { %v3012_v0 = vmul.f32 -1.442695, %v2510_v35  ;;  %v2512_v5 = vadd.f32 %v2511_v2, %v5761_v41  ;;  %v2553_v32 = vadd.f32 %v2552_v8, %v5762_v47 }
 0x885   :  { %v2513_v31 = vpop.f32.mrf.mxu0  ;;  %v2554_v60 = vpop.f32.mrf.mxu1 }
 0x886   :  { %3384 = vpow2.f32 %v3012_v0  ;;  %v3014_v48 = vmul.f32 -1.442695, %v2512_v5  ;;  %v3013_v38 = vmul.f32 -1.442695, %v2553_v32 }
 0x887   :  { %v2514_v44 = vpop.f32.mrf.mxu0  ;;  %v2555_v7 = vpop.f32.mrf.mxu1 }
 0x888   :  { %3386 = vpow2.f32 %v3014_v48 }
 0x889   :  { %3388 = vpow2.f32 %v3013_v38 }
 0x893   :  { %v3385_v19 = vpop.eup %3384 }
 0x894   :  { %v2560_v1 = vadd.f32 1.0, %v3385_v19 }
 0x895   :  { %v3387_v3 = vpop.eup %3386 }
 0x896   :  { %3390 = vrcp.f32 %v2560_v1  ;;  %v2573_v58 = vadd.f32 1.0, %v3387_v3  ;;  %v3389_v43 = vpop.eup %3388 }
 0x897   :  { %3392 = vtanh.f32 %v2551_v30  ;;  %v2567_v59 = vadd.f32 1.0, %v3389_v43 }
 0x898   :  { %3394 = vrcp.f32 %v2573_v58 }
 0x8a1   :  { %v2620_v12 = vpop.f32.mrf.mxu0  ;;  %v2661_v62 = vpop.f32.mrf.mxu1 }
 0x8a2   :  { %v2668_v49 = vadd.f32 %v2620_v12, %v233_v4  ;;  %v2670_v46 = vadd.f32 %v2661_v62, %v306_v22 }
 0x8a3   :  { %v3391_v24 = vpop.eup %3390  ;;  %v2622_v57 = vpop.f32.mrf.mxu0 }
 0x8a4   :  { %v2663_v23 = vpop.f32.mrf.mxu1  ;;  %v3393_v25 = vpop.eup %3392  ;;  %v3015_v15 = vmul.f32 -1.442695, %v2668_v49  ;;  %v2669_v18 = vadd.f32 %v2622_v57, %v235_v34 }
 0x8a5   :  { %v3395_v26 = vpop.eup %3394  ;;  %v2624_v27 = vpop.f32.mrf.mxu0  ;;  %v2577_v51 = vmul.f32 %v3393_v25, %v3391_v24  ;;  %v2671_v55 = vadd.f32 %v2663_v23, %v308_v39 }
 0x8a6   :  { %v2665_v29 = vpop.f32.mrf.mxu1  ;;  %v2576_v33 = vmul.f32 %v3395_v26, %v5098_v20  ;;  %3396 = vpow2.f32 %v3015_v15  ;;  %v3017_v16 = vmul.f32 -1.442695, %v2669_v18  ;;  %v3021_v27 = vld [vmem:[%s5183_s6] ss:$0 sm:$0xff] }
 0x8a7   :  { %v2625_v50 = vpop.f32.mrf.mxu0  ;;  %v3016_v21 = vmul.f32 -1.442695, %v2671_v55 }
 0x8a8   :  { %v2666_v45 = vpop.f32.mrf.mxu1  ;;  %3398 = vpow2.f32 %v3017_v16  ;;  %v5158_v37 = vadd.f32 %v2577_v51, %v2576_v33  ;;  %v3022_v33 = vld [vmem:[#allocation3] ss:$0 sm:$0xff] }
 0x8a9   :  { %3400 = vrcp.f32 %v2567_v59 }
 0x8aa   :  { %3402 = vtanh.f32 %v5158_v37 }
 0x8ab   :  { %3404 = vtanh.f32 %v2670_v46 }
 0x8ac   :  { %3406 = vpow2.f32 %v3016_v21 }
 0x8b3   :  { %v3397_v20 = vpop.eup %3396 }
 0x8b4   :  { %v2675_v54 = vadd.f32 1.0, %v3397_v20 }
 0x8b5   :  { %v3399_v14 = vpop.eup %3398 }
 0x8b6   :  { %v3401_v40 = vpop.eup %3400  ;;  %3408 = vrcp.f32 %v2675_v54  ;;  %v2688_v56 = vadd.f32 1.0, %v3399_v14 }
 0x8b7   :  { %v3403_v63 = vpop.eup %3402 }
 0x8b8   :  { %3410 = vrcp.f32 %v2688_v56  ;;  %v2580_v61 = vmul.f32 %v3403_v63, %v3401_v40  ;;  %v3405_v6 = vpop.eup %3404 }
 0x8b9   :  { %v3407_v35 = vpop.eup %3406 }
 0x8ba   :  { %v2581_v11 = vpack.c.bf16 %v2580_v61, %v2580_v61  ;;  %v2682_v0 = vadd.f32 1.0, %v3407_v35 }
 0x8bc   :  { %2729 = vmatprep.mubr.bf16.mxu0 %v2581_v11  ;;  %2770 = vmatprep.mubr.bf16.mxu1 %v2581_v11  ;;  %3412 = vrcp.f32 %v2682_v0 }
 0x8c3   :  { %v3409_v2 = vpop.eup %3408 }
 0x8c4   :  { %v2692_v10 = vmul.f32 %v3409_v2, %v3405_v6 }
 0x8c5   :  { %v3411_v8 = vpop.eup %3410 }
 0x8c6   :  { %v2691_v5 = vmul.f32 %v3411_v8, %v5106_v17 }
 0x8c8   :  { %v2693_v31 = vadd.f32 %v2692_v10, %v2691_v5 }
 0x8c9   :  { %v3413_v60 = vpop.eup %3412 }
 0x8ca   :  { %3414 = vtanh.f32 %v2693_v31 }
 0x8d7   :  { %v3415_v48 = vpop.eup %3414 }
 0x8d8   :  { %v2695_v44 = vmul.f32 %v3415_v48, %v3413_v60 }
 0x8da   :  { %v2696_v7 = vpack.c.bf16 %v2695_v44, %v2695_v44 }
 0x8dc   :  { %2730 = vmatmul.mubr.bf16.vlgmr.msra.gmra.mxu0 %v2696_v7  ;;  %2771 = vmatmul.mubr.bf16.vlgmr.msra.gmra.mxu1 %v2696_v7 }
 0x99c   :  { %v2731_v32 = vpop.f32.mrf.mxu0  ;;  %v2772_v38 = vpop.f32.mrf.mxu1 }
 0x99d   :  { %v2732_v19 = vadd.f32 %v2731_v32, %v5760_v42  ;;  %v2773_v34 = vadd.f32 %v2772_v38, %v5763_v13 }
 0x99e   :  { %v2733_v30 = vpop.f32.mrf.mxu0  ;;  %v2774_v1 = vpop.f32.mrf.mxu1 }
 0x99f   :  { %v3018_v3 = vmul.f32 -1.442695, %v2732_v19  ;;  %v2734_v58 = vadd.f32 %v2733_v30, %v5761_v41  ;;  %v2775_v62 = vadd.f32 %v2774_v1, %v5762_v47 }
 0x9a0   :  { %v2735_v9 = vpop.f32.mrf.mxu0  ;;  %v2776_v17 = vpop.f32.mrf.mxu1 }
 0x9a1   :  { %3416 = vpow2.f32 %v3018_v3  ;;  %v3020_v52 = vmul.f32 -1.442695, %v2734_v58  ;;  %v3019_v43 = vmul.f32 -1.442695, %v2775_v62 }
 0x9a2   :  { %v2736_v4 = vpop.f32.mrf.mxu0  ;;  %v2777_v12 = vpop.f32.mrf.mxu1 }
 0x9a3   :  { %3418 = vpow2.f32 %v3020_v52 }
 0x9a4   :  { %3420 = vpow2.f32 %v3019_v43 }
 0x9ae   :  { %v3417_v28 = vpop.eup %3416 }
 0x9af   :  { %v2782_v49 = vadd.f32 1.0, %v3417_v28 }
 0x9b0   :  { %v3419_v42 = vpop.eup %3418 }
 0x9b1   :  { %3422 = vrcp.f32 %v2782_v49  ;;  %v2795_v24 = vadd.f32 1.0, %v3419_v42  ;;  %v3421_v41 = vpop.eup %3420 }
 0x9b2   :  { %3424 = vtanh.f32 %v2773_v34  ;;  %v2789_v15 = vadd.f32 1.0, %v3421_v41 }
 0x9b3   :  { %3426 = vrcp.f32 %v2795_v24 }
 0x9b4   :  { %3428 = vrcp.f32 %v2789_v15 }
 0x9be   :  { %v3423_v57 = vpop.eup %3422 }
 0x9bf   :  { %v3425_v23 = vpop.eup %3424 }
 0x9c0   :  { %v3427_v25 = vpop.eup %3426  ;;  %v2799_v18 = vmul.f32 %v3425_v23, %v3423_v57 }
 0x9c1   :  { %v2798_v26 = vmul.f32 %v3427_v25, %v5158_v37  ;;  %v3429_v59 = vpop.eup %3428 }
 0x9c3   :  { %v2800_v47 = vadd.f32 %v2799_v18, %v2798_v26 }
 0x9c5   :  { %3430 = vtanh.f32 %v2800_v47 }
 0x9d2   :  { %v3431_v13 = vpop.eup %3430 }
 0x9d3   :  { %v2802_v29 = vmul.f32 %v3431_v13, %v3429_v59 }
 0x9d5   :  { %v2810_v51 = vmul.f32 %v3021_v27, %v2802_v29 }
 0x9d7   :  { %2811 = vadd.xlane.f32.xlu0 %v2810_v51 }
 0xa60   :  { %v2812_v16 = vpop.xlane.xlu0 %2811 }
 0xa61   :  { %v2820_v50 = vadd.f32 %v3022_v33, %v2812_v16 }
 0xa63   :  { %2822 = vst.msk [vmem:[%s5185_s8] sm:$0xff] %vm2821_vm2, %v2820_v50 }
 0xa64   :  { %2827 = vsyncpa [#allocation5], 1 }
 0xa65   :  { %2828 = vsyncpa [#allocation7], 1 }

</bundles_post_ra>
